<compile_context>
chip_gen: v7x
topology: tpu7x:2x2x1
jax: 0.10.0
libtpu: 0.0.40
codegen_flags: <defaults>
</compile_context>

<pallas_src>
import jax
import jax.numpy as jnp
from jax.experimental import pallas as pl
from jax.experimental.pallas import tpu as pltpu

# ---------------------------------------------------------------------------
# Scaled-down BART config (bart-large is d_model=1024, 12+12 layers, vocab=50265)
# ---------------------------------------------------------------------------
VOCAB = 64
D_MODEL = 32
N_HEADS = 4
HEAD_DIM = D_MODEL // N_HEADS
FFN = 64
N_ENC_LAYERS = 2
N_DEC_LAYERS = 2
MAX_POS = 32
POS_OFFSET = 2              # BartLearnedPositionalEmbedding offset
LN_EPS = 1e-5
MASK_MIN = float(jnp.finfo(jnp.float32).min)
ATTN_SCALE = HEAD_DIM ** -0.5

# Toy-scale limit; at bart-large scale raise on v5e/v6e (128 MiB physical) and
# re-derive tile sizes on v7x (64 MiB physical).
VMEM_LIMIT_BYTES = 32 * 1024 * 1024


# ---------------------------------------------------------------------------
# In-kernel helpers (pure functions on jnp values)
# ---------------------------------------------------------------------------
def _gelu(x):
    # exact (erf) gelu, matching torch.nn.functional.gelu default
    # (tanh approximation would move this to the EUP slot; kept exact for parity)
    return 0.5 * x * (1.0 + jax.lax.erf(x * 0.7071067811865476))


def _ln(x, g, b):
    mean = jnp.mean(x, axis=-1, keepdims=True)
    xc = x - mean
    var = jnp.mean(xc * xc, axis=-1, keepdims=True)
    return xc * jax.lax.rsqrt(var + LN_EPS) * g + b


def _proj(x, w_bf16, b_f32):
    # bf16 MXU operands, f32 accumulation, f32 bias add
    return jnp.dot(x.astype(jnp.bfloat16), w_bf16,
                   preferred_element_type=jnp.float32) + b_f32


def _split_heads(x):
    # (N, D) f32 -> (H, N, head_dim) bf16
    n = x.shape[0]
    return jnp.transpose(x.reshape(n, N_HEADS, HEAD_DIM),
                         (1, 0, 2)).astype(jnp.bfloat16)


def _attend(q, k, v, add_mask):
    """Multi-head attention with heads as a batch dim.

    q: (Tq, D) f32, k/v: (S, D) f32, add_mask: additive f32 broadcastable to
    (H, Tq, S) -- either (1, S) padding mask or (Tq, S) causal+padding mask.
    """
    tq = q.shape[0]
    qh, kh, vh = _split_heads(q), _split_heads(k), _split_heads(v)
    s = jnp.einsum('hqd,hkd->hqk', qh, kh,
                   preferred_element_type=jnp.float32)           # (H, Tq, S)
    s = s * ATTN_SCALE + add_mask
    s = s - jnp.max(s, axis=-1, keepdims=True)
    p = jnp.exp(s)
    p = p * pl.reciprocal(jnp.sum(p, axis=-1, keepdims=True), approx=True)
    ctx = jnp.einsum('hqk,hkd->hqd', p.astype(jnp.bfloat16), vh,
                     preferred_element_type=jnp.float32)         # (H, Tq, hd)
    return jnp.transpose(ctx, (1, 0, 2)).reshape(tq, D_MODEL)


# ---------------------------------------------------------------------------
# Fused layer-stack kernels: ONE pallas_call per stack, grid = (batch, layer).
# The output block is resident across the layer axis and carries the hidden state
# from layer l to layer l+1; layer l's weights are selected by the index_map and
# stream (double-buffered) while layer l-1 computes.
# ---------------------------------------------------------------------------
def _encoder_stack_kernel(x_ref, mask_ref, emb_g_ref, emb_b_ref,
                          qkv_w_ref, qkv_b_ref, o_w_ref, o_b_ref,
                          ln1_g_ref, ln1_b_ref,
                          fc1_w_ref, fc1_b_ref, fc2_w_ref, fc2_b_ref,
                          ln2_g_ref, ln2_b_ref,
                          out_ref):
    l = pl.program_id(1)

    # layer 0: apply the post-embedding LayerNorm once and seed the resident state
    @pl.when(l == 0)
    def _():
        out_ref[0] = _ln(x_ref[0], emb_g_ref[...], emb_b_ref[...])

    x = out_ref[0]                                          # resident (S, D) f32
    add_mask = jnp.where(mask_ref[0] > 0.5, 0.0, MASK_MIN)  # (1, S) built in-kernel

    # self-attention (q/k/v weights packed on one leading dim, one DMA per layer)
    qkv_w = qkv_w_ref[0]
    qkv_b = qkv_b_ref[0]
    q = _proj(x, qkv_w[0], qkv_b[0])
    k = _proj(x, qkv_w[1], qkv_b[1])
    v = _proj(x, qkv_w[2], qkv_b[2])
    attn = _proj(_attend(q, k, v, add_mask), o_w_ref[0], o_b_ref[0])
    h = _ln(x + attn, ln1_g_ref[0], ln1_b_ref[0])           # fused residual + LN

    # feed-forward
    ff = _gelu(_proj(h, fc1_w_ref[0], fc1_b_ref[0]))
    ff = _proj(ff, fc2_w_ref[0], fc2_b_ref[0])
    out_ref[0] = _ln(h + ff, ln2_g_ref[0], ln2_b_ref[0]).astype(out_ref.dtype)


def _decoder_stack_kernel(d_ref, dec_mask_ref, enc_ref, enc_mask_ref,
                          emb_g_ref, emb_b_ref,
                          sa_qkv_w, sa_qkv_b, sa_o_w, sa_o_b, ln1_g, ln1_b,
                          ca_qkv_w, ca_qkv_b, ca_o_w, ca_o_b, ln2_g, ln2_b,
                          fc1_w, fc1_b, fc2_w, fc2_b, ln3_g, ln3_b,
                          out_ref):
    l = pl.program_id(1)
    t = out_ref.shape[1]

    @pl.when(l == 0)
    def _():
        out_ref[0] = _ln(d_ref[0], emb_g_ref[...], emb_b_ref[...])

    x = out_ref[0]                                          # resident (T, D) f32
    enc = enc_ref[0]                                        # (S, D) f32

    # masks rebuilt in-kernel: causal + decoder padding, encoder padding
    row = jax.lax.broadcasted_iota(jnp.int32, (t, t), 0)
    col = jax.lax.broadcasted_iota(jnp.int32, (t, t), 1)
    keep = (col <= row) & (dec_mask_ref[0] > 0.5)           # (T,T) & (1,T)
    self_mask = jnp.where(keep, 0.0, MASK_MIN)              # (T, T)
    cross_mask = jnp.where(enc_mask_ref[0] > 0.5, 0.0, MASK_MIN)   # (1, S)

    # masked self-attention
    w = sa_qkv_w[0]
    b = sa_qkv_b[0]
    q = _proj(x, w[0], b[0])
    k = _proj(x, w[1], b[1])
    v = _proj(x, w[2], b[2])
    attn = _proj(_attend(q, k, v, self_mask), sa_o_w[0], sa_o_b[0])
    h = _ln(x + attn, ln1_g[0], ln1_b[0])

    # cross-attention over encoder hidden states
    w = ca_qkv_w[0]
    b = ca_qkv_b[0]
    q = _proj(h, w[0], b[0])
    k = _proj(enc, w[1], b[1])
    v = _proj(enc, w[2], b[2])
    attn = _proj(_attend(q, k, v, cross_mask), ca_o_w[0], ca_o_b[0])
    h = _ln(h + attn, ln2_g[0], ln2_b[0])

    # feed-forward
    ff = _gelu(_proj(h, fc1_w[0], fc1_b[0]))
    ff = _proj(ff, fc2_w[0], fc2_b[0])
    out_ref[0] = _ln(h + ff, ln3_g[0], ln3_b[0]).astype(out_ref.dtype)


# ---------------------------------------------------------------------------
# lm_head: tiled matmul, f32 VMEM accumulator, reduction axis last ("arbitrary")
# ---------------------------------------------------------------------------
def _lm_head_kernel(x_ref, w_ref, b_ref, o_ref, acc_ref):
    @pl.when(pl.program_id(2) == 0)
    def _():
        acc_ref[...] = jnp.zeros_like(acc_ref)
    acc_ref[...] += jnp.dot(x_ref[...].astype(jnp.bfloat16), w_ref[...],
                            preferred_element_type=jnp.float32)
    @pl.when(pl.program_id(2) == pl.num_programs(2) - 1)
    def _():
        o_ref[...] = (acc_ref[...] + b_ref[...]).astype(o_ref.dtype)


# ---------------------------------------------------------------------------
# Pallas wrappers
# ---------------------------------------------------------------------------
ENC_WEIGHT_KEYS = ("qkv_w", "qkv_b", "o_w", "o_b", "ln1_g", "ln1_b",
                   "fc1_w", "fc1_b", "fc2_w", "fc2_b", "ln2_g", "ln2_b")

DEC_WEIGHT_KEYS = ("sa_qkv_w", "sa_qkv_b", "sa_o_w", "sa_o_b", "ln1_g", "ln1_b",
                   "ca_qkv_w", "ca_qkv_b", "ca_o_w", "ca_o_b", "ln2_g", "ln2_b",
                   "fc1_w", "fc1_b", "fc2_w", "fc2_b", "ln3_g", "ln3_b")


def _layer_spec(arr):
    """Stacked weight (L, ...) -> block (1, ...), index selects layer l."""
    zeros = (0,) * (arr.ndim - 1)
    return pl.BlockSpec((1,) + arr.shape[1:], lambda b, l, _z=zeros: (l,) + _z)


def _const_spec(arr):
    zeros = (0,) * arr.ndim
    return pl.BlockSpec(arr.shape, lambda b, l, _z=zeros: _z)


def pallas_encoder_stack(emb, enc_mask3d, emb_g, emb_b, weights):
    B, S, D = emb.shape
    L = weights["qkv_w"].shape[0]
    ws = [weights[k] for k in ENC_WEIGHT_KEYS]
    return pl.pallas_call(
        _encoder_stack_kernel,
        out_shape=jax.ShapeDtypeStruct((B, S, D), jnp.float32),
        grid=(B, L),
        in_specs=[pl.BlockSpec((1, S, D), lambda b, l: (b, 0, 0)),
                  pl.BlockSpec((1, 1, S), lambda b, l: (b, 0, 0)),
                  _const_spec(emb_g), _const_spec(emb_b)]
                 + [_layer_spec(w) for w in ws],
        out_specs=pl.BlockSpec((1, S, D), lambda b, l: (b, 0, 0)),
        compiler_params=pltpu.CompilerParams(
            dimension_semantics=("parallel", "arbitrary"),
            vmem_limit_bytes=VMEM_LIMIT_BYTES),
    )(emb, enc_mask3d, emb_g, emb_b, *ws)


def pallas_decoder_stack(demb, dec_mask3d, enc_hidden, enc_mask3d,
                         emb_g, emb_b, weights):
    B, T, D = demb.shape
    S = enc_hidden.shape[1]
    L = weights["sa_qkv_w"].shape[0]
    ws = [weights[k] for k in DEC_WEIGHT_KEYS]
    return pl.pallas_call(
        _decoder_stack_kernel,
        out_shape=jax.ShapeDtypeStruct((B, T, D), jnp.float32),
        grid=(B, L),
        in_specs=[pl.BlockSpec((1, T, D), lambda b, l: (b, 0, 0)),
                  pl.BlockSpec((1, 1, T), lambda b, l: (b, 0, 0)),
                  pl.BlockSpec((1, S, D), lambda b, l: (b, 0, 0)),
                  pl.BlockSpec((1, 1, S), lambda b, l: (b, 0, 0)),
                  _const_spec(emb_g), _const_spec(emb_b)]
                 + [_layer_spec(w) for w in ws],
        out_specs=pl.BlockSpec((1, T, D), lambda b, l: (b, 0, 0)),
        compiler_params=pltpu.CompilerParams(
            dimension_semantics=("parallel", "arbitrary"),
            vmem_limit_bytes=VMEM_LIMIT_BYTES),
    )(demb, dec_mask3d, enc_hidden, enc_mask3d, emb_g, emb_b, *ws)


def pallas_lm_head(x2d, w_bf16, bias):
    M, K = x2d.shape
    N = w_bf16.shape[1]
    # lane-dense 128-multiple tiles at real scale; fall back to whole dim otherwise
    tm = 256 if M % 256 == 0 else M
    tn = 512 if N % 512 == 0 else N
    tk = 512 if K % 512 == 0 else K
    return pl.pallas_call(
        _lm_head_kernel,
        out_shape=jax.ShapeDtypeStruct((M, N), jnp.float32),
        grid=(M // tm, N // tn, K // tk),
        in_specs=[pl.BlockSpec((tm, tk), lambda i, j, k: (i, k)),
                  pl.BlockSpec((tk, tn), lambda i, j, k: (k, j)),
                  pl.BlockSpec((1, tn), lambda i, j, k: (0, j))],
        out_specs=pl.BlockSpec((tm, tn), lambda i, j, k: (i, j)),
        scratch_shapes=[pltpu.VMEM((tm, tn), jnp.float32)],
        compiler_params=pltpu.CompilerParams(
            dimension_semantics=("parallel", "parallel", "arbitrary")),
    )(x2d, w_bf16, bias)


# ---------------------------------------------------------------------------
# Forward pass (embedding gathers stay in plain JAX; only 3 pallas_calls total)
# ---------------------------------------------------------------------------
def sql_bart_forward(params, input_ids, attention_mask,
                     decoder_input_ids, decoder_attention_mask):
    B, S_enc = input_ids.shape
    T_dec = decoder_input_ids.shape[1]

    enc_mask3d = attention_mask.astype(jnp.float32)[:, None, :]          # (B,1,S)
    dec_mask3d = decoder_attention_mask.astype(jnp.float32)[:, None, :]  # (B,1,T)

    # ---------------- encoder ----------------
    pos = jnp.arange(S_enc) + POS_OFFSET
    emb = params["shared"][input_ids] + params["enc_pos"][pos][None, :, :]
    encoder_hidden = pallas_encoder_stack(
        emb, enc_mask3d, params["enc_ln_emb_g"], params["enc_ln_emb_b"],
        params["enc"])

    # ---------------- decoder ----------------
    dpos = jnp.arange(T_dec) + POS_OFFSET
    demb = params["shared"][decoder_input_ids] + params["dec_pos"][dpos][None, :, :]
    dec_hidden = pallas_decoder_stack(
        demb, dec_mask3d, encoder_hidden, enc_mask3d,
        params["dec_ln_emb_g"], params["dec_ln_emb_b"], params["dec"])

    # ---------------- lm head (+ final_logits_bias, zeros) ----------------
    logits = pallas_lm_head(dec_hidden.reshape(B * T_dec, D_MODEL),
                            params["lm_head_w"], params["final_logits_bias"])
    return logits.reshape(B, T_dec, VOCAB)


# ---------------------------------------------------------------------------
# Deterministic parameter init (synthetic weights; no checkpoint load).
# Matmul weights are stored in bf16 (MXU operands); LN params / biases in f32.
# Per-layer weights are stacked on a leading layer axis for the (B, L) grid.
# ---------------------------------------------------------------------------
def init_params(key):
    keys = iter(jax.random.split(key, 64))

    def w_bf16(shape, scale=0.02):
        return (scale * jax.random.normal(next(keys), shape)).astype(jnp.bfloat16)

    def zeros(shape):
        return jnp.zeros(shape, jnp.float32)

    def ones(shape):
        return jnp.ones(shape, jnp.float32)

    def enc_stack(L):
        return {
            "qkv_w": w_bf16((L, 3, D_MODEL, D_MODEL)),
            "qkv_b": zeros((L, 3, 1, D_MODEL)),
            "o_w": w_bf16((L, D_MODEL, D_MODEL)),
            "o_b": zeros((L, 1, D_MODEL)),
            "ln1_g": ones((L, 1, D_MODEL)), "ln1_b": zeros((L, 1, D_MODEL)),
            "fc1_w": w_bf16((L, D_MODEL, FFN)), "fc1_b": zeros((L, 1, FFN)),
            "fc2_w": w_bf16((L, FFN, D_MODEL)), "fc2_b": zeros((L, 1, D_MODEL)),
            "ln2_g": ones((L, 1, D_MODEL)), "ln2_b": zeros((L, 1, D_MODEL)),
        }

    def dec_stack(L):
        return {
            "sa_qkv_w": w_bf16((L, 3, D_MODEL, D_MODEL)),
            "sa_qkv_b": zeros((L, 3, 1, D_MODEL)),
            "sa_o_w": w_bf16((L, D_MODEL, D_MODEL)),
            "sa_o_b": zeros((L, 1, D_MODEL)),
            "ln1_g": ones((L, 1, D_MODEL)), "ln1_b": zeros((L, 1, D_MODEL)),
            "ca_qkv_w": w_bf16((L, 3, D_MODEL, D_MODEL)),
            "ca_qkv_b": zeros((L, 3, 1, D_MODEL)),
            "ca_o_w": w_bf16((L, D_MODEL, D_MODEL)),
            "ca_o_b": zeros((L, 1, D_MODEL)),
            "ln2_g": ones((L, 1, D_MODEL)), "ln2_b": zeros((L, 1, D_MODEL)),
            "fc1_w": w_bf16((L, D_MODEL, FFN)), "fc1_b": zeros((L, 1, FFN)),
            "fc2_w": w_bf16((L, FFN, D_MODEL)), "fc2_b": zeros((L, 1, D_MODEL)),
            "ln3_g": ones((L, 1, D_MODEL)), "ln3_b": zeros((L, 1, D_MODEL)),
        }

    def w_f32(shape, scale=0.02):
        return (scale * jax.random.normal(next(keys), shape)).astype(jnp.float32)

    return {
        "shared": w_f32((VOCAB, D_MODEL)),
        "enc_pos": w_f32((MAX_POS + POS_OFFSET, D_MODEL)),
        "dec_pos": w_f32((MAX_POS + POS_OFFSET, D_MODEL)),
        "enc_ln_emb_g": ones((1, D_MODEL)), "enc_ln_emb_b": zeros((1, D_MODEL)),
        "dec_ln_emb_g": ones((1, D_MODEL)), "dec_ln_emb_b": zeros((1, D_MODEL)),
        "enc": enc_stack(N_ENC_LAYERS),
        "dec": dec_stack(N_DEC_LAYERS),
        "lm_head_w": w_bf16((D_MODEL, VOCAB)),
        "final_logits_bias": zeros((1, VOCAB)),
    }


# ---------------------------------------------------------------------------
if __name__ == "__main__":
    key = jax.random.PRNGKey(0)
    k_params, k_in, k_dec = jax.random.split(key, 3)

    B, S_ENC, T_DEC = 2, 8, 8
    params = init_params(k_params)

    input_ids = jax.random.randint(k_in, (B, S_ENC), 0, VOCAB, dtype=jnp.int32)
    decoder_input_ids = jax.random.randint(k_dec, (B, T_DEC), 0, VOCAB, dtype=jnp.int32)
    # batch 0 has two padding positions at the end of the encoder input
    attention_mask = jnp.array(
        [[1, 1, 1, 1, 1, 1, 0, 0],
         [1, 1, 1, 1, 1, 1, 1, 1]], dtype=jnp.float32)
    decoder_attention_mask = jnp.ones((B, T_DEC), jnp.float32)

    fwd = jax.jit(sql_bart_forward)
    lm_logits = fwd(params, input_ids, attention_mask,
                    decoder_input_ids, decoder_attention_mask)
    lm_logits = jax.block_until_ready(lm_logits)

    assert lm_logits.shape == (B, T_DEC, VOCAB), lm_logits.shape
    assert lm_logits.dtype == jnp.float32
    assert bool(jnp.all(jnp.isfinite(lm_logits)))
    print("KERNEL_OK")
</pallas_src>

<mosaic_0001>
module attributes {stable_mosaic.version = 11 : i64} {
  func.func @_lm_head_kernel(%arg0: i32, %arg1: i32, %arg2: i32, %arg3: memref<16x32xf32, #tpu.memory_space<vmem>>, %arg4: memref<32x64xbf16, #tpu.memory_space<vmem>>, %arg5: memref<1x64xf32, #tpu.memory_space<vmem>>, %arg6: memref<16x64xf32, #tpu.memory_space<vmem>>, %arg7: memref<16x64xf32, #tpu.memory_space<vmem>>) attributes {dimension_semantics = [#tpu.dimension_semantics<parallel>, #tpu.dimension_semantics<parallel>, #tpu.dimension_semantics<arbitrary>], iteration_bounds = array<i64: 1, 1, 1>, scalar_prefetch = 0 : i64, scratch_operands = 1 : i64, tpu.core_type = #tpu.core_type<tc>, window_params = [{transform_indices = @transform_0, window_bounds = array<i64: 16, 32>}, {transform_indices = @transform_1, window_bounds = array<i64: 32, 64>}, {transform_indices = @transform_2, window_bounds = array<i64: 1, 64>}, {transform_indices = @transform_3, window_bounds = array<i64: 16, 64>}]} {
    %c0_i32 = arith.constant 0 : i32
    %0 = arith.cmpi eq, %arg2, %c0_i32 : i32
    %1 = arith.extui %0 : i1 to i32
    %c0_i32_0 = arith.constant 0 : i32
    %2 = arith.cmpi ne, %1, %c0_i32_0 : i32
    scf.if %2 {
      %cst_10 = arith.constant 0.000000e+00 : f32
      %13 = vector.broadcast %cst_10 : f32 to vector<16x64xf32>
      %c0_11 = arith.constant 0 : index
      %c0_12 = arith.constant 0 : index
      %14 = vector.load %arg7[%c0_11, %c0_12] : memref<16x64xf32, #tpu.memory_space<vmem>>, vector<16x64xf32>
      tpu.vector_store %arg7[%c0_11, %c0_12], %13 {strides = array<i32>} : memref<16x64xf32, #tpu.memory_space<vmem>>, vector<16x64xf32>,
    } else {
    }
    %c0 = arith.constant 0 : index
    %c0_1 = arith.constant 0 : index
    %3 = vector.load %arg7[%c0, %c0_1] : memref<16x64xf32, #tpu.memory_space<vmem>>, vector<16x64xf32>
    %c0_2 = arith.constant 0 : index
    %c0_3 = arith.constant 0 : index
    %4 = vector.load %arg3[%c0_2, %c0_3] : memref<16x32xf32, #tpu.memory_space<vmem>>, vector<16x32xf32>
    %5 = arith.truncf %4 : vector<16x32xf32> to vector<16x32xbf16>
    %c0_4 = arith.constant 0 : index
    %c0_5 = arith.constant 0 : index
    %6 = vector.load %arg4[%c0_4, %c0_5] : memref<32x64xbf16, #tpu.memory_space<vmem>>, vector<32x64xbf16>
    %cst = arith.constant dense<0.000000e+00> : vector<16x64xf32>
    %7 = tpu.matmul %5, %6, %cst {dimension_numbers = #tpu.dot_dimension_numbers<[1], [0], [0], [1], [0, 0, 1, 1], [], []>} : vector<16x32xbf16>, vector<32x64xbf16>, vector<16x64xf32> -> vector<16x64xf32>
    %8 = arith.addf %3, %7 : vector<16x64xf32>
    %c0_6 = arith.constant 0 : index
    %c0_7 = arith.constant 0 : index
    %9 = vector.load %arg7[%c0_6, %c0_7] : memref<16x64xf32, #tpu.memory_space<vmem>>, vector<16x64xf32>
    tpu.vector_store %arg7[%c0_6, %c0_7], %8 {strides = array<i32>} : memref<16x64xf32, #tpu.memory_space<vmem>>, vector<16x64xf32>,
    %c0_i32_8 = arith.constant 0 : i32
    %10 = arith.cmpi eq, %arg2, %c0_i32_8 : i32
    %11 = arith.extui %10 : i1 to i32
    %c0_i32_9 = arith.constant 0 : i32
    %12 = arith.cmpi ne, %11, %c0_i32_9 : i32
    scf.if %12 {
      %c0_10 = arith.constant 0 : index
      %c0_11 = arith.constant 0 : index
      %13 = vector.load %arg7[%c0_10, %c0_11] : memref<16x64xf32, #tpu.memory_space<vmem>>, vector<16x64xf32>
      %c0_12 = arith.constant 0 : index
      %c0_13 = arith.constant 0 : index
      %14 = vector.load %arg5[%c0_12, %c0_13] : memref<1x64xf32, #tpu.memory_space<vmem>>, vector<1x64xf32>
      %15 = vector.broadcast %14 : vector<1x64xf32> to vector<16x64xf32>
      %16 = arith.addf %13, %15 : vector<16x64xf32>
      %c0_14 = arith.constant 0 : index
      %c0_15 = arith.constant 0 : index
      %17 = vector.load %arg6[%c0_14, %c0_15] : memref<16x64xf32, #tpu.memory_space<vmem>>, vector<16x64xf32>
      tpu.vector_store %arg6[%c0_14, %c0_15], %16 {strides = array<i32>} : memref<16x64xf32, #tpu.memory_space<vmem>>, vector<16x64xf32>,
    } else {
    }
    return
  }
  func.func @transform_0(%arg0: i32, %arg1: i32, %arg2: i32) -> (i32, i32) {
    %c0_i32 = arith.constant 0 : i32
    return %arg0, %arg2 : i32, i32
  }
  func.func @transform_1(%arg0: i32, %arg1: i32, %arg2: i32) -> (i32, i32) {
    %c0_i32 = arith.constant 0 : i32
    return %arg2, %arg1 : i32, i32
  }
  func.func @transform_2(%arg0: i32, %arg1: i32, %arg2: i32) -> (i32, i32) {
    %c0_i32 = arith.constant 0 : i32
    %c0_i32_0 = arith.constant 0 : i32
    return %c0_i32, %arg1 : i32, i32
  }
  func.func @transform_3(%arg0: i32, %arg1: i32, %arg2: i32) -> (i32, i32) {
    %c0_i32 = arith.constant 0 : i32
    return %arg0, %arg1 : i32, i32
  }
}

module attributes {stable_mosaic.version = 11 : i64} {
  func.func @_encoder_stack_kernel(%arg0: i32, %arg1: i32, %arg2: memref<1x8x32xf32, #tpu.memory_space<vmem>>, %arg3: memref<1x1x8xf32, #tpu.memory_space<vmem>>, %arg4: memref<1x32xf32, #tpu.memory_space<vmem>>, %arg5: memref<1x32xf32, #tpu.memory_space<vmem>>, %arg6: memref<1x3x32x32xbf16, #tpu.memory_space<vmem>>, %arg7: memref<1x3x1x32xf32, #tpu.memory_space<vmem>>, %arg8: memref<1x32x32xbf16, #tpu.memory_space<vmem>>, %arg9: memref<1x1x32xf32, #tpu.memory_space<vmem>>, %arg10: memref<1x1x32xf32, #tpu.memory_space<vmem>>, %arg11: memref<1x1x32xf32, #tpu.memory_space<vmem>>, %arg12: memref<1x32x64xbf16, #tpu.memory_space<vmem>>, %arg13: memref<1x1x64xf32, #tpu.memory_space<vmem>>, %arg14: memref<1x64x32xbf16, #tpu.memory_space<vmem>>, %arg15: memref<1x1x32xf32, #tpu.memory_space<vmem>>, %arg16: memref<1x1x32xf32, #tpu.memory_space<vmem>>, %arg17: memref<1x1x32xf32, #tpu.memory_space<vmem>>, %arg18: memref<1x8x32xf32, #tpu.memory_space<vmem>>) attributes {dimension_semantics = [#tpu.dimension_semantics<parallel>, #tpu.dimension_semantics<arbitrary>], iteration_bounds = array<i64: 2, 2>, scalar_prefetch = 0 : i64, scratch_operands = 0 : i64, tpu.core_type = #tpu.core_type<tc>, window_params = [{transform_indices = @transform_0, window_bounds = array<i64: 1, 8, 32>}, {transform_indices = @transform_1, window_bounds = array<i64: 1, 1, 8>}, {pipeline_mode = #tpu.pipeline_mode<synchronous>, transform_indices = @transform_2, window_bounds = array<i64: 1, 32>}, {pipeline_mode = #tpu.pipeline_mode<synchronous>, transform_indices = @transform_3, window_bounds = array<i64: 1, 32>}, {transform_indices = @transform_4, window_bounds = array<i64: 1, 3, 32, 32>}, {transform_indices = @transform_5, window_bounds = array<i64: 1, 3, 1, 32>}, {transform_indices = @transform_6, window_bounds = array<i64: 1, 32, 32>}, {transform_indices = @transform_7, window_bounds = array<i64: 1, 1, 32>}, {transform_indices = @transform_8, window_bounds = array<i64: 1, 1, 32>}, {transform_indices = @transform_9, window_bounds = array<i64: 1, 1, 32>}, {transform_indices = @transform_10, window_bounds = array<i64: 1, 32, 64>}, {transform_indices = @transform_11, window_bounds = array<i64: 1, 1, 64>}, {transform_indices = @transform_12, window_bounds = array<i64: 1, 64, 32>}, {transform_indices = @transform_13, window_bounds = array<i64: 1, 1, 32>}, {transform_indices = @transform_14, window_bounds = array<i64: 1, 1, 32>}, {transform_indices = @transform_15, window_bounds = array<i64: 1, 1, 32>}, {transform_indices = @transform_16, window_bounds = array<i64: 1, 8, 32>}]} {
    %c0_i32 = arith.constant 0 : i32
    %0 = arith.cmpi eq, %arg1, %c0_i32 : i32
    %1 = arith.extui %0 : i1 to i32
    %c0_i32_0 = arith.constant 0 : i32
    %2 = arith.cmpi ne, %1, %c0_i32_0 : i32
    scf.if %2 {
      %c0_73 = arith.constant 0 : index
      %c0_74 = arith.constant 0 : index
      %c0_75 = arith.constant 0 : index
      %154 = vector.load %arg2[%c0_73, %c0_74, %c0_75] : memref<1x8x32xf32, #tpu.memory_space<vmem>>, vector<1x8x32xf32>
      %155 = vector.shape_cast %154 : vector<1x8x32xf32> to vector<8x32xf32>
      %c0_76 = arith.constant 0 : index
      %c0_77 = arith.constant 0 : index
      %156 = vector.load %arg4[%c0_76, %c0_77] : memref<1x32xf32, #tpu.memory_space<vmem>>, vector<1x32xf32>
      %c0_78 = arith.constant 0 : index
      %c0_79 = arith.constant 0 : index
      %157 = vector.load %arg5[%c0_78, %c0_79] : memref<1x32xf32, #tpu.memory_space<vmem>>, vector<1x32xf32>
      %cst_80 = arith.constant dense<0.000000e+00> : vector<8xf32>
      %158 = vector.multi_reduction <add>, %155, %cst_80 [1] : vector<8x32xf32> to vector<8xf32>
      %159 = vector.shape_cast %158 : vector<8xf32> to vector<8x1xf32>
      %cst_81 = arith.constant 3.200000e+01 : f32
      %160 = vector.broadcast %cst_81 : f32 to vector<8x1xf32>
      %161 = arith.divf %159, %160 : vector<8x1xf32>
      %162 = vector.broadcast %161 : vector<8x1xf32> to vector<8x32xf32>
      %163 = arith.subf %155, %162 : vector<8x32xf32>
      %164 = arith.mulf %163, %163 : vector<8x32xf32>
      %cst_82 = arith.constant dense<0.000000e+00> : vector<8xf32>
      %165 = vector.multi_reduction <add>, %164, %cst_82 [1] : vector<8x32xf32> to vector<8xf32>
      %166 = vector.shape_cast %165 : vector<8xf32> to vector<8x1xf32>
      %cst_83 = arith.constant 3.200000e+01 : f32
      %167 = vector.broadcast %cst_83 : f32 to vector<8x1xf32>
      %168 = arith.divf %166, %167 : vector<8x1xf32>
      %cst_84 = arith.constant 9.99999974E-6 : f32
      %169 = vector.broadcast %cst_84 : f32 to vector<8x1xf32>
      %170 = arith.addf %168, %169 : vector<8x1xf32>
      %171 = math.rsqrt %170 : vector<8x1xf32>
      %172 = vector.broadcast %171 : vector<8x1xf32> to vector<8x32xf32>
      %173 = arith.mulf %163, %172 : vector<8x32xf32>
      %174 = vector.broadcast %156 : vector<1x32xf32> to vector<8x32xf32>
      %175 = arith.mulf %173, %174 : vector<8x32xf32>
      %176 = vector.broadcast %157 : vector<1x32xf32> to vector<8x32xf32>
      %177 = arith.addf %175, %176 : vector<8x32xf32>
      %c0_85 = arith.constant 0 : index
      %c0_86 = arith.constant 0 : index
      %c0_87 = arith.constant 0 : index
      %178 = vector.load %arg18[%c0_85, %c0_86, %c0_87] : memref<1x8x32xf32, #tpu.memory_space<vmem>>, vector<1x8x32xf32>
      %179 = vector.shape_cast %178 : vector<1x8x32xf32> to vector<8x32xf32>
      %180 = vector.shape_cast %177 : vector<8x32xf32> to vector<1x8x32xf32>
      tpu.vector_store %arg18[%c0_85, %c0_86, %c0_87], %180 {strides = array<i32>} : memref<1x8x32xf32, #tpu.memory_space<vmem>>, vector<1x8x32xf32>,
    } else {
    }
    %c0 = arith.constant 0 : index
    %c0_1 = arith.constant 0 : index
    %c0_2 = arith.constant 0 : index
    %3 = vector.load %arg18[%c0, %c0_1, %c0_2] : memref<1x8x32xf32, #tpu.memory_space<vmem>>, vector<1x8x32xf32>
    %4 = vector.shape_cast %3 : vector<1x8x32xf32> to vector<8x32xf32>
    %c0_3 = arith.constant 0 : index
    %c0_4 = arith.constant 0 : index
    %c0_5 = arith.constant 0 : index
    %5 = vector.load %arg3[%c0_3, %c0_4, %c0_5] : memref<1x1x8xf32, #tpu.memory_space<vmem>>, vector<1x1x8xf32>
    %6 = vector.shape_cast %5 : vector<1x1x8xf32> to vector<1x8xf32>
    %cst = arith.constant 5.000000e-01 : f32
    %7 = vector.broadcast %cst : f32 to vector<1x8xf32>
    %8 = arith.cmpf ogt, %6, %7 : vector<1x8xf32>
    %cst_6 = arith.constant 0.000000e+00 : f32
    %cst_7 = arith.constant -3.40282347E+38 : f32
    %9 = vector.broadcast %cst_6 : f32 to vector<1x8xf32>
    %10 = vector.broadcast %cst_7 : f32 to vector<1x8xf32>
    %11 = arith.select %8, %9, %10 : vector<1x8xi1>, vector<1x8xf32>
    %c0_8 = arith.constant 0 : index
    %c0_9 = arith.constant 0 : index
    %c0_10 = arith.constant 0 : index
    %c0_11 = arith.constant 0 : index
    %12 = vector.load %arg6[%c0_8, %c0_9, %c0_10, %c0_11] : memref<1x3x32x32xbf16, #tpu.memory_space<vmem>>, vector<1x3x32x32xbf16>
    %13 = vector.shape_cast %12 : vector<1x3x32x32xbf16> to vector<3x32x32xbf16>
    %c0_12 = arith.constant 0 : index
    %c0_13 = arith.constant 0 : index
    %c0_14 = arith.constant 0 : index
    %c0_15 = arith.constant 0 : index
    %14 = vector.load %arg7[%c0_12, %c0_13, %c0_14, %c0_15] : memref<1x3x1x32xf32, #tpu.memory_space<vmem>>, vector<1x3x1x32xf32>
    %15 = vector.shape_cast %14 : vector<1x3x1x32xf32> to vector<3x1x32xf32>
    %16 = vector.extract_strided_slice %13 {offsets = [0, 0, 0], sizes = [1, 32, 32], strides = [1, 1, 1]} : vector<3x32x32xbf16> to vector<1x32x32xbf16>
    %17 = vector.shape_cast %16 : vector<1x32x32xbf16> to vector<32x32xbf16>
    %18 = vector.extract_strided_slice %15 {offsets = [0, 0, 0], sizes = [1, 1, 32], strides = [1, 1, 1]} : vector<3x1x32xf32> to vector<1x1x32xf32>
    %19 = vector.shape_cast %18 : vector<1x1x32xf32> to vector<1x32xf32>
    %20 = arith.truncf %4 : vector<8x32xf32> to vector<8x32xbf16>
    %cst_16 = arith.constant dense<0.000000e+00> : vector<8x32xf32>
    %21 = tpu.matmul %20, %17, %cst_16 {dimension_numbers = #tpu.dot_dimension_numbers<[1], [0], [0], [1], [0, 0, 1, 1], [], []>} : vector<8x32xbf16>, vector<32x32xbf16>, vector<8x32xf32> -> vector<8x32xf32>
    %22 = vector.broadcast %19 : vector<1x32xf32> to vector<8x32xf32>
    %23 = arith.addf %21, %22 : vector<8x32xf32>
    %24 = vector.extract_strided_slice %13 {offsets = [1, 0, 0], sizes = [1, 32, 32], strides = [1, 1, 1]} : vector<3x32x32xbf16> to vector<1x32x32xbf16>
    %25 = vector.shape_cast %24 : vector<1x32x32xbf16> to vector<32x32xbf16>
    %26 = vector.extract_strided_slice %15 {offsets = [1, 0, 0], sizes = [1, 1, 32], strides = [1, 1, 1]} : vector<3x1x32xf32> to vector<1x1x32xf32>
    %27 = vector.shape_cast %26 : vector<1x1x32xf32> to vector<1x32xf32>
    %28 = arith.truncf %4 : vector<8x32xf32> to vector<8x32xbf16>
    %cst_17 = arith.constant dense<0.000000e+00> : vector<8x32xf32>
    %29 = tpu.matmul %28, %25, %cst_17 {dimension_numbers = #tpu.dot_dimension_numbers<[1], [0], [0], [1], [0, 0, 1, 1], [], []>} : vector<8x32xbf16>, vector<32x32xbf16>, vector<8x32xf32> -> vector<8x32xf32>
    %30 = vector.broadcast %27 : vector<1x32xf32> to vector<8x32xf32>
    %31 = arith.addf %29, %30 : vector<8x32xf32>
    %32 = vector.extract_strided_slice %13 {offsets = [2, 0, 0], sizes = [1, 32, 32], strides = [1, 1, 1]} : vector<3x32x32xbf16> to vector<1x32x32xbf16>
    %33 = vector.shape_cast %32 : vector<1x32x32xbf16> to vector<32x32xbf16>
    %34 = vector.extract_strided_slice %15 {offsets = [2, 0, 0], sizes = [1, 1, 32], strides = [1, 1, 1]} : vector<3x1x32xf32> to vector<1x1x32xf32>
    %35 = vector.shape_cast %34 : vector<1x1x32xf32> to vector<1x32xf32>
    %36 = arith.truncf %4 : vector<8x32xf32> to vector<8x32xbf16>
    %cst_18 = arith.constant dense<0.000000e+00> : vector<8x32xf32>
    %37 = tpu.matmul %36, %33, %cst_18 {dimension_numbers = #tpu.dot_dimension_numbers<[1], [0], [0], [1], [0, 0, 1, 1], [], []>} : vector<8x32xbf16>, vector<32x32xbf16>, vector<8x32xf32> -> vector<8x32xf32>
    %38 = vector.broadcast %35 : vector<1x32xf32> to vector<8x32xf32>
    %39 = arith.addf %37, %38 : vector<8x32xf32>
    %40 = vector.shape_cast %23 : vector<8x32xf32> to vector<8x4x8xf32>
    %41 = tpu.transpose %40, [1, 0, 2] : vector<8x4x8xf32> -> vector<4x8x8xf32>
    %42 = arith.truncf %41 : vector<4x8x8xf32> to vector<4x8x8xbf16>
    %43 = vector.shape_cast %31 : vector<8x32xf32> to vector<8x4x8xf32>
    %44 = tpu.transpose %43, [1, 0, 2] : vector<8x4x8xf32> -> vector<4x8x8xf32>
    %45 = arith.truncf %44 : vector<4x8x8xf32> to vector<4x8x8xbf16>
    %46 = vector.shape_cast %39 : vector<8x32xf32> to vector<8x4x8xf32>
    %47 = tpu.transpose %46, [1, 0, 2] : vector<8x4x8xf32> -> vector<4x8x8xf32>
    %48 = arith.truncf %47 : vector<4x8x8xf32> to vector<4x8x8xbf16>
    "tpu.trace_start"() <{level = 10 : i32, message = "hqd,hkd->hqk"}> : () -> ()
    %cst_19 = arith.constant dense<0.000000e+00> : vector<4x8x8xf32>
    %49 = tpu.matmul %42, %45, %cst_19 {dimension_numbers = #tpu.dot_dimension_numbers<[2], [2], [1], [1], [0, 0, 0, 1, 1, 1], [0], [0]>} : vector<4x8x8xbf16>, vector<4x8x8xbf16>, vector<4x8x8xf32> -> vector<4x8x8xf32>
    "tpu.trace_stop"() : () -> ()
    %cst_20 = arith.constant 0.353553385 : f32
    %50 = vector.broadcast %cst_20 : f32 to vector<4x8x8xf32>
    %51 = arith.mulf %49, %50 : vector<4x8x8xf32>
    %52 = vector.shape_cast %11 : vector<1x8xf32> to vector<1x1x8xf32>
    %53 = vector.broadcast %52 : vector<1x1x8xf32> to vector<4x8x8xf32>
    %54 = arith.addf %51, %53 : vector<4x8x8xf32>
    %cst_21 = arith.constant dense<0xFF800000> : vector<4x8xf32>
    %55 = vector.multi_reduction <maximumf>, %54, %cst_21 [2] : vector<4x8x8xf32> to vector<4x8xf32>
    %56 = vector.shape_cast %55 : vector<4x8xf32> to vector<4x8x1xf32>
    %57 = vector.broadcast %56 : vector<4x8x1xf32> to vector<4x8x8xf32>
    %58 = arith.subf %54, %57 : vector<4x8x8xf32>
    %59 = math.exp %58 : vector<4x8x8xf32>
    %cst_22 = arith.constant dense<0.000000e+00> : vector<4x8xf32>
    %60 = vector.multi_reduction <add>, %59, %cst_22 [2] : vector<4x8x8xf32> to vector<4x8xf32>
    %61 = vector.shape_cast %60 : vector<4x8xf32> to vector<4x8x1xf32>
    %62 = tpu.reciprocal %61 {approx = true} : vector<4x8x1xf32> -> vector<4x8x1xf32>
    %63 = vector.broadcast %62 : vector<4x8x1xf32> to vector<4x8x8xf32>
    %64 = arith.mulf %59, %63 : vector<4x8x8xf32>
    %65 = arith.truncf %64 : vector<4x8x8xf32> to vector<4x8x8xbf16>
    "tpu.trace_start"() <{level = 10 : i32, message = "hqk,hkd->hqd"}> : () -> ()
    %cst_23 = arith.constant dense<0.000000e+00> : vector<4x8x8xf32>
    %66 = tpu.matmul %65, %48, %cst_23 {dimension_numbers = #tpu.dot_dimension_numbers<[2], [1], [1], [2], [0, 0, 0, 1, 1, 2], [0], [0]>} : vector<4x8x8xbf16>, vector<4x8x8xbf16>, vector<4x8x8xf32> -> vector<4x8x8xf32>
    "tpu.trace_stop"() : () -> ()
    %67 = tpu.transpose %66, [1, 0, 2] : vector<4x8x8xf32> -> vector<8x4x8xf32>
    %68 = vector.shape_cast %67 : vector<8x4x8xf32> to vector<8x32xf32>
    %c0_24 = arith.constant 0 : index
    %c0_25 = arith.constant 0 : index
    %c0_26 = arith.constant 0 : index
    %69 = vector.load %arg8[%c0_24, %c0_25, %c0_26] : memref<1x32x32xbf16, #tpu.memory_space<vmem>>, vector<1x32x32xbf16>
    %70 = vector.shape_cast %69 : vector<1x32x32xbf16> to vector<32x32xbf16>
    %c0_27 = arith.constant 0 : index
    %c0_28 = arith.constant 0 : index
    %c0_29 = arith.constant 0 : index
    %71 = vector.load %arg9[%c0_27, %c0_28, %c0_29] : memref<1x1x32xf32, #tpu.memory_space<vmem>>, vector<1x1x32xf32>
    %72 = vector.shape_cast %71 : vector<1x1x32xf32> to vector<1x32xf32>
    %73 = arith.truncf %68 : vector<8x32xf32> to vector<8x32xbf16>
    %cst_30 = arith.constant dense<0.000000e+00> : vector<8x32xf32>
    %74 = tpu.matmul %73, %70, %cst_30 {dimension_numbers = #tpu.dot_dimension_numbers<[1], [0], [0], [1], [0, 0, 1, 1], [], []>} : vector<8x32xbf16>, vector<32x32xbf16>, vector<8x32xf32> -> vector<8x32xf32>
    %75 = vector.broadcast %72 : vector<1x32xf32> to vector<8x32xf32>
    %76 = arith.addf %74, %75 : vector<8x32xf32>
    %77 = arith.addf %4, %76 : vector<8x32xf32>
    %c0_31 = arith.constant 0 : index
    %c0_32 = arith.constant 0 : index
    %c0_33 = arith.constant 0 : index
    %78 = vector.load %arg10[%c0_31, %c0_32, %c0_33] : memref<1x1x32xf32, #tpu.memory_space<vmem>>, vector<1x1x32xf32>
    %79 = vector.shape_cast %78 : vector<1x1x32xf32> to vector<1x32xf32>
    %c0_34 = arith.constant 0 : index
    %c0_35 = arith.constant 0 : index
    %c0_36 = arith.constant 0 : index
    %80 = vector.load %arg11[%c0_34, %c0_35, %c0_36] : memref<1x1x32xf32, #tpu.memory_space<vmem>>, vector<1x1x32xf32>
    %81 = vector.shape_cast %80 : vector<1x1x32xf32> to vector<1x32xf32>
    %cst_37 = arith.constant dense<0.000000e+00> : vector<8xf32>
    %82 = vector.multi_reduction <add>, %77, %cst_37 [1] : vector<8x32xf32> to vector<8xf32>
    %83 = vector.shape_cast %82 : vector<8xf32> to vector<8x1xf32>
    %cst_38 = arith.constant 3.200000e+01 : f32
    %84 = vector.broadcast %cst_38 : f32 to vector<8x1xf32>
    %85 = arith.divf %83, %84 : vector<8x1xf32>
    %86 = vector.broadcast %85 : vector<8x1xf32> to vector<8x32xf32>
    %87 = arith.subf %77, %86 : vector<8x32xf32>
    %88 = arith.mulf %87, %87 : vector<8x32xf32>
    %cst_39 = arith.constant dense<0.000000e+00> : vector<8xf32>
    %89 = vector.multi_reduction <add>, %88, %cst_39 [1] : vector<8x32xf32> to vector<8xf32>
    %90 = vector.shape_cast %89 : vector<8xf32> to vector<8x1xf32>
    %cst_40 = arith.constant 3.200000e+01 : f32
    %91 = vector.broadcast %cst_40 : f32 to vector<8x1xf32>
    %92 = arith.divf %90, %91 : vector<8x1xf32>
    %cst_41 = arith.constant 9.99999974E-6 : f32
    %93 = vector.broadcast %cst_41 : f32 to vector<8x1xf32>
    %94 = arith.addf %92, %93 : vector<8x1xf32>
    %95 = math.rsqrt %94 : vector<8x1xf32>
    %96 = vector.broadcast %95 : vector<8x1xf32> to vector<8x32xf32>
    %97 = arith.mulf %87, %96 : vector<8x32xf32>
    %98 = vector.broadcast %79 : vector<1x32xf32> to vector<8x32xf32>
    %99 = arith.mulf %97, %98 : vector<8x32xf32>
    %100 = vector.broadcast %81 : vector<1x32xf32> to vector<8x32xf32>
    %101 = arith.addf %99, %100 : vector<8x32xf32>
    %c0_42 = arith.constant 0 : index
    %c0_43 = arith.constant 0 : index
    %c0_44 = arith.constant 0 : index
    %102 = vector.load %arg12[%c0_42, %c0_43, %c0_44] : memref<1x32x64xbf16, #tpu.memory_space<vmem>>, vector<1x32x64xbf16>
    %103 = vector.shape_cast %102 : vector<1x32x64xbf16> to vector<32x64xbf16>
    %c0_45 = arith.constant 0 : index
    %c0_46 = arith.constant 0 : index
    %c0_47 = arith.constant 0 : index
    %104 = vector.load %arg13[%c0_45, %c0_46, %c0_47] : memref<1x1x64xf32, #tpu.memory_space<vmem>>, vector<1x1x64xf32>
    %105 = vector.shape_cast %104 : vector<1x1x64xf32> to vector<1x64xf32>
    %106 = arith.truncf %101 : vector<8x32xf32> to vector<8x32xbf16>
    %cst_48 = arith.constant dense<0.000000e+00> : vector<8x64xf32>
    %107 = tpu.matmul %106, %103, %cst_48 {dimension_numbers = #tpu.dot_dimension_numbers<[1], [0], [0], [1], [0, 0, 1, 1], [], []>} : vector<8x32xbf16>, vector<32x64xbf16>, vector<8x64xf32> -> vector<8x64xf32>
    %108 = vector.broadcast %105 : vector<1x64xf32> to vector<8x64xf32>
    %109 = arith.addf %107, %108 : vector<8x64xf32>
    %cst_49 = arith.constant 5.000000e-01 : f32
    %110 = vector.broadcast %cst_49 : f32 to vector<8x64xf32>
    %111 = arith.mulf %110, %109 : vector<8x64xf32>
    %cst_50 = arith.constant 0.707106769 : f32
    %112 = vector.broadcast %cst_50 : f32 to vector<8x64xf32>
    %113 = arith.mulf %109, %112 : vector<8x64xf32>
    %114 = math.erf %113 : vector<8x64xf32>
    %cst_51 = arith.constant 1.000000e+00 : f32
    %115 = vector.broadcast %cst_51 : f32 to vector<8x64xf32>
    %116 = arith.addf %115, %114 : vector<8x64xf32>
    %117 = arith.mulf %111, %116 : vector<8x64xf32>
    %c0_52 = arith.constant 0 : index
    %c0_53 = arith.constant 0 : index
    %c0_54 = arith.constant 0 : index
    %118 = vector.load %arg14[%c0_52, %c0_53, %c0_54] : memref<1x64x32xbf16, #tpu.memory_space<vmem>>, vector<1x64x32xbf16>
    %119 = vector.shape_cast %118 : vector<1x64x32xbf16> to vector<64x32xbf16>
    %c0_55 = arith.constant 0 : index
    %c0_56 = arith.constant 0 : index
    %c0_57 = arith.constant 0 : index
    %120 = vector.load %arg15[%c0_55, %c0_56, %c0_57] : memref<1x1x32xf32, #tpu.memory_space<vmem>>, vector<1x1x32xf32>
    %121 = vector.shape_cast %120 : vector<1x1x32xf32> to vector<1x32xf32>
    %122 = arith.truncf %117 : vector<8x64xf32> to vector<8x64xbf16>
    %cst_58 = arith.constant dense<0.000000e+00> : vector<8x32xf32>
    %123 = tpu.matmul %122, %119, %cst_58 {dimension_numbers = #tpu.dot_dimension_numbers<[1], [0], [0], [1], [0, 0, 1, 1], [], []>} : vector<8x64xbf16>, vector<64x32xbf16>, vector<8x32xf32> -> vector<8x32xf32>
    %124 = vector.broadcast %121 : vector<1x32xf32> to vector<8x32xf32>
    %125 = arith.addf %123, %124 : vector<8x32xf32>
    %126 = arith.addf %101, %125 : vector<8x32xf32>
    %c0_59 = arith.constant 0 : index
    %c0_60 = arith.constant 0 : index
    %c0_61 = arith.constant 0 : index
    %127 = vector.load %arg16[%c0_59, %c0_60, %c0_61] : memref<1x1x32xf32, #tpu.memory_space<vmem>>, vector<1x1x32xf32>
    %128 = vector.shape_cast %127 : vector<1x1x32xf32> to vector<1x32xf32>
    %c0_62 = arith.constant 0 : index
    %c0_63 = arith.constant 0 : index
    %c0_64 = arith.constant 0 : index
    %129 = vector.load %arg17[%c0_62, %c0_63, %c0_64] : memref<1x1x32xf32, #tpu.memory_space<vmem>>, vector<1x1x32xf32>
    %130 = vector.shape_cast %129 : vector<1x1x32xf32> to vector<1x32xf32>
    %cst_65 = arith.constant dense<0.000000e+00> : vector<8xf32>
    %131 = vector.multi_reduction <add>, %126, %cst_65 [1] : vector<8x32xf32> to vector<8xf32>
    %132 = vector.shape_cast %131 : vector<8xf32> to vector<8x1xf32>
    %cst_66 = arith.constant 3.200000e+01 : f32
    %133 = vector.broadcast %cst_66 : f32 to vector<8x1xf32>
    %134 = arith.divf %132, %133 : vector<8x1xf32>
    %135 = vector.broadcast %134 : vector<8x1xf32> to vector<8x32xf32>
    %136 = arith.subf %126, %135 : vector<8x32xf32>
    %137 = arith.mulf %136, %136 : vector<8x32xf32>
    %cst_67 = arith.constant dense<0.000000e+00> : vector<8xf32>
    %138 = vector.multi_reduction <add>, %137, %cst_67 [1] : vector<8x32xf32> to vector<8xf32>
    %139 = vector.shape_cast %138 : vector<8xf32> to vector<8x1xf32>
    %cst_68 = arith.constant 3.200000e+01 : f32
    %140 = vector.broadcast %cst_68 : f32 to vector<8x1xf32>
    %141 = arith.divf %139, %140 : vector<8x1xf32>
    %cst_69 = arith.constant 9.99999974E-6 : f32
    %142 = vector.broadcast %cst_69 : f32 to vector<8x1xf32>
    %143 = arith.addf %141, %142 : vector<8x1xf32>
    %144 = math.rsqrt %143 : vector<8x1xf32>
    %145 = vector.broadcast %144 : vector<8x1xf32> to vector<8x32xf32>
    %146 = arith.mulf %136, %145 : vector<8x32xf32>
    %147 = vector.broadcast %128 : vector<1x32xf32> to vector<8x32xf32>
    %148 = arith.mulf %146, %147 : vector<8x32xf32>
    %149 = vector.broadcast %130 : vector<1x32xf32> to vector<8x32xf32>
    %150 = arith.addf %148, %149 : vector<8x32xf32>
    %c0_70 = arith.constant 0 : index
    %c0_71 = arith.constant 0 : index
    %c0_72 = arith.constant 0 : index
    %151 = vector.load %arg18[%c0_70, %c0_71, %c0_72] : memref<1x8x32xf32, #tpu.memory_space<vmem>>, vector<1x8x32xf32>
    %152 = vector.shape_cast %151 : vector<1x8x32xf32> to vector<8x32xf32>
    %153 = vector.shape_cast %150 : vector<8x32xf32> to vector<1x8x32xf32>
    tpu.vector_store %arg18[%c0_70, %c0_71, %c0_72], %153 {strides = array<i32>} : memref<1x8x32xf32, #tpu.memory_space<vmem>>, vector<1x8x32xf32>,
    return
  }
  func.func @transform_0(%arg0: i32, %arg1: i32) -> (i32, i32, i32) {
    %c0_i32 = arith.constant 0 : i32
    %c0_i32_0 = arith.constant 0 : i32
    %c0_i32_1 = arith.constant 0 : i32
    return %arg0, %c0_i32, %c0_i32_0 : i32, i32, i32
  }
  func.func @transform_1(%arg0: i32, %arg1: i32) -> (i32, i32, i32) {
    %c0_i32 = arith.constant 0 : i32
    %c0_i32_0 = arith.constant 0 : i32
    %c0_i32_1 = arith.constant 0 : i32
    return %arg0, %c0_i32, %c0_i32_0 : i32, i32, i32
  }
  func.func @transform_2(%arg0: i32, %arg1: i32) -> (i32, i32) {
    %c0_i32 = arith.constant 0 : i32
    %c0_i32_0 = arith.constant 0 : i32
    %c0_i32_1 = arith.constant 0 : i32
    return %c0_i32, %c0_i32_0 : i32, i32
  }
  func.func @transform_3(%arg0: i32, %arg1: i32) -> (i32, i32) {
    %c0_i32 = arith.constant 0 : i32
    %c0_i32_0 = arith.constant 0 : i32
    %c0_i32_1 = arith.constant 0 : i32
    return %c0_i32, %c0_i32_0 : i32, i32
  }
  func.func @transform_4(%arg0: i32, %arg1: i32) -> (i32, i32, i32, i32) {
    %c0_i32 = arith.constant 0 : i32
    %c0_i32_0 = arith.constant 0 : i32
    %c0_i32_1 = arith.constant 0 : i32
    %c0_i32_2 = arith.constant 0 : i32
    return %arg1, %c0_i32, %c0_i32_0, %c0_i32_1 : i32, i32, i32, i32
  }
  func.func @transform_5(%arg0: i32, %arg1: i32) -> (i32, i32, i32, i32) {
    %c0_i32 = arith.constant 0 : i32
    %c0_i32_0 = arith.constant 0 : i32
    %c0_i32_1 = arith.constant 0 : i32
    %c0_i32_2 = arith.constant 0 : i32
    return %arg1, %c0_i32, %c0_i32_0, %c0_i32_1 : i32, i32, i32, i32
  }
  func.func @transform_6(%arg0: i32, %arg1: i32) -> (i32, i32, i32) {
    %c0_i32 = arith.constant 0 : i32
    %c0_i32_0 = arith.constant 0 : i32
    %c0_i32_1 = arith.constant 0 : i32
    return %arg1, %c0_i32, %c0_i32_0 : i32, i32, i32
  }
  func.func @transform_7(%arg0: i32, %arg1: i32) -> (i32, i32, i32) {
    %c0_i32 = arith.constant 0 : i32
    %c0_i32_0 = arith.constant 0 : i32
    %c0_i32_1 = arith.constant 0 : i32
    return %arg1, %c0_i32, %c0_i32_0 : i32, i32, i32
  }
  func.func @transform_8(%arg0: i32, %arg1: i32) -> (i32, i32, i32) {
    %c0_i32 = arith.constant 0 : i32
    %c0_i32_0 = arith.constant 0 : i32
    %c0_i32_1 = arith.constant 0 : i32
    return %arg1, %c0_i32, %c0_i32_0 : i32, i32, i32
  }
  func.func @transform_9(%arg0: i32, %arg1: i32) -> (i32, i32, i32) {
    %c0_i32 = arith.constant 0 : i32
    %c0_i32_0 = arith.constant 0 : i32
    %c0_i32_1 = arith.constant 0 : i32
    return %arg1, %c0_i32, %c0_i32_0 : i32, i32, i32
  }
  func.func @transform_10(%arg0: i32, %arg1: i32) -> (i32, i32, i32) {
    %c0_i32 = arith.constant 0 : i32
    %c0_i32_0 = arith.constant 0 : i32
    %c0_i32_1 = arith.constant 0 : i32
    return %arg1, %c0_i32, %c0_i32_0 : i32, i32, i32
  }
  func.func @transform_11(%arg0: i32, %arg1: i32) -> (i32, i32, i32) {
    %c0_i32 = arith.constant 0 : i32
    %c0_i32_0 = arith.constant 0 : i32
    %c0_i32_1 = arith.constant 0 : i32
    return %arg1, %c0_i32, %c0_i32_0 : i32, i32, i32
  }
  func.func @transform_12(%arg0: i32, %arg1: i32) -> (i32, i32, i32) {
    %c0_i32 = arith.constant 0 : i32
    %c0_i32_0 = arith.constant 0 : i32
    %c0_i32_1 = arith.constant 0 : i32
    return %arg1, %c0_i32, %c0_i32_0 : i32, i32, i32
  }
  func.func @transform_13(%arg0: i32, %arg1: i32) -> (i32, i32, i32) {
    %c0_i32 = arith.constant 0 : i32
    %c0_i32_0 = arith.constant 0 : i32
    %c0_i32_1 = arith.constant 0 : i32
    return %arg1, %c0_i32, %c0_i32_0 : i32, i32, i32
  }
  func.func @transform_14(%arg0: i32, %arg1: i32) -> (i32, i32, i32) {
    %c0_i32 = arith.constant 0 : i32
    %c0_i32_0 = arith.constant 0 : i32
    %c0_i32_1 = arith.constant 0 : i32
    return %arg1, %c0_i32, %c0_i32_0 : i32, i32, i32
  }
  func.func @transform_15(%arg0: i32, %arg1: i32) -> (i32, i32, i32) {
    %c0_i32 = arith.constant 0 : i32
    %c0_i32_0 = arith.constant 0 : i32
    %c0_i32_1 = arith.constant 0 : i32
    return %arg1, %c0_i32, %c0_i32_0 : i32, i32, i32
  }
  func.func @transform_16(%arg0: i32, %arg1: i32) -> (i32, i32, i32) {
    %c0_i32 = arith.constant 0 : i32
    %c0_i32_0 = arith.constant 0 : i32
    %c0_i32_1 = arith.constant 0 : i32
    return %arg0, %c0_i32, %c0_i32_0 : i32, i32, i32
  }
}

module attributes {stable_mosaic.version = 11 : i64} {
  func.func @_decoder_stack_kernel(%arg0: i32, %arg1: i32, %arg2: memref<1x8x32xf32, #tpu.memory_space<vmem>>, %arg3: memref<1x1x8xf32, #tpu.memory_space<vmem>>, %arg4: memref<1x8x32xf32, #tpu.memory_space<vmem>>, %arg5: memref<1x1x8xf32, #tpu.memory_space<vmem>>, %arg6: memref<1x32xf32, #tpu.memory_space<vmem>>, %arg7: memref<1x32xf32, #tpu.memory_space<vmem>>, %arg8: memref<1x3x32x32xbf16, #tpu.memory_space<vmem>>, %arg9: memref<1x3x1x32xf32, #tpu.memory_space<vmem>>, %arg10: memref<1x32x32xbf16, #tpu.memory_space<vmem>>, %arg11: memref<1x1x32xf32, #tpu.memory_space<vmem>>, %arg12: memref<1x1x32xf32, #tpu.memory_space<vmem>>, %arg13: memref<1x1x32xf32, #tpu.memory_space<vmem>>, %arg14: memref<1x3x32x32xbf16, #tpu.memory_space<vmem>>, %arg15: memref<1x3x1x32xf32, #tpu.memory_space<vmem>>, %arg16: memref<1x32x32xbf16, #tpu.memory_space<vmem>>, %arg17: memref<1x1x32xf32, #tpu.memory_space<vmem>>, %arg18: memref<1x1x32xf32, #tpu.memory_space<vmem>>, %arg19: memref<1x1x32xf32, #tpu.memory_space<vmem>>, %arg20: memref<1x32x64xbf16, #tpu.memory_space<vmem>>, %arg21: memref<1x1x64xf32, #tpu.memory_space<vmem>>, %arg22: memref<1x64x32xbf16, #tpu.memory_space<vmem>>, %arg23: memref<1x1x32xf32, #tpu.memory_space<vmem>>, %arg24: memref<1x1x32xf32, #tpu.memory_space<vmem>>, %arg25: memref<1x1x32xf32, #tpu.memory_space<vmem>>, %arg26: memref<1x8x32xf32, #tpu.memory_space<vmem>>) attributes {dimension_semantics = [#tpu.dimension_semantics<parallel>, #tpu.dimension_semantics<arbitrary>], iteration_bounds = array<i64: 2, 2>, scalar_prefetch = 0 : i64, scratch_operands = 0 : i64, tpu.core_type = #tpu.core_type<tc>, window_params = [{transform_indices = @transform_0, window_bounds = array<i64: 1, 8, 32>}, {transform_indices = @transform_1, window_bounds = array<i64: 1, 1, 8>}, {transform_indices = @transform_2, window_bounds = array<i64: 1, 8, 32>}, {transform_indices = @transform_3, window_bounds = array<i64: 1, 1, 8>}, {pipeline_mode = #tpu.pipeline_mode<synchronous>, transform_indices = @transform_4, window_bounds = array<i64: 1, 32>}, {pipeline_mode = #tpu.pipeline_mode<synchronous>, transform_indices = @transform_5, window_bounds = array<i64: 1, 32>}, {transform_indices = @transform_6, window_bounds = array<i64: 1, 3, 32, 32>}, {transform_indices = @transform_7, window_bounds = array<i64: 1, 3, 1, 32>}, {transform_indices = @transform_8, window_bounds = array<i64: 1, 32, 32>}, {transform_indices = @transform_9, window_bounds = array<i64: 1, 1, 32>}, {transform_indices = @transform_10, window_bounds = array<i64: 1, 1, 32>}, {transform_indices = @transform_11, window_bounds = array<i64: 1, 1, 32>}, {transform_indices = @transform_12, window_bounds = array<i64: 1, 3, 32, 32>}, {transform_indices = @transform_13, window_bounds = array<i64: 1, 3, 1, 32>}, {transform_indices = @transform_14, window_bounds = array<i64: 1, 32, 32>}, {transform_indices = @transform_15, window_bounds = array<i64: 1, 1, 32>}, {transform_indices = @transform_16, window_bounds = array<i64: 1, 1, 32>}, {transform_indices = @transform_17, window_bounds = array<i64: 1, 1, 32>}, {transform_indices = @transform_18, window_bounds = array<i64: 1, 32, 64>}, {transform_indices = @transform_19, window_bounds = array<i64: 1, 1, 64>}, {transform_indices = @transform_20, window_bounds = array<i64: 1, 64, 32>}, {transform_indices = @transform_21, window_bounds = array<i64: 1, 1, 32>}, {transform_indices = @transform_22, window_bounds = array<i64: 1, 1, 32>}, {transform_indices = @transform_23, window_bounds = array<i64: 1, 1, 32>}, {transform_indices = @transform_24, window_bounds = array<i64: 1, 8, 32>}]} {
    %c0_i32 = arith.constant 0 : i32
    %0 = arith.cmpi eq, %arg1, %c0_i32 : i32
    %1 = arith.extui %0 : i1 to i32
    %c0_i32_0 = arith.constant 0 : i32
    %2 = arith.cmpi ne, %1, %c0_i32_0 : i32
    scf.if %2 {
      %c0_116 = arith.constant 0 : index
      %c0_117 = arith.constant 0 : index
      %c0_118 = arith.constant 0 : index
      %258 = vector.load %arg2[%c0_116, %c0_117, %c0_118] : memref<1x8x32xf32, #tpu.memory_space<vmem>>, vector<1x8x32xf32>
      %259 = vector.shape_cast %258 : vector<1x8x32xf32> to vector<8x32xf32>
      %c0_119 = arith.constant 0 : index
      %c0_120 = arith.constant 0 : index
      %260 = vector.load %arg6[%c0_119, %c0_120] : memref<1x32xf32, #tpu.memory_space<vmem>>, vector<1x32xf32>
      %c0_121 = arith.constant 0 : index
      %c0_122 = arith.constant 0 : index
      %261 = vector.load %arg7[%c0_121, %c0_122] : memref<1x32xf32, #tpu.memory_space<vmem>>, vector<1x32xf32>
      %cst_123 = arith.constant dense<0.000000e+00> : vector<8xf32>
      %262 = vector.multi_reduction <add>, %259, %cst_123 [1] : vector<8x32xf32> to vector<8xf32>
      %263 = vector.shape_cast %262 : vector<8xf32> to vector<8x1xf32>
      %cst_124 = arith.constant 3.200000e+01 : f32
      %264 = vector.broadcast %cst_124 : f32 to vector<8x1xf32>
      %265 = arith.divf %263, %264 : vector<8x1xf32>
      %266 = vector.broadcast %265 : vector<8x1xf32> to vector<8x32xf32>
      %267 = arith.subf %259, %266 : vector<8x32xf32>
      %268 = arith.mulf %267, %267 : vector<8x32xf32>
      %cst_125 = arith.constant dense<0.000000e+00> : vector<8xf32>
      %269 = vector.multi_reduction <add>, %268, %cst_125 [1] : vector<8x32xf32> to vector<8xf32>
      %270 = vector.shape_cast %269 : vector<8xf32> to vector<8x1xf32>
      %cst_126 = arith.constant 3.200000e+01 : f32
      %271 = vector.broadcast %cst_126 : f32 to vector<8x1xf32>
      %272 = arith.divf %270, %271 : vector<8x1xf32>
      %cst_127 = arith.constant 9.99999974E-6 : f32
      %273 = vector.broadcast %cst_127 : f32 to vector<8x1xf32>
      %274 = arith.addf %272, %273 : vector<8x1xf32>
      %275 = math.rsqrt %274 : vector<8x1xf32>
      %276 = vector.broadcast %275 : vector<8x1xf32> to vector<8x32xf32>
      %277 = arith.mulf %267, %276 : vector<8x32xf32>
      %278 = vector.broadcast %260 : vector<1x32xf32> to vector<8x32xf32>
      %279 = arith.mulf %277, %278 : vector<8x32xf32>
      %280 = vector.broadcast %261 : vector<1x32xf32> to vector<8x32xf32>
      %281 = arith.addf %279, %280 : vector<8x32xf32>
      %c0_128 = arith.constant 0 : index
      %c0_129 = arith.constant 0 : index
      %c0_130 = arith.constant 0 : index
      %282 = vector.load %arg26[%c0_128, %c0_129, %c0_130] : memref<1x8x32xf32, #tpu.memory_space<vmem>>, vector<1x8x32xf32>
      %283 = vector.shape_cast %282 : vector<1x8x32xf32> to vector<8x32xf32>
      %284 = vector.shape_cast %281 : vector<8x32xf32> to vector<1x8x32xf32>
      tpu.vector_store %arg26[%c0_128, %c0_129, %c0_130], %284 {strides = array<i32>} : memref<1x8x32xf32, #tpu.memory_space<vmem>>, vector<1x8x32xf32>,
    } else {
    }
    %c0 = arith.constant 0 : index
    %c0_1 = arith.constant 0 : index
    %c0_2 = arith.constant 0 : index
    %3 = vector.load %arg26[%c0, %c0_1, %c0_2] : memref<1x8x32xf32, #tpu.memory_space<vmem>>, vector<1x8x32xf32>
    %4 = vector.shape_cast %3 : vector<1x8x32xf32> to vector<8x32xf32>
    %c0_3 = arith.constant 0 : index
    %c0_4 = arith.constant 0 : index
    %c0_5 = arith.constant 0 : index
    %5 = vector.load %arg4[%c0_3, %c0_4, %c0_5] : memref<1x8x32xf32, #tpu.memory_space<vmem>>, vector<1x8x32xf32>
    %6 = vector.shape_cast %5 : vector<1x8x32xf32> to vector<8x32xf32>
    %7 = tpu.iota {dimensions = array<i32: 0>} : vector<8x8xi32>
    %8 = tpu.iota {dimensions = array<i32: 1>} : vector<8x8xi32>
    %9 = arith.cmpi sle, %8, %7 : vector<8x8xi32>
    %c0_6 = arith.constant 0 : index
    %c0_7 = arith.constant 0 : index
    %c0_8 = arith.constant 0 : index
    %10 = vector.load %arg3[%c0_6, %c0_7, %c0_8] : memref<1x1x8xf32, #tpu.memory_space<vmem>>, vector<1x1x8xf32>
    %11 = vector.shape_cast %10 : vector<1x1x8xf32> to vector<1x8xf32>
    %cst = arith.constant 5.000000e-01 : f32
    %12 = vector.broadcast %cst : f32 to vector<1x8xf32>
    %13 = arith.cmpf ogt, %11, %12 : vector<1x8xf32>
    %14 = vector.broadcast %13 : vector<1x8xi1> to vector<8x8xi1>
    %15 = arith.andi %9, %14 : vector<8x8xi1>
    %cst_9 = arith.constant 0.000000e+00 : f32
    %cst_10 = arith.constant -3.40282347E+38 : f32
    %16 = vector.broadcast %cst_9 : f32 to vector<8x8xf32>
    %17 = vector.broadcast %cst_10 : f32 to vector<8x8xf32>
    %18 = arith.select %15, %16, %17 : vector<8x8xi1>, vector<8x8xf32>
    %c0_11 = arith.constant 0 : index
    %c0_12 = arith.constant 0 : index
    %c0_13 = arith.constant 0 : index
    %19 = vector.load %arg5[%c0_11, %c0_12, %c0_13] : memref<1x1x8xf32, #tpu.memory_space<vmem>>, vector<1x1x8xf32>
    %20 = vector.shape_cast %19 : vector<1x1x8xf32> to vector<1x8xf32>
    %cst_14 = arith.constant 5.000000e-01 : f32
    %21 = vector.broadcast %cst_14 : f32 to vector<1x8xf32>
    %22 = arith.cmpf ogt, %20, %21 : vector<1x8xf32>
    %cst_15 = arith.constant 0.000000e+00 : f32
    %cst_16 = arith.constant -3.40282347E+38 : f32
    %23 = vector.broadcast %cst_15 : f32 to vector<1x8xf32>
    %24 = vector.broadcast %cst_16 : f32 to vector<1x8xf32>
    %25 = arith.select %22, %23, %24 : vector<1x8xi1>, vector<1x8xf32>
    %c0_17 = arith.constant 0 : index
    %c0_18 = arith.constant 0 : index
    %c0_19 = arith.constant 0 : index
    %c0_20 = arith.constant 0 : index
    %26 = vector.load %arg8[%c0_17, %c0_18, %c0_19, %c0_20] : memref<1x3x32x32xbf16, #tpu.memory_space<vmem>>, vector<1x3x32x32xbf16>
    %27 = vector.shape_cast %26 : vector<1x3x32x32xbf16> to vector<3x32x32xbf16>
    %c0_21 = arith.constant 0 : index
    %c0_22 = arith.constant 0 : index
    %c0_23 = arith.constant 0 : index
    %c0_24 = arith.constant 0 : index
    %28 = vector.load %arg9[%c0_21, %c0_22, %c0_23, %c0_24] : memref<1x3x1x32xf32, #tpu.memory_space<vmem>>, vector<1x3x1x32xf32>
    %29 = vector.shape_cast %28 : vector<1x3x1x32xf32> to vector<3x1x32xf32>
    %30 = vector.extract_strided_slice %27 {offsets = [0, 0, 0], sizes = [1, 32, 32], strides = [1, 1, 1]} : vector<3x32x32xbf16> to vector<1x32x32xbf16>
    %31 = vector.shape_cast %30 : vector<1x32x32xbf16> to vector<32x32xbf16>
    %32 = vector.extract_strided_slice %29 {offsets = [0, 0, 0], sizes = [1, 1, 32], strides = [1, 1, 1]} : vector<3x1x32xf32> to vector<1x1x32xf32>
    %33 = vector.shape_cast %32 : vector<1x1x32xf32> to vector<1x32xf32>
    %34 = arith.truncf %4 : vector<8x32xf32> to vector<8x32xbf16>
    %cst_25 = arith.constant dense<0.000000e+00> : vector<8x32xf32>
    %35 = tpu.matmul %34, %31, %cst_25 {dimension_numbers = #tpu.dot_dimension_numbers<[1], [0], [0], [1], [0, 0, 1, 1], [], []>} : vector<8x32xbf16>, vector<32x32xbf16>, vector<8x32xf32> -> vector<8x32xf32>
    %36 = vector.broadcast %33 : vector<1x32xf32> to vector<8x32xf32>
    %37 = arith.addf %35, %36 : vector<8x32xf32>
    %38 = vector.extract_strided_slice %27 {offsets = [1, 0, 0], sizes = [1, 32, 32], strides = [1, 1, 1]} : vector<3x32x32xbf16> to vector<1x32x32xbf16>
    %39 = vector.shape_cast %38 : vector<1x32x32xbf16> to vector<32x32xbf16>
    %40 = vector.extract_strided_slice %29 {offsets = [1, 0, 0], sizes = [1, 1, 32], strides = [1, 1, 1]} : vector<3x1x32xf32> to vector<1x1x32xf32>
    %41 = vector.shape_cast %40 : vector<1x1x32xf32> to vector<1x32xf32>
    %42 = arith.truncf %4 : vector<8x32xf32> to vector<8x32xbf16>
    %cst_26 = arith.constant dense<0.000000e+00> : vector<8x32xf32>
    %43 = tpu.matmul %42, %39, %cst_26 {dimension_numbers = #tpu.dot_dimension_numbers<[1], [0], [0], [1], [0, 0, 1, 1], [], []>} : vector<8x32xbf16>, vector<32x32xbf16>, vector<8x32xf32> -> vector<8x32xf32>
    %44 = vector.broadcast %41 : vector<1x32xf32> to vector<8x32xf32>
    %45 = arith.addf %43, %44 : vector<8x32xf32>
    %46 = vector.extract_strided_slice %27 {offsets = [2, 0, 0], sizes = [1, 32, 32], strides = [1, 1, 1]} : vector<3x32x32xbf16> to vector<1x32x32xbf16>
    %47 = vector.shape_cast %46 : vector<1x32x32xbf16> to vector<32x32xbf16>
    %48 = vector.extract_strided_slice %29 {offsets = [2, 0, 0], sizes = [1, 1, 32], strides = [1, 1, 1]} : vector<3x1x32xf32> to vector<1x1x32xf32>
    %49 = vector.shape_cast %48 : vector<1x1x32xf32> to vector<1x32xf32>
    %50 = arith.truncf %4 : vector<8x32xf32> to vector<8x32xbf16>
    %cst_27 = arith.constant dense<0.000000e+00> : vector<8x32xf32>
    %51 = tpu.matmul %50, %47, %cst_27 {dimension_numbers = #tpu.dot_dimension_numbers<[1], [0], [0], [1], [0, 0, 1, 1], [], []>} : vector<8x32xbf16>, vector<32x32xbf16>, vector<8x32xf32> -> vector<8x32xf32>
    %52 = vector.broadcast %49 : vector<1x32xf32> to vector<8x32xf32>
    %53 = arith.addf %51, %52 : vector<8x32xf32>
    %54 = vector.shape_cast %37 : vector<8x32xf32> to vector<8x4x8xf32>
    %55 = tpu.transpose %54, [1, 0, 2] : vector<8x4x8xf32> -> vector<4x8x8xf32>
    %56 = arith.truncf %55 : vector<4x8x8xf32> to vector<4x8x8xbf16>
    %57 = vector.shape_cast %45 : vector<8x32xf32> to vector<8x4x8xf32>
    %58 = tpu.transpose %57, [1, 0, 2] : vector<8x4x8xf32> -> vector<4x8x8xf32>
    %59 = arith.truncf %58 : vector<4x8x8xf32> to vector<4x8x8xbf16>
    %60 = vector.shape_cast %53 : vector<8x32xf32> to vector<8x4x8xf32>
    %61 = tpu.transpose %60, [1, 0, 2] : vector<8x4x8xf32> -> vector<4x8x8xf32>
    %62 = arith.truncf %61 : vector<4x8x8xf32> to vector<4x8x8xbf16>
    "tpu.trace_start"() <{level = 10 : i32, message = "hqd,hkd->hqk"}> : () -> ()
    %cst_28 = arith.constant dense<0.000000e+00> : vector<4x8x8xf32>
    %63 = tpu.matmul %56, %59, %cst_28 {dimension_numbers = #tpu.dot_dimension_numbers<[2], [2], [1], [1], [0, 0, 0, 1, 1, 1], [0], [0]>} : vector<4x8x8xbf16>, vector<4x8x8xbf16>, vector<4x8x8xf32> -> vector<4x8x8xf32>
    "tpu.trace_stop"() : () -> ()
    %cst_29 = arith.constant 0.353553385 : f32
    %64 = vector.broadcast %cst_29 : f32 to vector<4x8x8xf32>
    %65 = arith.mulf %63, %64 : vector<4x8x8xf32>
    %66 = vector.shape_cast %18 : vector<8x8xf32> to vector<1x8x8xf32>
    %67 = vector.broadcast %66 : vector<1x8x8xf32> to vector<4x8x8xf32>
    %68 = arith.addf %65, %67 : vector<4x8x8xf32>
    %cst_30 = arith.constant dense<0xFF800000> : vector<4x8xf32>
    %69 = vector.multi_reduction <maximumf>, %68, %cst_30 [2] : vector<4x8x8xf32> to vector<4x8xf32>
    %70 = vector.shape_cast %69 : vector<4x8xf32> to vector<4x8x1xf32>
    %71 = vector.broadcast %70 : vector<4x8x1xf32> to vector<4x8x8xf32>
    %72 = arith.subf %68, %71 : vector<4x8x8xf32>
    %73 = math.exp %72 : vector<4x8x8xf32>
    %cst_31 = arith.constant dense<0.000000e+00> : vector<4x8xf32>
    %74 = vector.multi_reduction <add>, %73, %cst_31 [2] : vector<4x8x8xf32> to vector<4x8xf32>
    %75 = vector.shape_cast %74 : vector<4x8xf32> to vector<4x8x1xf32>
    %76 = tpu.reciprocal %75 {approx = true} : vector<4x8x1xf32> -> vector<4x8x1xf32>
    %77 = vector.broadcast %76 : vector<4x8x1xf32> to vector<4x8x8xf32>
    %78 = arith.mulf %73, %77 : vector<4x8x8xf32>
    %79 = arith.truncf %78 : vector<4x8x8xf32> to vector<4x8x8xbf16>
    "tpu.trace_start"() <{level = 10 : i32, message = "hqk,hkd->hqd"}> : () -> ()
    %cst_32 = arith.constant dense<0.000000e+00> : vector<4x8x8xf32>
    %80 = tpu.matmul %79, %62, %cst_32 {dimension_numbers = #tpu.dot_dimension_numbers<[2], [1], [1], [2], [0, 0, 0, 1, 1, 2], [0], [0]>} : vector<4x8x8xbf16>, vector<4x8x8xbf16>, vector<4x8x8xf32> -> vector<4x8x8xf32>
    "tpu.trace_stop"() : () -> ()
    %81 = tpu.transpose %80, [1, 0, 2] : vector<4x8x8xf32> -> vector<8x4x8xf32>
    %82 = vector.shape_cast %81 : vector<8x4x8xf32> to vector<8x32xf32>
    %c0_33 = arith.constant 0 : index
    %c0_34 = arith.constant 0 : index
    %c0_35 = arith.constant 0 : index
    %83 = vector.load %arg10[%c0_33, %c0_34, %c0_35] : memref<1x32x32xbf16, #tpu.memory_space<vmem>>, vector<1x32x32xbf16>
    %84 = vector.shape_cast %83 : vector<1x32x32xbf16> to vector<32x32xbf16>
    %c0_36 = arith.constant 0 : index
    %c0_37 = arith.constant 0 : index
    %c0_38 = arith.constant 0 : index
    %85 = vector.load %arg11[%c0_36, %c0_37, %c0_38] : memref<1x1x32xf32, #tpu.memory_space<vmem>>, vector<1x1x32xf32>
    %86 = vector.shape_cast %85 : vector<1x1x32xf32> to vector<1x32xf32>
    %87 = arith.truncf %82 : vector<8x32xf32> to vector<8x32xbf16>
    %cst_39 = arith.constant dense<0.000000e+00> : vector<8x32xf32>
    %88 = tpu.matmul %87, %84, %cst_39 {dimension_numbers = #tpu.dot_dimension_numbers<[1], [0], [0], [1], [0, 0, 1, 1], [], []>} : vector<8x32xbf16>, vector<32x32xbf16>, vector<8x32xf32> -> vector<8x32xf32>
    %89 = vector.broadcast %86 : vector<1x32xf32> to vector<8x32xf32>
    %90 = arith.addf %88, %89 : vector<8x32xf32>
    %91 = arith.addf %4, %90 : vector<8x32xf32>
    %c0_40 = arith.constant 0 : index
    %c0_41 = arith.constant 0 : index
    %c0_42 = arith.constant 0 : index
    %92 = vector.load %arg12[%c0_40, %c0_41, %c0_42] : memref<1x1x32xf32, #tpu.memory_space<vmem>>, vector<1x1x32xf32>
    %93 = vector.shape_cast %92 : vector<1x1x32xf32> to vector<1x32xf32>
    %c0_43 = arith.constant 0 : index
    %c0_44 = arith.constant 0 : index
    %c0_45 = arith.constant 0 : index
    %94 = vector.load %arg13[%c0_43, %c0_44, %c0_45] : memref<1x1x32xf32, #tpu.memory_space<vmem>>, vector<1x1x32xf32>
    %95 = vector.shape_cast %94 : vector<1x1x32xf32> to vector<1x32xf32>
    %cst_46 = arith.constant dense<0.000000e+00> : vector<8xf32>
    %96 = vector.multi_reduction <add>, %91, %cst_46 [1] : vector<8x32xf32> to vector<8xf32>
    %97 = vector.shape_cast %96 : vector<8xf32> to vector<8x1xf32>
    %cst_47 = arith.constant 3.200000e+01 : f32
    %98 = vector.broadcast %cst_47 : f32 to vector<8x1xf32>
    %99 = arith.divf %97, %98 : vector<8x1xf32>
    %100 = vector.broadcast %99 : vector<8x1xf32> to vector<8x32xf32>
    %101 = arith.subf %91, %100 : vector<8x32xf32>
    %102 = arith.mulf %101, %101 : vector<8x32xf32>
    %cst_48 = arith.constant dense<0.000000e+00> : vector<8xf32>
    %103 = vector.multi_reduction <add>, %102, %cst_48 [1] : vector<8x32xf32> to vector<8xf32>
    %104 = vector.shape_cast %103 : vector<8xf32> to vector<8x1xf32>
    %cst_49 = arith.constant 3.200000e+01 : f32
    %105 = vector.broadcast %cst_49 : f32 to vector<8x1xf32>
    %106 = arith.divf %104, %105 : vector<8x1xf32>
    %cst_50 = arith.constant 9.99999974E-6 : f32
    %107 = vector.broadcast %cst_50 : f32 to vector<8x1xf32>
    %108 = arith.addf %106, %107 : vector<8x1xf32>
    %109 = math.rsqrt %108 : vector<8x1xf32>
    %110 = vector.broadcast %109 : vector<8x1xf32> to vector<8x32xf32>
    %111 = arith.mulf %101, %110 : vector<8x32xf32>
    %112 = vector.broadcast %93 : vector<1x32xf32> to vector<8x32xf32>
    %113 = arith.mulf %111, %112 : vector<8x32xf32>
    %114 = vector.broadcast %95 : vector<1x32xf32> to vector<8x32xf32>
    %115 = arith.addf %113, %114 : vector<8x32xf32>
    %c0_51 = arith.constant 0 : index
    %c0_52 = arith.constant 0 : index
    %c0_53 = arith.constant 0 : index
    %c0_54 = arith.constant 0 : index
    %116 = vector.load %arg14[%c0_51, %c0_52, %c0_53, %c0_54] : memref<1x3x32x32xbf16, #tpu.memory_space<vmem>>, vector<1x3x32x32xbf16>
    %117 = vector.shape_cast %116 : vector<1x3x32x32xbf16> to vector<3x32x32xbf16>
    %c0_55 = arith.constant 0 : index
    %c0_56 = arith.constant 0 : index
    %c0_57 = arith.constant 0 : index
    %c0_58 = arith.constant 0 : index
    %118 = vector.load %arg15[%c0_55, %c0_56, %c0_57, %c0_58] : memref<1x3x1x32xf32, #tpu.memory_space<vmem>>, vector<1x3x1x32xf32>
    %119 = vector.shape_cast %118 : vector<1x3x1x32xf32> to vector<3x1x32xf32>
    %120 = vector.extract_strided_slice %117 {offsets = [0, 0, 0], sizes = [1, 32, 32], strides = [1, 1, 1]} : vector<3x32x32xbf16> to vector<1x32x32xbf16>
    %121 = vector.shape_cast %120 : vector<1x32x32xbf16> to vector<32x32xbf16>
    %122 = vector.extract_strided_slice %119 {offsets = [0, 0, 0], sizes = [1, 1, 32], strides = [1, 1, 1]} : vector<3x1x32xf32> to vector<1x1x32xf32>
    %123 = vector.shape_cast %122 : vector<1x1x32xf32> to vector<1x32xf32>
    %124 = arith.truncf %115 : vector<8x32xf32> to vector<8x32xbf16>
    %cst_59 = arith.constant dense<0.000000e+00> : vector<8x32xf32>
    %125 = tpu.matmul %124, %121, %cst_59 {dimension_numbers = #tpu.dot_dimension_numbers<[1], [0], [0], [1], [0, 0, 1, 1], [], []>} : vector<8x32xbf16>, vector<32x32xbf16>, vector<8x32xf32> -> vector<8x32xf32>
    %126 = vector.broadcast %123 : vector<1x32xf32> to vector<8x32xf32>
    %127 = arith.addf %125, %126 : vector<8x32xf32>
    %128 = vector.extract_strided_slice %117 {offsets = [1, 0, 0], sizes = [1, 32, 32], strides = [1, 1, 1]} : vector<3x32x32xbf16> to vector<1x32x32xbf16>
    %129 = vector.shape_cast %128 : vector<1x32x32xbf16> to vector<32x32xbf16>
    %130 = vector.extract_strided_slice %119 {offsets = [1, 0, 0], sizes = [1, 1, 32], strides = [1, 1, 1]} : vector<3x1x32xf32> to vector<1x1x32xf32>
    %131 = vector.shape_cast %130 : vector<1x1x32xf32> to vector<1x32xf32>
    %132 = arith.truncf %6 : vector<8x32xf32> to vector<8x32xbf16>
    %cst_60 = arith.constant dense<0.000000e+00> : vector<8x32xf32>
    %133 = tpu.matmul %132, %129, %cst_60 {dimension_numbers = #tpu.dot_dimension_numbers<[1], [0], [0], [1], [0, 0, 1, 1], [], []>} : vector<8x32xbf16>, vector<32x32xbf16>, vector<8x32xf32> -> vector<8x32xf32>
    %134 = vector.broadcast %131 : vector<1x32xf32> to vector<8x32xf32>
    %135 = arith.addf %133, %134 : vector<8x32xf32>
    %136 = vector.extract_strided_slice %117 {offsets = [2, 0, 0], sizes = [1, 32, 32], strides = [1, 1, 1]} : vector<3x32x32xbf16> to vector<1x32x32xbf16>
    %137 = vector.shape_cast %136 : vector<1x32x32xbf16> to vector<32x32xbf16>
    %138 = vector.extract_strided_slice %119 {offsets = [2, 0, 0], sizes = [1, 1, 32], strides = [1, 1, 1]} : vector<3x1x32xf32> to vector<1x1x32xf32>
    %139 = vector.shape_cast %138 : vector<1x1x32xf32> to vector<1x32xf32>
    %140 = arith.truncf %6 : vector<8x32xf32> to vector<8x32xbf16>
    %cst_61 = arith.constant dense<0.000000e+00> : vector<8x32xf32>
    %141 = tpu.matmul %140, %137, %cst_61 {dimension_numbers = #tpu.dot_dimension_numbers<[1], [0], [0], [1], [0, 0, 1, 1], [], []>} : vector<8x32xbf16>, vector<32x32xbf16>, vector<8x32xf32> -> vector<8x32xf32>
    %142 = vector.broadcast %139 : vector<1x32xf32> to vector<8x32xf32>
    %143 = arith.addf %141, %142 : vector<8x32xf32>
    %144 = vector.shape_cast %127 : vector<8x32xf32> to vector<8x4x8xf32>
    %145 = tpu.transpose %144, [1, 0, 2] : vector<8x4x8xf32> -> vector<4x8x8xf32>
    %146 = arith.truncf %145 : vector<4x8x8xf32> to vector<4x8x8xbf16>
    %147 = vector.shape_cast %135 : vector<8x32xf32> to vector<8x4x8xf32>
    %148 = tpu.transpose %147, [1, 0, 2] : vector<8x4x8xf32> -> vector<4x8x8xf32>
    %149 = arith.truncf %148 : vector<4x8x8xf32> to vector<4x8x8xbf16>
    %150 = vector.shape_cast %143 : vector<8x32xf32> to vector<8x4x8xf32>
    %151 = tpu.transpose %150, [1, 0, 2] : vector<8x4x8xf32> -> vector<4x8x8xf32>
    %152 = arith.truncf %151 : vector<4x8x8xf32> to vector<4x8x8xbf16>
    "tpu.trace_start"() <{level = 10 : i32, message = "hqd,hkd->hqk"}> : () -> ()
    %cst_62 = arith.constant dense<0.000000e+00> : vector<4x8x8xf32>
    %153 = tpu.matmul %146, %149, %cst_62 {dimension_numbers = #tpu.dot_dimension_numbers<[2], [2], [1], [1], [0, 0, 0, 1, 1, 1], [0], [0]>} : vector<4x8x8xbf16>, vector<4x8x8xbf16>, vector<4x8x8xf32> -> vector<4x8x8xf32>
    "tpu.trace_stop"() : () -> ()
    %cst_63 = arith.constant 0.353553385 : f32
    %154 = vector.broadcast %cst_63 : f32 to vector<4x8x8xf32>
    %155 = arith.mulf %153, %154 : vector<4x8x8xf32>
    %156 = vector.shape_cast %25 : vector<1x8xf32> to vector<1x1x8xf32>
    %157 = vector.broadcast %156 : vector<1x1x8xf32> to vector<4x8x8xf32>
    %158 = arith.addf %155, %157 : vector<4x8x8xf32>
    %cst_64 = arith.constant dense<0xFF800000> : vector<4x8xf32>
    %159 = vector.multi_reduction <maximumf>, %158, %cst_64 [2] : vector<4x8x8xf32> to vector<4x8xf32>
    %160 = vector.shape_cast %159 : vector<4x8xf32> to vector<4x8x1xf32>
    %161 = vector.broadcast %160 : vector<4x8x1xf32> to vector<4x8x8xf32>
    %162 = arith.subf %158, %161 : vector<4x8x8xf32>
    %163 = math.exp %162 : vector<4x8x8xf32>
    %cst_65 = arith.constant dense<0.000000e+00> : vector<4x8xf32>
    %164 = vector.multi_reduction <add>, %163, %cst_65 [2] : vector<4x8x8xf32> to vector<4x8xf32>
    %165 = vector.shape_cast %164 : vector<4x8xf32> to vector<4x8x1xf32>
    %166 = tpu.reciprocal %165 {approx = true} : vector<4x8x1xf32> -> vector<4x8x1xf32>
    %167 = vector.broadcast %166 : vector<4x8x1xf32> to vector<4x8x8xf32>
    %168 = arith.mulf %163, %167 : vector<4x8x8xf32>
    %169 = arith.truncf %168 : vector<4x8x8xf32> to vector<4x8x8xbf16>
    "tpu.trace_start"() <{level = 10 : i32, message = "hqk,hkd->hqd"}> : () -> ()
    %cst_66 = arith.constant dense<0.000000e+00> : vector<4x8x8xf32>
    %170 = tpu.matmul %169, %152, %cst_66 {dimension_numbers = #tpu.dot_dimension_numbers<[2], [1], [1], [2], [0, 0, 0, 1, 1, 2], [0], [0]>} : vector<4x8x8xbf16>, vector<4x8x8xbf16>, vector<4x8x8xf32> -> vector<4x8x8xf32>
    "tpu.trace_stop"() : () -> ()
    %171 = tpu.transpose %170, [1, 0, 2] : vector<4x8x8xf32> -> vector<8x4x8xf32>
    %172 = vector.shape_cast %171 : vector<8x4x8xf32> to vector<8x32xf32>
    %c0_67 = arith.constant 0 : index
    %c0_68 = arith.constant 0 : index
    %c0_69 = arith.constant 0 : index
    %173 = vector.load %arg16[%c0_67, %c0_68, %c0_69] : memref<1x32x32xbf16, #tpu.memory_space<vmem>>, vector<1x32x32xbf16>
    %174 = vector.shape_cast %173 : vector<1x32x32xbf16> to vector<32x32xbf16>
    %c0_70 = arith.constant 0 : index
    %c0_71 = arith.constant 0 : index
    %c0_72 = arith.constant 0 : index
    %175 = vector.load %arg17[%c0_70, %c0_71, %c0_72] : memref<1x1x32xf32, #tpu.memory_space<vmem>>, vector<1x1x32xf32>
    %176 = vector.shape_cast %175 : vector<1x1x32xf32> to vector<1x32xf32>
    %177 = arith.truncf %172 : vector<8x32xf32> to vector<8x32xbf16>
    %cst_73 = arith.constant dense<0.000000e+00> : vector<8x32xf32>
    %178 = tpu.matmul %177, %174, %cst_73 {dimension_numbers = #tpu.dot_dimension_numbers<[1], [0], [0], [1], [0, 0, 1, 1], [], []>} : vector<8x32xbf16>, vector<32x32xbf16>, vector<8x32xf32> -> vector<8x32xf32>
    %179 = vector.broadcast %176 : vector<1x32xf32> to vector<8x32xf32>
    %180 = arith.addf %178, %179 : vector<8x32xf32>
    %181 = arith.addf %115, %180 : vector<8x32xf32>
    %c0_74 = arith.constant 0 : index
    %c0_75 = arith.constant 0 : index
    %c0_76 = arith.constant 0 : index
    %182 = vector.load %arg18[%c0_74, %c0_75, %c0_76] : memref<1x1x32xf32, #tpu.memory_space<vmem>>, vector<1x1x32xf32>
    %183 = vector.shape_cast %182 : vector<1x1x32xf32> to vector<1x32xf32>
    %c0_77 = arith.constant 0 : index
    %c0_78 = arith.constant 0 : index
    %c0_79 = arith.constant 0 : index
    %184 = vector.load %arg19[%c0_77, %c0_78, %c0_79] : memref<1x1x32xf32, #tpu.memory_space<vmem>>, vector<1x1x32xf32>
    %185 = vector.shape_cast %184 : vector<1x1x32xf32> to vector<1x32xf32>
    %cst_80 = arith.constant dense<0.000000e+00> : vector<8xf32>
    %186 = vector.multi_reduction <add>, %181, %cst_80 [1] : vector<8x32xf32> to vector<8xf32>
    %187 = vector.shape_cast %186 : vector<8xf32> to vector<8x1xf32>
    %cst_81 = arith.constant 3.200000e+01 : f32
    %188 = vector.broadcast %cst_81 : f32 to vector<8x1xf32>
    %189 = arith.divf %187, %188 : vector<8x1xf32>
    %190 = vector.broadcast %189 : vector<8x1xf32> to vector<8x32xf32>
    %191 = arith.subf %181, %190 : vector<8x32xf32>
    %192 = arith.mulf %191, %191 : vector<8x32xf32>
    %cst_82 = arith.constant dense<0.000000e+00> : vector<8xf32>
    %193 = vector.multi_reduction <add>, %192, %cst_82 [1] : vector<8x32xf32> to vector<8xf32>
    %194 = vector.shape_cast %193 : vector<8xf32> to vector<8x1xf32>
    %cst_83 = arith.constant 3.200000e+01 : f32
    %195 = vector.broadcast %cst_83 : f32 to vector<8x1xf32>
    %196 = arith.divf %194, %195 : vector<8x1xf32>
    %cst_84 = arith.constant 9.99999974E-6 : f32
    %197 = vector.broadcast %cst_84 : f32 to vector<8x1xf32>
    %198 = arith.addf %196, %197 : vector<8x1xf32>
    %199 = math.rsqrt %198 : vector<8x1xf32>
    %200 = vector.broadcast %199 : vector<8x1xf32> to vector<8x32xf32>
    %201 = arith.mulf %191, %200 : vector<8x32xf32>
    %202 = vector.broadcast %183 : vector<1x32xf32> to vector<8x32xf32>
    %203 = arith.mulf %201, %202 : vector<8x32xf32>
    %204 = vector.broadcast %185 : vector<1x32xf32> to vector<8x32xf32>
    %205 = arith.addf %203, %204 : vector<8x32xf32>
    %c0_85 = arith.constant 0 : index
    %c0_86 = arith.constant 0 : index
    %c0_87 = arith.constant 0 : index
    %206 = vector.load %arg20[%c0_85, %c0_86, %c0_87] : memref<1x32x64xbf16, #tpu.memory_space<vmem>>, vector<1x32x64xbf16>
    %207 = vector.shape_cast %206 : vector<1x32x64xbf16> to vector<32x64xbf16>
    %c0_88 = arith.constant 0 : index
    %c0_89 = arith.constant 0 : index
    %c0_90 = arith.constant 0 : index
    %208 = vector.load %arg21[%c0_88, %c0_89, %c0_90] : memref<1x1x64xf32, #tpu.memory_space<vmem>>, vector<1x1x64xf32>
    %209 = vector.shape_cast %208 : vector<1x1x64xf32> to vector<1x64xf32>
    %210 = arith.truncf %205 : vector<8x32xf32> to vector<8x32xbf16>
    %cst_91 = arith.constant dense<0.000000e+00> : vector<8x64xf32>
    %211 = tpu.matmul %210, %207, %cst_91 {dimension_numbers = #tpu.dot_dimension_numbers<[1], [0], [0], [1], [0, 0, 1, 1], [], []>} : vector<8x32xbf16>, vector<32x64xbf16>, vector<8x64xf32> -> vector<8x64xf32>
    %212 = vector.broadcast %209 : vector<1x64xf32> to vector<8x64xf32>
    %213 = arith.addf %211, %212 : vector<8x64xf32>
    %cst_92 = arith.constant 5.000000e-01 : f32
    %214 = vector.broadcast %cst_92 : f32 to vector<8x64xf32>
    %215 = arith.mulf %214, %213 : vector<8x64xf32>
    %cst_93 = arith.constant 0.707106769 : f32
    %216 = vector.broadcast %cst_93 : f32 to vector<8x64xf32>
    %217 = arith.mulf %213, %216 : vector<8x64xf32>
    %218 = math.erf %217 : vector<8x64xf32>
    %cst_94 = arith.constant 1.000000e+00 : f32
    %219 = vector.broadcast %cst_94 : f32 to vector<8x64xf32>
    %220 = arith.addf %219, %218 : vector<8x64xf32>
    %221 = arith.mulf %215, %220 : vector<8x64xf32>
    %c0_95 = arith.constant 0 : index
    %c0_96 = arith.constant 0 : index
    %c0_97 = arith.constant 0 : index
    %222 = vector.load %arg22[%c0_95, %c0_96, %c0_97] : memref<1x64x32xbf16, #tpu.memory_space<vmem>>, vector<1x64x32xbf16>
    %223 = vector.shape_cast %222 : vector<1x64x32xbf16> to vector<64x32xbf16>
    %c0_98 = arith.constant 0 : index
    %c0_99 = arith.constant 0 : index
    %c0_100 = arith.constant 0 : index
    %224 = vector.load %arg23[%c0_98, %c0_99, %c0_100] : memref<1x1x32xf32, #tpu.memory_space<vmem>>, vector<1x1x32xf32>
    %225 = vector.shape_cast %224 : vector<1x1x32xf32> to vector<1x32xf32>
    %226 = arith.truncf %221 : vector<8x64xf32> to vector<8x64xbf16>
    %cst_101 = arith.constant dense<0.000000e+00> : vector<8x32xf32>
    %227 = tpu.matmul %226, %223, %cst_101 {dimension_numbers = #tpu.dot_dimension_numbers<[1], [0], [0], [1], [0, 0, 1, 1], [], []>} : vector<8x64xbf16>, vector<64x32xbf16>, vector<8x32xf32> -> vector<8x32xf32>
    %228 = vector.broadcast %225 : vector<1x32xf32> to vector<8x32xf32>
    %229 = arith.addf %227, %228 : vector<8x32xf32>
    %230 = arith.addf %205, %229 : vector<8x32xf32>
    %c0_102 = arith.constant 0 : index
    %c0_103 = arith.constant 0 : index
    %c0_104 = arith.constant 0 : index
    %231 = vector.load %arg24[%c0_102, %c0_103, %c0_104] : memref<1x1x32xf32, #tpu.memory_space<vmem>>, vector<1x1x32xf32>
    %232 = vector.shape_cast %231 : vector<1x1x32xf32> to vector<1x32xf32>
    %c0_105 = arith.constant 0 : index
    %c0_106 = arith.constant 0 : index
    %c0_107 = arith.constant 0 : index
    %233 = vector.load %arg25[%c0_105, %c0_106, %c0_107] : memref<1x1x32xf32, #tpu.memory_space<vmem>>, vector<1x1x32xf32>
    %234 = vector.shape_cast %233 : vector<1x1x32xf32> to vector<1x32xf32>
    %cst_108 = arith.constant dense<0.000000e+00> : vector<8xf32>
    %235 = vector.multi_reduction <add>, %230, %cst_108 [1] : vector<8x32xf32> to vector<8xf32>
    %236 = vector.shape_cast %235 : vector<8xf32> to vector<8x1xf32>
    %cst_109 = arith.constant 3.200000e+01 : f32
    %237 = vector.broadcast %cst_109 : f32 to vector<8x1xf32>
    %238 = arith.divf %236, %237 : vector<8x1xf32>
    %239 = vector.broadcast %238 : vector<8x1xf32> to vector<8x32xf32>
    %240 = arith.subf %230, %239 : vector<8x32xf32>
    %241 = arith.mulf %240, %240 : vector<8x32xf32>
    %cst_110 = arith.constant dense<0.000000e+00> : vector<8xf32>
    %242 = vector.multi_reduction <add>, %241, %cst_110 [1] : vector<8x32xf32> to vector<8xf32>
    %243 = vector.shape_cast %242 : vector<8xf32> to vector<8x1xf32>
    %cst_111 = arith.constant 3.200000e+01 : f32
    %244 = vector.broadcast %cst_111 : f32 to vector<8x1xf32>
    %245 = arith.divf %243, %244 : vector<8x1xf32>
    %cst_112 = arith.constant 9.99999974E-6 : f32
    %246 = vector.broadcast %cst_112 : f32 to vector<8x1xf32>
    %247 = arith.addf %245, %246 : vector<8x1xf32>
    %248 = math.rsqrt %247 : vector<8x1xf32>
    %249 = vector.broadcast %248 : vector<8x1xf32> to vector<8x32xf32>
    %250 = arith.mulf %240, %249 : vector<8x32xf32>
    %251 = vector.broadcast %232 : vector<1x32xf32> to vector<8x32xf32>
    %252 = arith.mulf %250, %251 : vector<8x32xf32>
    %253 = vector.broadcast %234 : vector<1x32xf32> to vector<8x32xf32>
    %254 = arith.addf %252, %253 : vector<8x32xf32>
    %c0_113 = arith.constant 0 : index
    %c0_114 = arith.constant 0 : index
    %c0_115 = arith.constant 0 : index
    %255 = vector.load %arg26[%c0_113, %c0_114, %c0_115] : memref<1x8x32xf32, #tpu.memory_space<vmem>>, vector<1x8x32xf32>
    %256 = vector.shape_cast %255 : vector<1x8x32xf32> to vector<8x32xf32>
    %257 = vector.shape_cast %254 : vector<8x32xf32> to vector<1x8x32xf32>
    tpu.vector_store %arg26[%c0_113, %c0_114, %c0_115], %257 {strides = array<i32>} : memref<1x8x32xf32, #tpu.memory_space<vmem>>, vector<1x8x32xf32>,
    return
  }
  func.func @transform_0(%arg0: i32, %arg1: i32) -> (i32, i32, i32) {
    %c0_i32 = arith.constant 0 : i32
    %c0_i32_0 = arith.constant 0 : i32
    %c0_i32_1 = arith.constant 0 : i32
    return %arg0, %c0_i32, %c0_i32_0 : i32, i32, i32
  }
  func.func @transform_1(%arg0: i32, %arg1: i32) -> (i32, i32, i32) {
    %c0_i32 = arith.constant 0 : i32
    %c0_i32_0 = arith.constant 0 : i32
    %c0_i32_1 = arith.constant 0 : i32
    return %arg0, %c0_i32, %c0_i32_0 : i32, i32, i32
  }
  func.func @transform_2(%arg0: i32, %arg1: i32) -> (i32, i32, i32) {
    %c0_i32 = arith.constant 0 : i32
    %c0_i32_0 = arith.constant 0 : i32
    %c0_i32_1 = arith.constant 0 : i32
    return %arg0, %c0_i32, %c0_i32_0 : i32, i32, i32
  }
  func.func @transform_3(%arg0: i32, %arg1: i32) -> (i32, i32, i32) {
    %c0_i32 = arith.constant 0 : i32
    %c0_i32_0 = arith.constant 0 : i32
    %c0_i32_1 = arith.constant 0 : i32
    return %arg0, %c0_i32, %c0_i32_0 : i32, i32, i32
  }
  func.func @transform_4(%arg0: i32, %arg1: i32) -> (i32, i32) {
    %c0_i32 = arith.constant 0 : i32
    %c0_i32_0 = arith.constant 0 : i32
    %c0_i32_1 = arith.constant 0 : i32
    return %c0_i32, %c0_i32_0 : i32, i32
  }
  func.func @transform_5(%arg0: i32, %arg1: i32) -> (i32, i32) {
    %c0_i32 = arith.constant 0 : i32
    %c0_i32_0 = arith.constant 0 : i32
    %c0_i32_1 = arith.constant 0 : i32
    return %c0_i32, %c0_i32_0 : i32, i32
  }
  func.func @transform_6(%arg0: i32, %arg1: i32) -> (i32, i32, i32, i32) {
    %c0_i32 = arith.constant 0 : i32
    %c0_i32_0 = arith.constant 0 : i32
    %c0_i32_1 = arith.constant 0 : i32
    %c0_i32_2 = arith.constant 0 : i32
    return %arg1, %c0_i32, %c0_i32_0, %c0_i32_1 : i32, i32, i32, i32
  }
  func.func @transform_7(%arg0: i32, %arg1: i32) -> (i32, i32, i32, i32) {
    %c0_i32 = arith.constant 0 : i32
    %c0_i32_0 = arith.constant 0 : i32
    %c0_i32_1 = arith.constant 0 : i32
    %c0_i32_2 = arith.constant 0 : i32
    return %arg1, %c0_i32, %c0_i32_0, %c0_i32_1 : i32, i32, i32, i32
  }
  func.func @transform_8(%arg0: i32, %arg1: i32) -> (i32, i32, i32) {
    %c0_i32 = arith.constant 0 : i32
    %c0_i32_0 = arith.constant 0 : i32
    %c0_i32_1 = arith.constant 0 : i32
    return %arg1, %c0_i32, %c0_i32_0 : i32, i32, i32
  }
  func.func @transform_9(%arg0: i32, %arg1: i32) -> (i32, i32, i32) {
    %c0_i32 = arith.constant 0 : i32
    %c0_i32_0 = arith.constant 0 : i32
    %c0_i32_1 = arith.constant 0 : i32
    return %arg1, %c0_i32, %c0_i32_0 : i32, i32, i32
  }
  func.func @transform_10(%arg0: i32, %arg1: i32) -> (i32, i32, i32) {
    %c0_i32 = arith.constant 0 : i32
    %c0_i32_0 = arith.constant 0 : i32
    %c0_i32_1 = arith.constant 0 : i32
    return %arg1, %c0_i32, %c0_i32_0 : i32, i32, i32
  }
  func.func @transform_11(%arg0: i32, %arg1: i32) -> (i32, i32, i32) {
    %c0_i32 = arith.constant 0 : i32
    %c0_i32_0 = arith.constant 0 : i32
    %c0_i32_1 = arith.constant 0 : i32
    return %arg1, %c0_i32, %c0_i32_0 : i32, i32, i32
  }
  func.func @transform_12(%arg0: i32, %arg1: i32) -> (i32, i32, i32, i32) {
    %c0_i32 = arith.constant 0 : i32
    %c0_i32_0 = arith.constant 0 : i32
    %c0_i32_1 = arith.constant 0 : i32
    %c0_i32_2 = arith.constant 0 : i32
    return %arg1, %c0_i32, %c0_i32_0, %c0_i32_1 : i32, i32, i32, i32
  }
  func.func @transform_13(%arg0: i32, %arg1: i32) -> (i32, i32, i32, i32) {
    %c0_i32 = arith.constant 0 : i32
    %c0_i32_0 = arith.constant 0 : i32
    %c0_i32_1 = arith.constant 0 : i32
    %c0_i32_2 = arith.constant 0 : i32
    return %arg1, %c0_i32, %c0_i32_0, %c0_i32_1 : i32, i32, i32, i32
  }
  func.func @transform_14(%arg0: i32, %arg1: i32) -> (i32, i32, i32) {
    %c0_i32 = arith.constant 0 : i32
    %c0_i32_0 = arith.constant 0 : i32
    %c0_i32_1 = arith.constant 0 : i32
    return %arg1, %c0_i32, %c0_i32_0 : i32, i32, i32
  }
  func.func @transform_15(%arg0: i32, %arg1: i32) -> (i32, i32, i32) {
    %c0_i32 = arith.constant 0 : i32
    %c0_i32_0 = arith.constant 0 : i32
    %c0_i32_1 = arith.constant 0 : i32
    return %arg1, %c0_i32, %c0_i32_0 : i32, i32, i32
  }
  func.func @transform_16(%arg0: i32, %arg1: i32) -> (i32, i32, i32) {
    %c0_i32 = arith.constant 0 : i32
    %c0_i32_0 = arith.constant 0 : i32
    %c0_i32_1 = arith.constant 0 : i32
    return %arg1, %c0_i32, %c0_i32_0 : i32, i32, i32
  }
  func.func @transform_17(%arg0: i32, %arg1: i32) -> (i32, i32, i32) {
    %c0_i32 = arith.constant 0 : i32
    %c0_i32_0 = arith.constant 0 : i32
    %c0_i32_1 = arith.constant 0 : i32
    return %arg1, %c0_i32, %c0_i32_0 : i32, i32, i32
  }
  func.func @transform_18(%arg0: i32, %arg1: i32) -> (i32, i32, i32) {
    %c0_i32 = arith.constant 0 : i32
    %c0_i32_0 = arith.constant 0 : i32
    %c0_i32_1 = arith.constant 0 : i32
    return %arg1, %c0_i32, %c0_i32_0 : i32, i32, i32
  }
  func.func @transform_19(%arg0: i32, %arg1: i32) -> (i32, i32, i32) {
    %c0_i32 = arith.constant 0 : i32
    %c0_i32_0 = arith.constant 0 : i32
    %c0_i32_1 = arith.constant 0 : i32
    return %arg1, %c0_i32, %c0_i32_0 : i32, i32, i32
  }
  func.func @transform_20(%arg0: i32, %arg1: i32) -> (i32, i32, i32) {
    %c0_i32 = arith.constant 0 : i32
    %c0_i32_0 = arith.constant 0 : i32
    %c0_i32_1 = arith.constant 0 : i32
    return %arg1, %c0_i32, %c0_i32_0 : i32, i32, i32
  }
  func.func @transform_21(%arg0: i32, %arg1: i32) -> (i32, i32, i32) {
    %c0_i32 = arith.constant 0 : i32
    %c0_i32_0 = arith.constant 0 : i32
    %c0_i32_1 = arith.constant 0 : i32
    return %arg1, %c0_i32, %c0_i32_0 : i32, i32, i32
  }
  func.func @transform_22(%arg0: i32, %arg1: i32) -> (i32, i32, i32) {
    %c0_i32 = arith.constant 0 : i32
    %c0_i32_0 = arith.constant 0 : i32
    %c0_i32_1 = arith.constant 0 : i32
    return %arg1, %c0_i32, %c0_i32_0 : i32, i32, i32
  }
  func.func @transform_23(%arg0: i32, %arg1: i32) -> (i32, i32, i32) {
    %c0_i32 = arith.constant 0 : i32
    %c0_i32_0 = arith.constant 0 : i32
    %c0_i32_1 = arith.constant 0 : i32
    return %arg1, %c0_i32, %c0_i32_0 : i32, i32, i32
  }
  func.func @transform_24(%arg0: i32, %arg1: i32) -> (i32, i32, i32) {
    %c0_i32 = arith.constant 0 : i32
    %c0_i32_0 = arith.constant 0 : i32
    %c0_i32_1 = arith.constant 0 : i32
    return %arg0, %c0_i32, %c0_i32_0 : i32, i32, i32
  }
}

</mosaic_0001>

<bundles_post_ra>
// kernel: sql_bart_forward.5
= control target key start
LH: loop header
LB: loop body
LE: loop exit
PB: predicated region body
PF: predicated region fallthrough
CT: control target
= control target key end

     0   :  { %v172_v1 = vmov 0.0   ;;  %vm173_vm0 = vmmov 0   ;;  %vm20_vm1 = vcmask 523264   ;;  %s230_s0 = inlined_call_operand.vmem [shape: f32[16,32], index: 0, kind: input, shape index: {}]   ;;  %s231_s1 = inlined_call_operand.vmem [shape: bf16[32,64], index: 1, kind: input, shape index: {}]   ;;  %s232_s2 = inlined_call_operand.vmem [shape: f32[1,64], index: 2, kind: input, shape index: {}]   ;;  %s233_s3 = inlined_call_operand.hbm [shape: f32[16,64], index: 3, kind: output, shape index: {}]  }
   0x1   :  { %v146_v0 = vld [vmem:[%s231_s1] sm:$0xff]   ;;  %133 = vmatprep.subr.bf16.mxu0 %v172_v1  ;;  %v147_v2 = vld [vmem:[%s231_s1 + $0x8] sm:$0xff]   ;;  %137 = vmatprep.mubr.msk.bf16.mxu0 %vm173_vm0, %v172_v1 }
   0x2   :  { %134 = vmatpush3.bf16.msra.mxu0 %v146_v0  ;;  %v25_v3 = vld [vmem:[%s230_s0] sm:$0xff]  ;;  %v26_v4 = vld [vmem:[%s230_s0 + $0x8] sm:$0xff] }
   0x3   :  { %8 = vsyncpa [#allocation4], 0  ;;  %135 = vmatprep.subr.bf16.mxu0 %v172_v1  ;;  %21 = vst.msk [vmem:[#allocation2] sm:$0xff] %vm20_vm1, %v172_v1  ;;  %v27_v5 = vpack.c.bf16 %v26_v4, %v25_v3  ;;  %vm44_vm2 = vcmask 261120   ;;  %v129_v14 = vld [vmem:[%s232_s2] ss:$0 sm:$0xff] }
   0x4   :  { %22 = vst.msk [vmem:[#allocation2 + $0x8] sm:$0xff] %vm20_vm1, %v172_v1  ;;  %s174_s20 = smov [#allocation3]  }
   0x5   :  { %s115_s21 = sshll.u32 %s174_s20, 4  ;;  %s116_s21 = int_to_ptr.vmem [resolvable:$true] %s115_s21 }
   0x6   :  { %136 = vmatpush3.bf16.msra.mxu0 %v147_v2  ;;  %s148_s22 = scalar_lea.vmem %s116_s21, 256  ;;  %p153_p1 = scmp.lt.s32.totalorder %s116_s21, %s116_s21 }
   0x7   :  { %p149_p0 = scmp.ne.s32.totalorder %s116_s21, %s148_s22  ;;  %p154_p2 = scmp.lt.s32.totalorder %s148_s22, %s148_s22 }
   0x9   :  { %138 = vmatmul.mubr.msk.bf16.vlgmr.msra.gmra.mrb[0].mxu0 %vm44_vm2, %v27_v5  ;;  %p155_p3 = por %p154_p2, %p153_p1 }
   0xa   :  { %v23_v6 = vld [vmem:[#allocation2] sm:$0xff] }
   0xb   :  { %v24_v8 = vld [vmem:[#allocation2 + $0x8] sm:$0xff]  ;;  %p156_p4 = pnand %p155_p3, %p149_p0 }
  0xdc   :  { %v82_v7 = vpop.f32.mrb[0].mxu0 }
  0xdd   :  { %v89_v9 = vadd.f32 %v82_v7, %v23_v6  ;;  %v139_v10 = vpop.f32.mrb[1].mxu0 }
  0xde   :  { %v85_v11 = vpop.f32.mrb[2].mxu0 }
  0xdf   :  { %92 = vst.msk [vmem:[#allocation2] sm:$0xff] %vm20_vm1, %v89_v9  ;;  %v90_v12 = vadd.f32 %v85_v11, %v24_v8  ;;  %v140_v13 = vpop.f32.mrb[3].mxu0 }
  0xe1   :  { %93 = vst.msk [vmem:[#allocation2 + $0x8] sm:$0xff] %vm20_vm1, %v90_v12 }
  0xe6   :  { %v97_v15 = vld [vmem:[#allocation2] sm:$0xff] }
  0xe7   :  { %v106_v16 = vadd.f32 %v129_v14, %v97_v15 }
  0xe8   :  { %v98_v17 = vld [vmem:[#allocation2 + $0x8] sm:$0xff] }
  0xe9   :  { %v107_v18 = vadd.f32 %v129_v14, %v98_v17  ;;  %108 = vst.msk [vmem:[#allocation3] sm:$0xff] %vm20_vm1, %v106_v16 }
  0xeb   :  { %109 = vst.msk [vmem:[#allocation3 + $0x8] sm:$0xff] %vm20_vm1, %v107_v18 }
  0xec   :  { %159 = shalt.err (!%p156_p4)
}
  0xed   :  { %s160_s24 = scalar_lea.hbm %s233_s3, 256 }
  0xee   :  { %p161_p5 = scmp.ne.s32.totalorder %s233_s3, %s160_s24  ;;  %p164_p6 = scmp.lt.u32.totalorder %s160_s24, %s233_s3 }
  0xf0   :  { %p166_p7 = pnand %p164_p6, %p161_p5 }
  0xf2   :  { %169 = shalt.err (!%p166_p7)
}
  0xf3   :  { %s175_s29 = smov 128   ;;  %s176_s30 = smov 8  }
  0xf4   :  { %121 = dma.vmem_to_hbm [thread:$0]  %s116_s21, 256, %s233_s3, [#allocation4], %s175_s29, %s175_s29, %s176_s30  }
  0xf5   :  { %170 = dma.done.wait [#allocation4], 256  }
  0xf6   :  { %171 = vsyncadd [#allocation4], 4294967040 }
  0xf7   :  { %125 = vsyncpa [#allocation4], 1 }

// kernel: sql_bart_forward.3
= control target key start
LH: loop header
LB: loop body
LE: loop exit
PB: predicated region body
PF: predicated region fallthrough
CT: control target
= control target key end

     0   :  { %s2921_s21 = smov 0   ;;  %s2923_s22 = smov 0   ;;  %s3302_s0 = inlined_call_operand.vmem [shape: f32[2,8,32], index: 0, kind: input, shape index: {}]   ;;  %s3303_s1 = inlined_call_operand.vmem [shape: f32[2,1,8], index: 1, kind: input, shape index: {}]   ;;  %s3304_s2 = inlined_call_operand.vmem [shape: f32[1,32], index: 2, kind: input, shape index: {}]   ;;  %s3305_s3 = inlined_call_operand.vmem [shape: f32[1,32], index: 3, kind: input, shape index: {}]   ;;  %s3306_s4 = inlined_call_operand.vmem [shape: bf16[2,3,32,32], index: 4, kind: input, shape index: {}]   ;;  %s3307_s5 = inlined_call_operand.vmem [shape: f32[2,3,1,32], index: 5, kind: input, shape index: {}]   ;;  %s3308_s6 = inlined_call_operand.vmem [shape: bf16[2,32,32], index: 6, kind: input, shape index: {}]   ;;  %s3309_s7 = inlined_call_operand.vmem [shape: f32[2,1,32], index: 7, kind: input, shape index: {}]   ;;  %s3310_s8 = inlined_call_operand.vmem [shape: f32[2,1,32], index: 8, kind: input, shape index: {}]   ;;  %s3311_s9 = inlined_call_operand.vmem [shape: f32[2,1,32], index: 9, kind: input, shape index: {}]   ;;  %s3312_s10 = inlined_call_operand.vmem [shape: bf16[2,32,64], index: 10, kind: input, shape index: {}]   ;;  %s3313_s11 = inlined_call_operand.vmem [shape: f32[2,1,64], index: 11, kind: input, shape index: {}]   ;;  %s3314_s12 = inlined_call_operand.vmem [shape: bf16[2,64,32], index: 12, kind: input, shape index: {}]   ;;  %s3315_s13 = inlined_call_operand.vmem [shape: f32[2,1,32], index: 13, kind: input, shape index: {}]   ;;  %s3316_s14 = inlined_call_operand.vmem [shape: f32[2,1,32], index: 14, kind: input, shape index: {}]   ;;  %s3317_s15 = inlined_call_operand.vmem [shape: f32[2,1,32], index: 15, kind: input, shape index: {}]   ;;  %s3318_s16 = inlined_call_operand.vmem [shape: f32[2,8,32], index: 16, kind: output, shape index: {}]  }
   0x1   :  { %3324 = sst [smem:[#allocation9_spill]] %s3302_s0  ;;  %s2925_s23 = smov 0  }
   0x2   :  { %3325 = sst [smem:[#allocation10_spill]] %s3303_s1  ;;  %s2927_s24 = smov 0  }
   0x3   :  { %3326 = sst [smem:[#allocation11_spill]] %s3304_s2  ;;  %s2929_s25 = smov 0  }
   0x4   :  { %3327 = sst [smem:[#allocation12_spill]] %s3305_s3 }
   0x5   :  { %3328 = sst [smem:[#allocation13_spill]] %s3306_s4 }
   0x6   :  { %3329 = sst [smem:[#allocation14_spill]] %s3307_s5 }
   0x7   :  { %3330 = sst [smem:[#allocation15_spill]] %s3308_s6 }
   0x8   :  { %3331 = sst [smem:[#allocation16_spill]] %s3312_s10 }
   0x9   :  { %3332 = sst [smem:[#allocation17_spill]] %s3313_s11 }
   0xa   :  { %3333 = sst [smem:[#allocation18_spill]] %s3317_s15 }
   0xb   :  { %3334 = sst [smem:[#allocation19_spill]] %s3318_s16 }
   0xc LB: > { %3335 = sst [smem:[#allocation2_spill]] %s2807_s21  ;;  %s35_s26 = sadd.s32 1, %s2815_s23  ;;  %s2823_s25 = sphi %s2929_s25, %s26_s25   ;;  %s2819_s24 = sphi %s2927_s24, %s3367_s24   ;;  %s2815_s23 = sphi %s2925_s23, %s3366_s23   ;;  %s2811_s22 = sphi %s2923_s22, %s3365_s22   ;;  %s2807_s21 = sphi %s2921_s21, %s3364_s21  }
   0xd   : > { %3336 = sst [smem:[#allocation3_spill]] %s2815_s23  ;;  %s38_s27 = sadd.s32 1, %s2819_s24 }
   0xe   : > { %3337 = sst [smem:[#allocation4_spill]] %s2819_s24  ;;  %p36_p0 = scmp.ge.s32.totalorder %s35_s26, 2 }
   0xf   : > { %3338 = sst [smem:[#allocation5_spill]] %s2823_s25  ;;  %p2494_p1 = scmp.ge.s32.totalorder %s2823_s25, 1 }
  0x10   : > { %p586_p2 = scmp.lt.s32.totalorder %s2823_s25, 5  ;;  %s3369_s26 = smov (%p36_p0, %s35_s26), 0 }
  0x11   : > { %3339 = sst [smem:[#allocation6_spill]] %s3369_s26  ;;  %s3371_s27 = smov (!%p36_p0, %s38_s27), %s2819_s24 }
  0x12   : > { %p587_p3 = pnand %p2494_p1, %p586_p2  ;;  %p40_p4 = scmp.ge.s32.totalorder %s3371_s27, 2 }
  0x14   : > { %s3373_s27 = smov (%p40_p4, %s3371_s27), 0  ;;  %590 = sbr.rel (%p587_p3) target bundleno = 2963 (0xb93), region = 84 }
  0x15   : > { %3340 = sst [smem:[#allocation7_spill]] %s3373_s27 }
  0x1b   : > { %p682_p5 = scmp.lt.s32.totalorder %s2811_s22, 1  ;;  %p689_p6 = scmp.lt.s32.totalorder %s2807_s21, 1 }
  0x1c   : > { %s3343_s20 = sld [smem:[#allocation9_spill]]  ;;  %s3344_s4 = sld [smem:[#allocation13_spill]] }
  0x1d   : > { %s3375_s22 = smov (!%p682_p5, %s2811_s22), 1  ;;  %s3345_s6 = sld [smem:[#allocation15_spill]] }
  0x1e   : > { %3341 = sst [smem:[#allocation8_spill]] %s3375_s22  ;;  %s2495_s29 = sshll.u32 %s3375_s22, 3 }
  0x1f   : > { %s2957_s28 = scalar_select %p689_p6, %s2807_s21, 1 }
  0x20   : > { %s3346_s5 = sld [smem:[#allocation14_spill]]  ;;  %s3347_s10 = sld [smem:[#allocation16_spill]] }
  0x21   : > { %s2694_s26 = smul.u32 48, %s2957_s28  ;;  %s2555_s23 = sshll.u32 %s2957_s28, 4 }
  0x22   : > { %s685_s27 = scalar_lea.vmem %s3343_s20, %s2495_s29  ;;  %s2695_s24 = smul.u32 3, %s2957_s28 }
  0x23   : > { %s2973_s2 = scalar_lea.vmem %s3344_s4, %s2694_s26  ;;  %s2978_s15 = scalar_lea.vmem %s3345_s6, %s2555_s23 }
  0x24   : > { %s727_s17 = scalar_lea.vmem %s3315_s13, %s2957_s28  ;;  %s730_s16 = scalar_lea.vmem %s3316_s14, %s2957_s28 }
  0x25   : > { %s3349_s4 = sld [smem:[#allocation18_spill]]  ;;  %s3350_s0 = sld [smem:[#allocation19_spill]] }
  0x26   : > { %s2983_s18 = scalar_lea.vmem %s3346_s5, %s2695_s24  ;;  %s3000_s6 = scalar_lea.vmem %s3347_s10, %s2555_s23 }
  0x27   : > { %s2557_s5 = sshll.u32 %s2957_s28, 5  ;;  %s3351_s19 = sld [smem:[#allocation2_spill]] }
  0x28   : > { %s3014_s3 = scalar_lea.vmem %s3314_s12, %s2557_s5 }
  0x2b   : > { %s733_s10 = scalar_lea.vmem %s3349_s4, %s2957_s28  ;;  %s3027_s11 = scalar_lea.vmem %s3350_s0, %s2495_s29 }
  0x2d   : > { %p2504_p7 = scmp.ne.s32.totalorder %s3351_s19, 0 }
  0x2e   : > { %v743_v0 = vld [vmem:[%s685_s27] sm:$0xff] (!%p2504_p7)  ;;  %vm746_vm0 = vcmask (!%p2504_p7), 261120   ;;  %s3352_s27 = sld [smem:[#allocation11_spill]] (!%p2504_p7)  ;;  %s3353_s20 = sld [smem:[#allocation12_spill]] (!%p2504_p7) }
  0x2f   : > { %742 = sbr.rel (%p2504_p7) target bundleno = 361 (0x169), region = 88  ;;  %v747_v1 = vsel (!%p2504_p7), %vm746_vm0, %v743_v0, 0.0 }
  0x30   : > { %748 = vadd.xlane.f32.xlu0 (!%p2504_p7), %v747_v1 }
  0x34   : > { %v2505_v11 = vld [vmem:[%s3352_s27] ss:$0 sm:$0xff] (!%p2504_p7) }
  0x35   : > { %v2506_v13 = vld [vmem:[%s3353_s20] ss:$0 sm:$0xff] (!%p2504_p7) }
  0xbd   : > { %v749_v2 = vpop.xlane.xlu0 %748 }
  0xbe   : > { %v751_v3 = vmul.f32 0.03125, %v749_v2 }
  0xc0   : > { %v752_v4 = vsub.f32 %v743_v0, %v751_v3 }
  0xc2   : > { %v753_v5 = vmul.f32 %v752_v4, %v752_v4 }
  0xc4   : > { %v754_v6 = vsel %vm746_vm0, %v753_v5, 0.0 }
  0xc5   : > { %755 = vadd.xlane.f32.xlu0 %v754_v6 }
 0x152   : > { %v756_v7 = vpop.xlane.xlu0 %755 }
 0x153   : > { %v757_v8 = vmul.f32 0.03125, %v756_v7 }
 0x155   : > { %v758_v9 = vadd.f32 1e-05, %v757_v8 }
 0x157   : > { %2747 = vrsqrt.f32 %v758_v9 }
 0x161   : > { %v2748_v10 = vpop.eup %2747 }
 0x162   : > { %v760_v12 = vmul.f32 %v2748_v10, %v752_v4 }
 0x164   : > { %v767_v14 = vmul.f32 %v2505_v11, %v760_v12 }
 0x166   : > { %v774_v15 = vadd.f32 %v2506_v13, %v767_v14 }
 0x168   : > { %775 = vst.msk [vmem:[%s3027_s11] sm:$0xff] %vm746_vm0, %v774_v15 }
 0x169 PF: > { %v2749_v16 = vld [vmem:[%s2973_s2 + $0x10] sm:$0xff]   ;;  %v2825_v17 = vmov 0.0   ;;  %v2750_v18 = vld [vmem:[%s2973_s2] sm:$0xff]   ;;  %v2751_v19 = vld [vmem:[%s2973_s2 + $0x18] sm:$0xff]   ;;  %vm2826_vm1 = vmmov 0   ;;  %vm814_vm2 = vcmask 261120   ;;  %v989_v39 = vlaneseq  ;;  %s3357_s5 = scalar_lea.vmem %s3309_s7, %s2957_s28  ;;  %s3358_s0 = scalar_lea.vmem %s3310_s8, %s2957_s28 }
 0x16a   : > { %2602 = vmatprep.subr.bf16.mxu1 %v2825_v17  ;;  %2594 = vmatprep.subr.bf16.mxu0 %v2825_v17  ;;  %v2752_v21 = vld [vmem:[%s2973_s2 + $0x8] sm:$0xff]   ;;  %v2511_v23 = vld [vmem:[%s2983_s18 + $0x1] ss:$0 sm:$0xff]  ;;  %v2507_v25 = vld [vmem:[%s2983_s18] ss:$0 sm:$0xff]  ;;  %s2827_s1 = smov 104  }
 0x16b   : > { %2603 = vmatpush3.bf16.msra.mxu1 %v2749_v16  ;;  %2606 = vmatprep.mubr.msk.bf16.mxu1 %vm2826_vm1, %v2825_v17  ;;  %v2753_v29 = vld [vmem:[%s2973_s2 + $0x20] sm:$0xff]   ;;  %s2828_s22 = smov 120   ;;  %v2754_v36 = vld [vmem:[%s2973_s2 + $0x28] sm:$0xff]   ;;  %s2829_s25 = smov 112   ;;  %v2830_v37 = vmov 1983009808  }
 0x16c   : > { %2604 = vmatprep.subr.bf16.mxu1 %v2825_v17  ;;  %2595 = vmatpush3.bf16.msra.mxu0 %v2750_v18  ;;  %v987_v38 = vunpack.c.l.s4 %v2830_v37  ;;  %v2831_v40 = vmov 1934713408   ;;  %v3080_v43 = vshrl.u32 %v989_v39, 7  ;;  %vm1424_vm3 = vcmask 64512   ;;  %s3354_s2 = sld [smem:[#allocation8_spill]]  ;;  %s3355_s21 = sld [smem:[#allocation10_spill]] }
 0x16d   : > { %2596 = vmatprep.subr.bf16.mxu0 %v2825_v17  ;;  %2598 = vmatprep.mubr.msk.bf16.mxu0 %vm2826_vm1, %v2825_v17  ;;  %v1019_v41 = vunpack.c.l.s4 %v2831_v40  ;;  %vm1674_vm5 = vcmask 1043456   ;;  %s2835_s24 = smov 24   ;;  %vm2005_vm6 = vcmask 130048   ;;  %vm2007_vm7 = vcmask 195584  }
 0x16e   : > { %v988_v42 = vunpack.c.0.s8 %v987_v38  ;;  %vm2219_vm8 = vcmask 523264  }
 0x16f   : > { %v3049_v20 = vld [vmem:[%s3027_s11] sm:$0xff]  ;;  %2605 = vmatpush3.bf16.msra.mxu1 %v2751_v19  ;;  %v1020_v46 = vunpack.c.0.s8 %v1019_v41 }
 0x170   : > { %v795_v22 = vpack.c.bf16 %v3049_v20, %v3049_v20  ;;  %2597 = vmatpush3.bf16.msra.mxu0 %v2752_v21  ;;  %2618 = vmatprep.subr.bf16.mxu1 %v2825_v17  ;;  %v3083_v47 = vsub.s32 %v988_v42, %v3080_v43 }
 0x171   : > { %2610 = vmatprep.subr.bf16.mxu0 %v2825_v17  ;;  %v3086_v54 = vsub.s32 %v1020_v46, %v3080_v43 }
 0x172   : > { %2607 = vmatmul.mubr.msk.bf16.vlgmr.msra.gmra.mrb[0].mxu1 %vm814_vm2, %v795_v22  ;;  %s3356_s30 = scalar_lea.vmem %s3355_s21, %s3354_s2  ;;  %s3360_s2 = sld [smem:[#allocation17_spill]] }
 0x173   : > { %2599 = vmatmul.mubr.msk.bf16.vlgmr.msra.gmra.mrb[0].mxu0 %vm814_vm2, %v795_v22  ;;  %2620 = vmatprep.mubr.msk.bf16.mxu1 %vm2826_vm1, %v2825_v17 }
 0x174   : > { %2614 = vmatprep.mubr.msk.bf16.mxu0 %vm2826_vm1, %v2825_v17  ;;  %2611 = vmatpush3.bf16.msra.mxu0 %v2753_v29 }
 0x175   : > { %2612 = vmatprep.subr.bf16.mxu0 %v2825_v17 }
 0x178   : > { %2613 = vmatpush3.bf16.msra.mxu0 %v2754_v36  ;;  %s3361_s26 = scalar_lea.vmem %s3360_s2, %s2957_s28 }
 0x179   : > { %2624 = vmatprep.subr.bf16.mxu0 %v2825_v17 }
 0x17b   : > { %2615 = vmatmul.mubr.msk.bf16.vlgmr.msra.gmra.mrb[4].mxu0 %vm814_vm2, %v795_v22 }
 0x17c   : > { %2626 = vmatprep.mubr.msk.bf16.mxu0 %vm2826_vm1, %v2825_v17 }
 0x245   : > { %v910_v24 = vpop.f32.mrb[0].mxu1 }
 0x246   : > { %v911_v26 = vadd.f32 %v2511_v23, %v910_v24  ;;  %v2608_v27 = vpop.f32.mrb[1].mxu1  ;;  %v852_v28 = vpop.f32.mrb[0].mxu0 }
 0x247   : > { %v913_v30 = vpop.f32.mrb[2].mxu1  ;;  %v2600_v31 = vpop.f32.mrb[1].mxu0  ;;  %v853_v33 = vadd.f32 %v2507_v25, %v852_v28 }
 0x248   : > { %1131 = vrot.lane.b32.xlu1 %v911_v26, %s2827_s1  ;;  %1125 = vrot.lane.b32.xlu0 %v911_v26, %s2828_s22  ;;  %v2609_v32 = vpop.f32.mrb[3].mxu1  ;;  %v855_v34 = vpop.f32.mrb[2].mxu0 }
 0x249   : > { %v2601_v35 = vpop.f32.mrb[3].mxu0 }
 0x24c   : > { %1128 = vrot.lane.b32.xlu0 %v911_v26, %s2829_s25  ;;  %975 = vrot.lane.b32.xlu1 %v853_v33, %s2828_s22 }
 0x250   : > { %978 = vrot.lane.b32.xlu0 %v853_v33, %s2829_s25  ;;  %981 = vrot.lane.b32.xlu1 %v853_v33, %s2827_s1 }
 0x2ba   : > { %v1132_v44 = vpop.permute.xlu1 %1131  ;;  %v1126_v45 = vpop.permute.xlu0 %1125 }
 0x2bb   : > { %v1150_v48 = vcombine.low %v1126_v45, %v1132_v44  ;;  %v1151_v49 = vcombine.high %v1126_v45, %v1132_v44 }
 0x2bd   : > { %v1158_v55 = vrot.slane %v1150_v48, %v3083_v47  ;;  %v1165_v56 = vrot.slane %v1151_v49, %v3083_v47 }
 0x2be   : > { %v1129_v50 = vpop.permute.xlu0 %1128  ;;  %v976_v51 = vpop.permute.xlu1 %975 }
 0x2bf   : > { %v1134_v52 = vcombine.low %v911_v26, %v1129_v50  ;;  %v1135_v53 = vcombine.high %v911_v26, %v1129_v50 }
 0x2c1   : > { %v1142_v57 = vrot.slane %v1134_v52, %v3083_v47  ;;  %v1149_v58 = vrot.slane %v1135_v53, %v3083_v47 }
 0x2c2   : > { %v979_v59 = vpop.permute.xlu0 %978  ;;  %v982_v60 = vpop.permute.xlu1 %981 }
 0x2c3   : > { %v1166_v61 = vcombine.low %v1142_v57, %v1158_v55  ;;  %v1167_v62 = vcombine.high %v1142_v57, %v1158_v55  ;;  %v1182_v63 = vcombine.low %v1149_v58, %v1165_v56  ;;  %v1183_v0 = vcombine.high %v1149_v58, %v1165_v56 }
 0x2c4   : > { %v984_v1 = vcombine.low %v853_v33, %v979_v59  ;;  %v985_v2 = vcombine.high %v853_v33, %v979_v59  ;;  %v1000_v3 = vcombine.low %v976_v51, %v982_v60  ;;  %v1001_v4 = vcombine.high %v976_v51, %v982_v60 }
 0x2c5   : > { %v1174_v5 = vrot.slane %v1166_v61, %v3086_v54  ;;  %v1181_v6 = vrot.slane %v1167_v62, %v3086_v54  ;;  %v1190_v7 = vrot.slane %v1182_v63, %v3086_v54  ;;  %v1197_v8 = vrot.slane %v1183_v0, %v3086_v54 }
 0x2c6   : > { %v992_v9 = vrot.slane %v984_v1, %v3083_v47  ;;  %v999_v10 = vrot.slane %v985_v2, %v3083_v47  ;;  %v1008_v11 = vrot.slane %v1000_v3, %v3083_v47  ;;  %v1015_v12 = vrot.slane %v1001_v4, %v3083_v47 }
 0x2c7   : > { %v1202_v13 = vcombine.low %v1174_v5, %v1181_v6  ;;  %v2521_v14 = vcombine.high %v1174_v5, %v1181_v6  ;;  %v1218_v15 = vcombine.low %v1190_v7, %v1197_v8  ;;  %v2522_v16 = vcombine.high %v1190_v7, %v1197_v8 }
 0x2c8   : > { %v1016_v18 = vcombine.low %v992_v9, %v1008_v11  ;;  %v1017_v19 = vcombine.high %v992_v9, %v1008_v11  ;;  %v1032_v21 = vcombine.low %v999_v10, %v1015_v12  ;;  %v1033_v22 = vcombine.high %v999_v10, %v1015_v12 }
 0x2c9   : > { %v1209_v23 = vrot.slane %v1202_v13, %v3083_v47  ;;  %v1217_v24 = vrot.slane %v2521_v14, %v3083_v47  ;;  %v1225_v25 = vrot.slane %v1218_v15, %v3083_v47  ;;  %v1233_v26 = vrot.slane %v2522_v16, %v3083_v47  ;;  %v968_v14 = vpop.f32.mrb[4].mxu0 }
 0x2ca   : > { %v1024_v27 = vrot.slane %v1016_v18, %v3086_v54  ;;  %v1031_v28 = vrot.slane %v1017_v19, %v3086_v54  ;;  %v1040_v29 = vrot.slane %v1032_v21, %v3086_v54  ;;  %v1047_v30 = vrot.slane %v1033_v22, %v3086_v54  ;;  %v2616_v15 = vpop.f32.mrb[5].mxu0  ;;  %v777_v19 = vld [vmem:[%s3356_s30] sm:$0x1] }
 0x2cb   : > { %v1234_v31 = vcombine.low %v1209_v23, %v1217_v24  ;;  %v1250_v32 = vcombine.low %v1225_v25, %v1233_v26  ;;  %v1235_v33 = vcombine.high %v1209_v23, %v1217_v24  ;;  %v1251_v34 = vcombine.high %v1225_v25, %v1233_v26  ;;  %v971_v16 = vpop.f32.mrb[6].mxu0 }
 0x2cc   : > { %v1052_v35 = vcombine.low %v1024_v27, %v1031_v28  ;;  %v2519_v36 = vcombine.high %v1024_v27, %v1031_v28  ;;  %v1068_v37 = vcombine.low %v1040_v29, %v1047_v30  ;;  %v2520_v38 = vcombine.high %v1040_v29, %v1047_v30  ;;  %v2617_v18 = vpop.f32.mrb[7].mxu0 }
 0x2cd   : > { %v1242_v39 = vrot.slane %v1234_v31, %v3086_v54  ;;  %v1258_v40 = vrot.slane %v1250_v32, %v3086_v54  ;;  %v1249_v49 = vrot.slane %v1235_v33, %v3086_v54  ;;  %v1265_v50 = vrot.slane %v1251_v34, %v3086_v54 }
 0x2ce   : > { %v1059_v41 = vrot.slane %v1052_v35, %v3083_v47  ;;  %v1067_v42 = vrot.slane %v2519_v36, %v3083_v47  ;;  %v1075_v44 = vrot.slane %v1068_v37, %v3083_v47  ;;  %v1083_v45 = vrot.slane %v2520_v38, %v3083_v47 }
 0x2cf   : > { %v1266_v46 = vcombine.low %v1242_v39, %v1258_v40  ;;  %v1267_v48 = vcombine.high %v1242_v39, %v1258_v40  ;;  %v1268_v60 = vcombine.low %v1249_v49, %v1265_v50  ;;  %v1269_v61 = vcombine.high %v1249_v49, %v1265_v50 }
 0x2d0   : > { %v1084_v51 = vcombine.low %v1059_v41, %v1067_v42  ;;  %v1100_v52 = vcombine.low %v1075_v44, %v1083_v45  ;;  %v1085_v62 = vcombine.high %v1059_v41, %v1067_v42  ;;  %v1101_v63 = vcombine.high %v1075_v44, %v1083_v45 }
 0x2d1   : > { %v1270_v53 = vpack.c.bf16 %v1266_v46, %v1266_v46  ;;  %v1271_v55 = vpack.c.bf16 %v1267_v48, %v1267_v48  ;;  %v1272_v2 = vpack.c.bf16 %v1268_v60, %v1268_v60  ;;  %v1273_v3 = vpack.c.bf16 %v1269_v61, %v1269_v61 }
 0x2d2   : > { %v1092_v56 = vrot.slane %v1084_v51, %v3086_v54  ;;  %v1108_v57 = vrot.slane %v1100_v52, %v3086_v54  ;;  %v1099_v6 = vrot.slane %v1085_v62, %v3086_v54  ;;  %v1115_v7 = vrot.slane %v1101_v63, %v3086_v54 }
 0x2d3   : > { %v1429_v58 = vsel %vm1424_vm3, %v1270_v53, 0  ;;  %v1475_v59 = vsel %vm1424_vm3, %v1271_v55, 0  ;;  %v1521_v8 = vsel %vm1424_vm3, %v1272_v2, 0  ;;  %v1567_v9 = vsel %vm1424_vm3, %v1273_v3, 0  ;;  %v2515_v55 = vld [vmem:[%s2983_s18 + $0x2] ss:$0 sm:$0xff] }
 0x2d4   : > { %2619 = vmatpush3.bf16.xpose.msra.mxu1 %v1429_v58  ;;  %2625 = vmatpush3.bf16.xpose.msra.mxu0 %v1475_v59  ;;  %v1116_v0 = vcombine.low %v1092_v56, %v1108_v57  ;;  %v1117_v1 = vcombine.high %v1092_v56, %v1108_v57  ;;  %v1118_v10 = vcombine.low %v1099_v6, %v1115_v7  ;;  %vm778_vm4 = vcmp.gt.f32.partialorder %v777_v19, 0.5  ;;  %s2834_s18 = smov 8  }
 0x2d5   : > { %2630 = vmatprep.subr.bf16.mxu1 %v2825_v17  ;;  %2636 = vmatprep.subr.bf16.mxu0 %v2825_v17  ;;  %v1119_v11 = vcombine.high %v1099_v6, %v1115_v7  ;;  %v1616_v21 = vsub.s32 0, %v3080_v43  ;;  %v2832_v22 = vmov -3.4028235e+38   ;;  %v969_v56 = vadd.f32 %v2515_v55, %v968_v14 }
 0x2d6   : > { %v1120_v4 = vpack.c.bf16 %v1116_v0, %v1116_v0  ;;  %v1121_v5 = vpack.c.bf16 %v1117_v1, %v1117_v1  ;;  %v1122_v12 = vpack.c.bf16 %v1118_v10, %v1118_v10  ;;  %v779_v23 = vsel %vm778_vm4, 0.0, %v2832_v22 }
 0x2d7   : > { %v1123_v13 = vpack.c.bf16 %v1119_v11, %v1119_v11  ;;  %v1617_v24 = vrot.slane %v779_v23, %v1616_v21 }
 0x2db   : > { %2621 = vmatmul.mubr.msk.bf16.vlgmr.msra.gmra.mrb[4].mxu1 %vm1424_vm3, %v1120_v4  ;;  %2627 = vmatmul.mubr.msk.bf16.vlgmr.msra.gmra.mrb[8].mxu0 %vm1424_vm3, %v1121_v5 }
 0x2dc   : > { %2631 = vmatpush3.bf16.xpose.msra.mxu1 %v1521_v8  ;;  %2637 = vmatpush3.bf16.xpose.msra.mxu0 %v1567_v9 }
 0x2dd   : > { %2632 = vmatprep.mubr.msk.bf16.mxu1 %vm2826_vm1, %v2825_v17  ;;  %2638 = vmatprep.mubr.msk.bf16.mxu0 %vm2826_vm1, %v2825_v17 }
 0x2de   : > { %2642 = vmatprep.subr.bf16.mxu1 %v2825_v17  ;;  %2648 = vmatprep.subr.bf16.mxu0 %v2825_v17 }
 0x2e3   : > { %2633 = vmatmul.mubr.msk.bf16.vlgmr.msra.gmra.mrb[8].mxu1 %vm1424_vm3, %v1122_v12  ;;  %2639 = vmatmul.mubr.msk.bf16.vlgmr.msra.gmra.mrb[12].mxu0 %vm1424_vm3, %v1123_v13 }
 0x2e4   : > { %2644 = vmatprep.mubr.msk.bf16.mxu1 %vm2826_vm1, %v2825_v17  ;;  %2650 = vmatprep.mubr.msk.bf16.mxu0 %vm2826_vm1, %v2825_v17 }
 0x3ae   : > { %v1465_v25 = vpop.f32.mrb[4].mxu1  ;;  %v1511_v26 = vpop.f32.mrb[8].mxu0 }
 0x3af   : > { %v1609_v27 = vmul.f32 0.35355338, %v1465_v25  ;;  %v1610_v28 = vmul.f32 0.35355338, %v1511_v26  ;;  %v2622_v29 = vpop.f32.mrb[5].mxu1  ;;  %v2628_v30 = vpop.f32.mrb[9].mxu0 }
 0x3b0   : > { %v1468_v31 = vpop.f32.mrb[6].mxu1  ;;  %v1514_v32 = vpop.f32.mrb[10].mxu0 }
 0x3b1   : > { %v2623_v33 = vpop.f32.mrb[7].mxu1  ;;  %v2629_v34 = vpop.f32.mrb[11].mxu0  ;;  %v1619_v35 = vadd.f32 %v1617_v24, %v1609_v27  ;;  %v1620_v36 = vadd.f32 %v1617_v24, %v1610_v28 }
 0x3b3   : > { %v1623_v37 = vsel %vm1424_vm3, %v1619_v35, -inf  ;;  %v1626_v38 = vsel %vm1424_vm3, %v1620_v36, -inf }
 0x3b4   : > { %1624 = vmax.xlane.f32.xlu0 %v1623_v37  ;;  %1627 = vmax.xlane.f32.xlu1 %v1626_v38 }
 0x3b6   : > { %v1557_v43 = vpop.f32.mrb[8].mxu1  ;;  %v1603_v39 = vpop.f32.mrb[12].mxu0 }
 0x3b7   : > { %v1611_v40 = vmul.f32 0.35355338, %v1557_v43  ;;  %v1612_v41 = vmul.f32 0.35355338, %v1603_v39  ;;  %v2634_v42 = vpop.f32.mrb[9].mxu1  ;;  %v2640_v44 = vpop.f32.mrb[13].mxu0 }
 0x3b8   : > { %v1560_v45 = vpop.f32.mrb[10].mxu1  ;;  %v1606_v46 = vpop.f32.mrb[14].mxu0 }
 0x3b9   : > { %v2635_v48 = vpop.f32.mrb[11].mxu1  ;;  %v2641_v49 = vpop.f32.mrb[15].mxu0  ;;  %v1621_v50 = vadd.f32 %v1617_v24, %v1611_v40  ;;  %v1622_v52 = vadd.f32 %v1617_v24, %v1612_v41 }
 0x3bb   : > { %v1629_v51 = vsel %vm1424_vm3, %v1621_v50, -inf  ;;  %v1632_v53 = vsel %vm1424_vm3, %v1622_v52, -inf }
 0x3bc   : > { %1630 = vmax.xlane.f32.xlu0 %v1629_v51 }
 0x3c0   : > { %1633 = vmax.xlane.f32.xlu0 %v1632_v53 }
 0x3c5   : > { %1275 = vrot.lane.b32.xlu1 %v969_v56, %s2828_s22 }
 0x441   : > { %v1625_v57 = vpop.xlane.xlu0 %1624  ;;  %v1628_v58 = vpop.xlane.xlu1 %1627 }
 0x442   : > { %v1635_v59 = vsub.f32 %v1619_v35, %v1625_v57  ;;  %v1636_v60 = vsub.f32 %v1620_v36, %v1628_v58 }
 0x444   : > { %v1639_v61 = vmul.f32 1.442695, %v1635_v59  ;;  %v1641_v62 = vmul.f32 1.442695, %v1636_v60 }
 0x445   : > { %v1276_v13 = vpop.permute.xlu1 %1275 }
 0x446   : > { %2763 = vpow2.f32 %v1639_v61 }
 0x447   : > { %2765 = vpow2.f32 %v1641_v62 }
 0x449   : > { %v1631_v3 = vpop.xlane.xlu0 %1630 }
 0x44a   : > { %v1637_v5 = vsub.f32 %v1621_v50, %v1631_v3 }
 0x44c   : > { %v1643_v7 = vmul.f32 1.442695, %v1637_v5 }
 0x44d   : > { %v1634_v4 = vpop.xlane.xlu0 %1633 }
 0x44e   : > { %v1638_v6 = vsub.f32 %v1622_v52, %v1634_v4  ;;  %2767 = vpow2.f32 %v1643_v7 }
 0x450   : > { %v3152_v63 = vpop.eup %2763  ;;  %v1645_v8 = vmul.f32 1.442695, %v1638_v6 }
 0x451   : > { %v3154_v0 = vpop.eup %2765  ;;  %v1647_v1 = vsel %vm1424_vm3, %v3152_v63, 0.0 }
 0x452   : > { %1648 = vadd.xlane.f32.xlu1 %v1647_v1  ;;  %v1650_v2 = vsel %vm1424_vm3, %v3154_v0, 0.0  ;;  %2769 = vpow2.f32 %v1645_v8 }
 0x453   : > { %1651 = vadd.xlane.f32.xlu0 %v1650_v2 }
 0x458   : > { %v3162_v9 = vpop.eup %2767 }
 0x459   : > { %v1653_v11 = vsel %vm1424_vm3, %v3162_v9, 0.0 }
 0x45c   : > { %v3164_v10 = vpop.eup %2769 }
 0x45d   : > { %v1656_v12 = vsel %vm1424_vm3, %v3164_v10, 0.0 }
 0x463   : > { %1281 = vrot.lane.b32.xlu1 %v969_v56, %s2827_s1 }
 0x469   : > { %1278 = vrot.lane.b32.xlu0 %v969_v56, %s2829_s25 }
 0x487   : > { %1654 = vadd.xlane.f32.xlu1 %v1653_v11 }
 0x488   : > { %1657 = vadd.xlane.f32.xlu0 %v1656_v12 }
 0x4df   : > { %v1649_v14 = vpop.xlane.xlu1 %1648 }
 0x4e0   : > { %v1652_v15 = vpop.xlane.xlu0 %1651  ;;  %2771 = vrcp.f32 %v1649_v14 }
 0x4e1   : > { %2773 = vrcp.f32 %v1652_v15 }
 0x4e3   : > { %v1282_v16 = vpop.permute.xlu1 %1281 }
 0x4e4   : > { %v1300_v18 = vcombine.low %v1276_v13, %v1282_v16  ;;  %v1301_v19 = vcombine.high %v1276_v13, %v1282_v16  ;;  %v1279_v21 = vpop.permute.xlu0 %1278 }
 0x4e5   : > { %v1284_v22 = vcombine.low %v969_v56, %v1279_v21  ;;  %v1285_v23 = vcombine.high %v969_v56, %v1279_v21 }
 0x4e6   : > { %v1308_v24 = vrot.slane %v1300_v18, %v3083_v47  ;;  %v1315_v25 = vrot.slane %v1301_v19, %v3083_v47 }
 0x4e7   : > { %v1292_v26 = vrot.slane %v1284_v22, %v3083_v47  ;;  %v1299_v27 = vrot.slane %v1285_v23, %v3083_v47 }
 0x4e9   : > { %v1316_v28 = vcombine.low %v1292_v26, %v1308_v24  ;;  %v1317_v29 = vcombine.high %v1292_v26, %v1308_v24  ;;  %v1332_v30 = vcombine.low %v1299_v27, %v1315_v25  ;;  %v1333_v31 = vcombine.high %v1299_v27, %v1315_v25 }
 0x4ea   : > { %v2772_v51 = vpop.eup %2771 }
 0x4eb   : > { %v1324_v32 = vrot.slane %v1316_v28, %v3086_v54  ;;  %v1331_v33 = vrot.slane %v1317_v29, %v3086_v54  ;;  %v1340_v34 = vrot.slane %v1332_v30, %v3086_v54  ;;  %v1347_v35 = vrot.slane %v1333_v31, %v3086_v54  ;;  %v2774_v55 = vpop.eup %2773 }
 0x4ec   : > { %v1663_v60 = vmul.f32 %v2772_v51, %v3152_v63  ;;  %v1664_v61 = vmul.f32 %v2774_v55, %v3154_v0 }
 0x4ed   : > { %v1352_v36 = vcombine.low %v1324_v32, %v1331_v33  ;;  %v2523_v37 = vcombine.high %v1324_v32, %v1331_v33  ;;  %v1368_v38 = vcombine.low %v1340_v34, %v1347_v35  ;;  %v2524_v43 = vcombine.high %v1340_v34, %v1347_v35 }
 0x4ee   : > { %v1667_v6 = vpack.c.bf16 %v1663_v60, %v1663_v60  ;;  %v1668_v7 = vpack.c.bf16 %v1664_v61, %v1664_v61 }
 0x4ef   : > { %v1359_v39 = vrot.slane %v1352_v36, %v3083_v47  ;;  %v1367_v40 = vrot.slane %v2523_v37, %v3083_v47  ;;  %v1375_v41 = vrot.slane %v1368_v38, %v3083_v47  ;;  %v1383_v42 = vrot.slane %v2524_v43, %v3083_v47 }
 0x4f1   : > { %v1384_v44 = vcombine.low %v1359_v39, %v1367_v40  ;;  %v1385_v45 = vcombine.high %v1359_v39, %v1367_v40  ;;  %v1400_v46 = vcombine.low %v1375_v41, %v1383_v42  ;;  %v1401_v48 = vcombine.high %v1375_v41, %v1383_v42 }
 0x4f3   : > { %v1392_v49 = vrot.slane %v1384_v44, %v3086_v54  ;;  %v1399_v50 = vrot.slane %v1385_v45, %v3086_v54  ;;  %v1408_v52 = vrot.slane %v1400_v46, %v3086_v54  ;;  %v1415_v53 = vrot.slane %v1401_v48, %v3086_v54  ;;  %v2755_v46 = vld [vmem:[%s2978_s15] sm:$0xff]  }
 0x4f5   : > { %v1416_v56 = vcombine.low %v1392_v49, %v1408_v52  ;;  %v1417_v57 = vcombine.high %v1392_v49, %v1408_v52  ;;  %v1418_v58 = vcombine.low %v1399_v50, %v1415_v53  ;;  %v1419_v59 = vcombine.high %v1399_v50, %v1415_v53 }
 0x4f7   : > { %v1420_v62 = vpack.c.bf16 %v1416_v56, %v1416_v56  ;;  %v1421_v1 = vpack.c.bf16 %v1417_v57, %v1417_v57  ;;  %v1422_v4 = vpack.c.bf16 %v1418_v58, %v1418_v58  ;;  %v1423_v5 = vpack.c.bf16 %v1419_v59, %v1419_v59  ;;  %v2756_v57 = vld [vmem:[%s2978_s15 + $0x8] sm:$0xff]   ;;  %s2833_s15 = smov 16  }
 0x4f9   : > { %v1676_v2 = vsel %vm1674_vm5, %v1420_v62, 0  ;;  %v1722_v3 = vsel %vm1674_vm5, %v1421_v1, 0  ;;  %v1768_v63 = vsel %vm1674_vm5, %v1422_v4, 0  ;;  %v1814_v0 = vsel %vm1674_vm5, %v1423_v5, 0 }
 0x4fa   : > { %2643 = vmatpush3.bf16.msra.mxu1 %v1676_v2  ;;  %2649 = vmatpush3.bf16.msra.mxu0 %v1722_v3 }
 0x4fb   : > { %2654 = vmatprep.subr.bf16.mxu1 %v2825_v17  ;;  %2660 = vmatprep.subr.bf16.mxu0 %v2825_v17 }
 0x4fd   : > { %2645 = vmatmul.mubr.msk.bf16.vlgmr.msra.gmra.mrb[12].mxu1 %vm1424_vm3, %v1667_v6  ;;  %2651 = vmatmul.mubr.msk.bf16.vlgmr.msra.gmra.mrb[16].mxu0 %vm1424_vm3, %v1668_v7 }
 0x4fe   : > { %2655 = vmatpush3.bf16.msra.mxu1 %v1768_v63  ;;  %2661 = vmatpush3.bf16.msra.mxu0 %v1814_v0 }
 0x4ff   : > { %2656 = vmatprep.mubr.msk.bf16.mxu1 %vm2826_vm1, %v2825_v17  ;;  %2662 = vmatprep.mubr.msk.bf16.mxu0 %vm2826_vm1, %v2825_v17 }
 0x500   : > { %2666 = vmatprep.subr.bf16.mxu1 %v2825_v17  ;;  %2674 = vmatprep.subr.bf16.mxu0 %v2825_v17 }
 0x514   : > { %v1655_v8 = vpop.xlane.xlu1 %1654 }
 0x515   : > { %2775 = vrcp.f32 %v1655_v8  ;;  %v1658_v11 = vpop.xlane.xlu0 %1657 }
 0x516   : > { %2777 = vrcp.f32 %v1658_v11 }
 0x51f   : > { %v2776_v12 = vpop.eup %2775 }
 0x520   : > { %v2778_v13 = vpop.eup %2777  ;;  %v1665_v14 = vmul.f32 %v2776_v12, %v3162_v9 }
 0x521   : > { %v1666_v15 = vmul.f32 %v2778_v13, %v3164_v10 }
 0x522   : > { %v1669_v16 = vpack.c.bf16 %v1665_v14, %v1665_v14 }
 0x523   : > { %v1670_v18 = vpack.c.bf16 %v1666_v15, %v1666_v15 }
 0x524   : > { %2657 = vmatmul.mubr.msk.bf16.vlgmr.msra.gmra.mrb[16].mxu1 %vm1424_vm3, %v1669_v16 }
 0x525   : > { %2663 = vmatmul.mubr.msk.bf16.vlgmr.msra.gmra.mrb[20].mxu0 %vm1424_vm3, %v1670_v18  ;;  %2670 = vmatprep.mubr.msk.bf16.mxu1 %vm2826_vm1, %v2825_v17  ;;  %v2535_v18 = vld [vmem:[%s3357_s5] ss:$0 sm:$0xff] }
 0x526   : > { %2678 = vmatprep.mubr.msk.bf16.mxu0 %vm2826_vm1, %v2825_v17  ;;  %2667 = vmatpush3.bf16.msra.mxu1 %v2755_v46 }
 0x527   : > { %2668 = vmatprep.subr.bf16.mxu1 %v2825_v17 }
 0x52a   : > { %2669 = vmatpush3.bf16.msra.mxu1 %v2756_v57 }
 0x52b   : > { %2682 = vmatprep.subr.bf16.mxu1 %v2825_v17 }
 0x5d0   : > { %v1712_v19 = vpop.f32.mrb[12].mxu1  ;;  %v1758_v21 = vpop.f32.mrb[16].mxu0 }
 0x5d1   : > { %v2646_v22 = vpop.f32.mrb[13].mxu1  ;;  %v2652_v23 = vpop.f32.mrb[17].mxu0 }
 0x5d2   : > { %v1715_v24 = vpop.f32.mrb[14].mxu1  ;;  %v1761_v9 = vpop.f32.mrb[18].mxu0 }
 0x5d3   : > { %v2647_v25 = vpop.f32.mrb[15].mxu1  ;;  %v2653_v10 = vpop.f32.mrb[19].mxu0 }
 0x5f7   : > { %v1804_v26 = vpop.f32.mrb[16].mxu1 }
 0x5f8   : > { %v1856_v27 = vcombine.low %v1712_v19, %v1804_v26  ;;  %v1857_v28 = vcombine.high %v1712_v19, %v1804_v26  ;;  %v1850_v29 = vpop.f32.mrb[20].mxu0  ;;  %v2658_v30 = vpop.f32.mrb[17].mxu1 }
 0x5f9   : > { %v1872_v31 = vcombine.low %v1758_v21, %v1850_v29  ;;  %v1873_v32 = vcombine.high %v1758_v21, %v1850_v29  ;;  %v2664_v33 = vpop.f32.mrb[21].mxu0  ;;  %v1807_v34 = vpop.f32.mrb[18].mxu1  ;;  %v2757_v30 = vld [vmem:[%s3000_s6] sm:$0xff]  }
 0x5fa   : > { %v1864_v35 = vrot.slane %v1856_v27, %v3083_v47  ;;  %v1871_v36 = vrot.slane %v1857_v28, %v3083_v47  ;;  %v1853_v37 = vpop.f32.mrb[22].mxu0  ;;  %v2659_v38 = vpop.f32.mrb[19].mxu1  ;;  %2675 = vmatpush3.bf16.msra.mxu0 %v2757_v30 }
 0x5fb   : > { %v1880_v43 = vrot.slane %v1872_v31, %v3083_v47  ;;  %v1887_v39 = vrot.slane %v1873_v32, %v3083_v47  ;;  %v2665_v40 = vpop.f32.mrb[23].mxu0  ;;  %v2758_v31 = vld [vmem:[%s3000_s6 + $0x8] sm:$0xff]   ;;  %2676 = vmatprep.subr.bf16.mxu0 %v2825_v17  ;;  %s3359_s6 = scalar_lea.vmem %s3311_s9, %s2957_s28 }
 0x5fc   : > { %v2540_v37 = vld [vmem:[%s3359_s6] ss:$0 sm:$0xff] }
 0x5fd   : > { %v1888_v41 = vcombine.low %v1864_v35, %v1880_v43  ;;  %v1889_v42 = vcombine.high %v1864_v35, %v1880_v43  ;;  %v1904_v44 = vcombine.low %v1871_v36, %v1887_v39  ;;  %v1905_v45 = vcombine.high %v1871_v36, %v1887_v39  ;;  %v2539_v35 = vld [vmem:[%s3358_s0] ss:$0 sm:$0xff] }
 0x5fe   : > { %2677 = vmatpush3.bf16.msra.mxu0 %v2758_v31  ;;  %v2759_v40 = vld [vmem:[%s3014_s3] sm:$0xff]  }
 0x5ff   : > { %v1896_v48 = vrot.slane %v1888_v41, %v3086_v54  ;;  %v1903_v49 = vrot.slane %v1889_v42, %v3086_v54  ;;  %v1912_v50 = vrot.slane %v1904_v44, %v3086_v54  ;;  %v1919_v51 = vrot.slane %v1905_v45, %v3086_v54  ;;  %v2760_v41 = vld [vmem:[%s3014_s3 + $0x8] sm:$0xff]   ;;  %v2761_v42 = vld [vmem:[%s3014_s3 + $0x10] sm:$0xff]   ;;  %v2762_v44 = vld [vmem:[%s3014_s3 + $0x18] sm:$0xff]  }
 0x600   : > { %v2541_v45 = vld [vmem:[%s3361_s26] ss:$0 sm:$0xff] }
 0x601   : > { %v1924_v52 = vcombine.low %v1896_v48, %v1903_v49  ;;  %v2533_v53 = vcombine.high %v1896_v48, %v1903_v49  ;;  %v1940_v55 = vcombine.low %v1912_v50, %v1919_v51  ;;  %v2534_v56 = vcombine.high %v1912_v50, %v1919_v51 }
 0x603   : > { %v1931_v58 = vrot.slane %v1924_v52, %v3083_v47  ;;  %v1939_v59 = vrot.slane %v2533_v53, %v3083_v47  ;;  %v1947_v60 = vrot.slane %v1940_v55, %v3083_v47  ;;  %v1955_v61 = vrot.slane %v2534_v56, %v3083_v47 }
 0x605   : > { %v1957_v62 = vcombine.high %v1931_v58, %v1939_v59  ;;  %v1973_v1 = vcombine.high %v1947_v60, %v1955_v61  ;;  %v1956_v2 = vcombine.low %v1931_v58, %v1939_v59  ;;  %v1972_v3 = vcombine.low %v1947_v60, %v1955_v61  ;;  %v2545_v58 = vld [vmem:[%s727_s17] ss:$0 sm:$0xff] }
 0x607   : > { %v1971_v4 = vrot.slane %v1957_v62, %v3086_v54  ;;  %v1987_v5 = vrot.slane %v1973_v1, %v3086_v54  ;;  %v1964_v6 = vrot.slane %v1956_v2, %v3086_v54  ;;  %v1980_v7 = vrot.slane %v1972_v3, %v3086_v54 }
 0x609   : > { %v1990_v63 = vcombine.low %v1971_v4, %v1987_v5  ;;  %v1989_v0 = vcombine.high %v1964_v6, %v1980_v7  ;;  %v1991_v8 = vcombine.high %v1971_v4, %v1987_v5  ;;  %v1988_v11 = vcombine.low %v1964_v6, %v1980_v7 }
 0x60b   : > { %1997 = vrot.lane.b32.xlu1 %v1990_v63, %s2833_s15  ;;  %1993 = vrot.lane.b32.xlu0 %v1989_v0, %s2834_s18 }
 0x60f   : > { %2001 = vrot.lane.b32.xlu1 %v1991_v8, %s2835_s24 }
 0x67d   : > { %v1998_v47 = vpop.permute.xlu1 %1997  ;;  %v1994_v12 = vpop.permute.xlu0 %1993 }
 0x67e   : > { %v2004_v13 = vsel %vm1424_vm3, %v1988_v11, %v1994_v12  ;;  %v2551_v12 = vld [vmem:[%s730_s16] ss:$0 sm:$0xff] }
 0x67f   : > { %v2006_v15 = vsel %vm2005_vm6, %v2004_v13, %v1998_v47 }
 0x681   : > { %v2002_v14 = vpop.permute.xlu1 %2001 }
 0x682   : > { %v2008_v54 = vsel %vm2007_vm7, %v2006_v15, %v2002_v14  ;;  %v2552_v14 = vld [vmem:[%s733_s10] ss:$0 sm:$0xff] }
 0x683   : > { %v2014_v16 = vpack.c.bf16 %v2008_v54, %v2008_v54 }
 0x685   : > { %2671 = vmatmul.mubr.msk.bf16.vlgmr.msra.gmra.mrb[20].mxu1 %vm814_vm2, %v2014_v16 }
 0x686   : > { %2690 = vmatprep.mubr.msk.bf16.mxu1 %vm2826_vm1, %v2825_v17  ;;  %2683 = vmatpush3.bf16.msra.mxu1 %v2759_v40 }
 0x687   : > { %2684 = vmatprep.subr.bf16.mxu1 %v2825_v17 }
 0x68a   : > { %2685 = vmatpush3.bf16.msra.mxu1 %v2760_v41 }
 0x68b   : > { %2686 = vmatprep.subr.bf16.mxu1 %v2825_v17 }
 0x68e   : > { %2687 = vmatpush3.bf16.msra.mxu1 %v2761_v42 }
 0x68f   : > { %2688 = vmatprep.subr.bf16.mxu1 %v2825_v17 }
 0x692   : > { %2689 = vmatpush3.bf16.msra.mxu1 %v2762_v44 }
 0x758   : > { %v2070_v19 = vpop.f32.mrb[20].mxu1 }
 0x759   : > { %v2071_v21 = vadd.f32 %v2535_v18, %v2070_v19  ;;  %v2672_v22 = vpop.f32.mrb[21].mxu1 }
 0x75a   : > { %v2073_v23 = vpop.f32.mrb[22].mxu1 }
 0x75b   : > { %v2673_v24 = vpop.f32.mrb[23].mxu1  ;;  %v2076_v9 = vadd.f32 %v2071_v21, %v3049_v20 }
 0x75d   : > { %v2079_v25 = vsel %vm814_vm2, %v2076_v9, 0.0 }
 0x75e   : > { %2080 = vadd.xlane.f32.xlu0 %v2079_v25 }
 0x7eb   : > { %v2081_v10 = vpop.xlane.xlu0 %2080 }
 0x7ec   : > { %v2083_v26 = vmul.f32 0.03125, %v2081_v10 }
 0x7ee   : > { %v2084_v27 = vsub.f32 %v2076_v9, %v2083_v26 }
 0x7f0   : > { %v2085_v28 = vmul.f32 %v2084_v27, %v2084_v27 }
 0x7f2   : > { %v2086_v29 = vsel %vm814_vm2, %v2085_v28, 0.0 }
 0x7f3   : > { %2087 = vadd.xlane.f32.xlu1 %v2086_v29 }
 0x880   : > { %v2088_v20 = vpop.xlane.xlu1 %2087 }
 0x881   : > { %v2089_v32 = vmul.f32 0.03125, %v2088_v20 }
 0x883   : > { %v2090_v33 = vadd.f32 1e-05, %v2089_v32 }
 0x885   : > { %2779 = vrsqrt.f32 %v2090_v33 }
 0x88f   : > { %v2780_v34 = vpop.eup %2779 }
 0x890   : > { %v2092_v36 = vmul.f32 %v2780_v34, %v2084_v27 }
 0x892   : > { %v2099_v38 = vmul.f32 %v2539_v35, %v2092_v36 }
 0x894   : > { %v2106_v43 = vadd.f32 %v2540_v37, %v2099_v38 }
 0x896   : > { %v2112_v39 = vpack.c.bf16 %v2106_v43, %v2106_v43 }
 0x898   : > { %2679 = vmatmul.mubr.msk.bf16.vlgmr.msra.gmra.mrb[24].mxu0 %vm814_vm2, %v2112_v39 }
 0x96b   : > { %v2168_v46 = vpop.f32.mrb[24].mxu0 }
 0x96c   : > { %v2169_v48 = vadd.f32 %v2541_v45, %v2168_v46  ;;  %v2680_v49 = vpop.f32.mrb[25].mxu0 }
 0x96d   : > { %v2171_v50 = vpop.f32.mrb[26].mxu0 }
 0x96e   : > { %v2175_v51 = vmul.f32 0.70710677, %v2169_v48  ;;  %v2681_v52 = vpop.f32.mrb[27].mxu0  ;;  %v2174_v55 = vmul.f32 0.5, %v2169_v48 }
 0x970   : > { %2781 = verf.f32 %v2175_v51 }
 0x97a   : > { %v2782_v53 = vpop.eup %2781 }
 0x97b   : > { %v2177_v56 = vadd.f32 1.0, %v2782_v53 }
 0x97d   : > { %v2178_v57 = vmul.f32 %v2177_v56, %v2174_v55 }
 0x97f   : > { %v2188_v17 = vpack.c.bf16 %v2178_v57, %v2178_v57 }
 0x981   : > { %2691 = vmatmul.mubr.msk.bf16.vlgmr.msra.gmra.mrb[24].mxu1 %vm2219_vm8, %v2188_v17 }
 0xa54   : > { %v2257_v59 = vpop.f32.mrb[24].mxu1 }
 0xa55   : > { %v2258_v60 = vadd.f32 %v2545_v58, %v2257_v59  ;;  %v2692_v61 = vpop.f32.mrb[25].mxu1 }
 0xa56   : > { %v2260_v62 = vpop.f32.mrb[26].mxu1 }
 0xa57   : > { %v2693_v1 = vpop.f32.mrb[27].mxu1  ;;  %v2263_v2 = vadd.f32 %v2258_v60, %v2106_v43 }
 0xa59   : > { %v2266_v3 = vsel %vm814_vm2, %v2263_v2, 0.0 }
 0xa5a   : > { %2267 = vadd.xlane.f32.xlu0 %v2266_v3 }
 0xae7   : > { %v2268_v4 = vpop.xlane.xlu0 %2267 }
 0xae8   : > { %v2269_v5 = vmul.f32 0.03125, %v2268_v4 }
 0xaea   : > { %v2270_v6 = vsub.f32 %v2263_v2, %v2269_v5 }
 0xaec   : > { %v2271_v7 = vmul.f32 %v2270_v6, %v2270_v6 }
 0xaee   : > { %v2272_v63 = vsel %vm814_vm2, %v2271_v7, 0.0 }
 0xaef   : > { %2273 = vadd.xlane.f32.xlu0 %v2272_v63 }
 0xb7c   : > { %v2274_v0 = vpop.xlane.xlu0 %2273 }
 0xb7d   : > { %v2275_v8 = vmul.f32 0.03125, %v2274_v0 }
 0xb7f   : > { %v2276_v11 = vadd.f32 1e-05, %v2275_v8 }
 0xb81   : > { %2783 = vrsqrt.f32 %v2276_v11 }
 0xb8b   : > { %v2784_v47 = vpop.eup %2783 }
 0xb8c   : > { %v2278_v13 = vmul.f32 %v2784_v47, %v2270_v6 }
 0xb8e   : > { %v2285_v15 = vmul.f32 %v2551_v12, %v2278_v13 }
 0xb90   : > { %v2292_v54 = vadd.f32 %v2552_v14, %v2285_v15 }
 0xb92   : > { %2293 = vst.msk [vmem:[%s3027_s11] sm:$0xff] %vm814_vm2, %v2292_v54 }
 0xb93 PF: > { %s3363_s24 = sld [smem:[#allocation5_spill]]  ;;  %s3364_s21 = sld [smem:[#allocation3_spill]] }
 0xb94   : > { %s3365_s22 = sld [smem:[#allocation4_spill]]  ;;  %s3366_s23 = sld [smem:[#allocation6_spill]] }
 0xb99   : > { %s26_s25 = sadd.s32 1, %s3363_s24   ;;  %s3367_s24 = sld [smem:[#allocation7_spill]] }
 0xb9a   : > { %p23_p8 = scmp.ge.s32.totalorder %s26_s25, 6  }
 0xb9c   :  { %25 = sbr.rel (!%p23_p8) target bundleno = 12 (0xc), region = 157 }

// kernel: sql_bart_forward.4
= control target key start
LH: loop header
LB: loop body
LE: loop exit
PB: predicated region body
PF: predicated region fallthrough
CT: control target
= control target key end

     0   :  { %s4903_s26 = smov 0   ;;  %s4905_s27 = smov 0   ;;  %s5556_s0 = inlined_call_operand.vmem [shape: f32[2,8,32], index: 0, kind: input, shape index: {}]   ;;  %s5557_s1 = inlined_call_operand.vmem [shape: f32[2,1,8], index: 1, kind: input, shape index: {}]   ;;  %s5558_s2 = inlined_call_operand.vmem [shape: f32[2,8,32], index: 2, kind: input, shape index: {}]   ;;  %s5559_s3 = inlined_call_operand.vmem [shape: f32[2,1,8], index: 3, kind: input, shape index: {}]   ;;  %s5560_s4 = inlined_call_operand.vmem [shape: f32[1,32], index: 4, kind: input, shape index: {}]   ;;  %s5561_s5 = inlined_call_operand.vmem [shape: f32[1,32], index: 5, kind: input, shape index: {}]   ;;  %s5562_s6 = inlined_call_operand.vmem [shape: bf16[2,3,32,32], index: 6, kind: input, shape index: {}]   ;;  %s5563_s7 = inlined_call_operand.vmem [shape: f32[2,3,1,32], index: 7, kind: input, shape index: {}]   ;;  %s5564_s8 = inlined_call_operand.vmem [shape: bf16[2,32,32], index: 8, kind: input, shape index: {}]   ;;  %s5565_s9 = inlined_call_operand.vmem [shape: f32[2,1,32], index: 9, kind: input, shape index: {}]   ;;  %s5566_s10 = inlined_call_operand.vmem [shape: f32[2,1,32], index: 10, kind: input, shape index: {}]   ;;  %s5567_s11 = inlined_call_operand.vmem [shape: f32[2,1,32], index: 11, kind: input, shape index: {}]   ;;  %s5568_s12 = inlined_call_operand.vmem [shape: bf16[2,3,32,32], index: 12, kind: input, shape index: {}]   ;;  %s5569_s13 = inlined_call_operand.vmem [shape: f32[2,3,1,32], index: 13, kind: input, shape index: {}]   ;;  %s5570_s14 = inlined_call_operand.vmem [shape: bf16[2,32,32], index: 14, kind: input, shape index: {}]   ;;  %s5571_s15 = inlined_call_operand.vmem [shape: f32[2,1,32], index: 15, kind: input, shape index: {}]   ;;  %s5572_s16 = inlined_call_operand.vmem [shape: f32[2,1,32], index: 16, kind: input, shape index: {}]   ;;  %s5573_s17 = inlined_call_operand.vmem [shape: f32[2,1,32], index: 17, kind: input, shape index: {}]   ;;  %s5574_s18 = inlined_call_operand.vmem [shape: bf16[2,32,64], index: 18, kind: input, shape index: {}]   ;;  %s5575_s19 = inlined_call_operand.vmem [shape: f32[2,1,64], index: 19, kind: input, shape index: {}]   ;;  %s5576_s20 = inlined_call_operand.vmem [shape: bf16[2,64,32], index: 20, kind: input, shape index: {}]   ;;  %s5577_s21 = inlined_call_operand.vmem [shape: f32[2,1,32], index: 21, kind: input, shape index: {}]   ;;  %s5578_s22 = inlined_call_operand.vmem [shape: f32[2,1,32], index: 22, kind: input, shape index: {}]   ;;  %s5579_s23 = inlined_call_operand.vmem [shape: f32[2,1,32], index: 23, kind: input, shape index: {}]   ;;  %s5580_s24 = inlined_call_operand.vmem [shape: f32[2,8,32], index: 24, kind: output, shape index: {}]  }
   0x1   :  { %5590 = sst [smem:[#allocation12_spill]] %s5556_s0  ;;  %s4907_s28 = smov 0  }
   0x2   :  { %5591 = sst [smem:[#allocation13_spill]] %s5557_s1 }
   0x3   :  { %5592 = sst [smem:[#allocation14_spill]] %s5558_s2 }
   0x4   :  { %5593 = sst [smem:[#allocation15_spill]] %s5559_s3 }
   0x5   :  { %5594 = sst [smem:[#allocation16_spill]] %s5560_s4 }
   0x6   :  { %5595 = sst [smem:[#allocation17_spill]] %s5561_s5  ;;  %s4901_s5 = smov 0  }
   0x7   :  { %5596 = sst [smem:[#allocation18_spill]] %s5562_s6  ;;  %s4909_s6 = smov 0  }
   0x8   :  { %5597 = sst [smem:[#allocation19_spill]] %s5563_s7 }
   0x9   :  { %5598 = sst [smem:[#allocation20_spill]] %s5564_s8 }
   0xa   :  { %5599 = sst [smem:[#allocation21_spill]] %s5568_s12 }
   0xb   :  { %5600 = sst [smem:[#allocation22_spill]] %s5569_s13 }
   0xc   :  { %5601 = sst [smem:[#allocation23_spill]] %s5570_s14 }
   0xd   :  { %5602 = sst [smem:[#allocation24_spill]] %s5571_s15 }
   0xe   :  { %5603 = sst [smem:[#allocation25_spill]] %s5572_s16 }
   0xf   :  { %5604 = sst [smem:[#allocation26_spill]] %s5573_s17 }
  0x10   :  { %5605 = sst [smem:[#allocation27_spill]] %s5574_s18 }
  0x11   :  { %5606 = sst [smem:[#allocation28_spill]] %s5575_s19 }
  0x12   :  { %5607 = sst [smem:[#allocation29_spill]] %s5576_s20 }
  0x13   :  { %5608 = sst [smem:[#allocation30_spill]] %s5577_s21 }
  0x14   :  { %5609 = sst [smem:[#allocation31_spill]] %s5578_s22 }
  0x15   :  { %5610 = sst [smem:[#allocation32_spill]] %s5579_s23 }
  0x16   :  { %5611 = sst [smem:[#allocation33_spill]] %s5580_s24 }
  0x17 LB: > { %5612 = sst [smem:[#allocation2_spill]] %s4746_s5  ;;  %s43_s2 = sadd.s32 1, %s4754_s27  ;;  %s4762_s6 = sphi %s4909_s6, %s34_s6   ;;  %s4758_s28 = sphi %s4907_s28, %s5673_s28   ;;  %s4754_s27 = sphi %s4905_s27, %s5672_s27   ;;  %s4750_s26 = sphi %s4903_s26, %s5671_s26   ;;  %s4746_s5 = sphi %s4901_s5, %s5670_s5  }
  0x18   : > { %5613 = sst [smem:[#allocation3_spill]] %s4754_s27  ;;  %s46_s29 = sadd.s32 1, %s4758_s28 }
  0x19   : > { %5614 = sst [smem:[#allocation4_spill]] %s4758_s28  ;;  %p44_p0 = scmp.ge.s32.totalorder %s43_s2, 2 }
  0x1a   : > { %5615 = sst [smem:[#allocation5_spill]] %s4762_s6  ;;  %p4259_p1 = scmp.ge.s32.totalorder %s4762_s6, 1 }
  0x1b   : > { %p856_p2 = scmp.lt.s32.totalorder %s4762_s6, 5  ;;  %s5675_s2 = smov (%p44_p0, %s43_s2), 0 }
  0x1c   : > { %5616 = sst [smem:[#allocation6_spill]] %s5675_s2  ;;  %s5677_s29 = smov (!%p44_p0, %s46_s29), %s4758_s28 }
  0x1d   : > { %p857_p3 = pnand %p4259_p1, %p856_p2  ;;  %p48_p4 = scmp.ge.s32.totalorder %s5677_s29, 2 }
  0x1f   : > { %s5679_s29 = smov (%p48_p4, %s5677_s29), 0  ;;  %860 = sbr.rel (%p857_p3) target bundleno = 4804 (0x12c4), region = 116 }
  0x20   : > { %5617 = sst [smem:[#allocation7_spill]] %s5679_s29 }
  0x26   : > { %p998_p5 = scmp.lt.s32.totalorder %s4750_s26, 1  ;;  %p1012_p6 = scmp.lt.s32.totalorder %s4746_s5, 1 }
  0x27   : > { %s5620_s29 = sld [smem:[#allocation12_spill]]  ;;  %s5623_s4 = sld [smem:[#allocation18_spill]] }
  0x28   : > { %s5681_s26 = smov (!%p998_p5, %s4750_s26), 1  ;;  %s5625_s28 = sld [smem:[#allocation20_spill]] }
  0x29   : > { %5618 = sst [smem:[#allocation8_spill]] %s5681_s26  ;;  %s4940_s7 = sshll.u32 %s5681_s26, 3 }
  0x2a   : > { %s4937_s0 = scalar_select %p1012_p6, %s4746_s5, 1 }
  0x2b   : > { %s5627_s24 = sld [smem:[#allocation19_spill]]  ;;  %s5628_s12 = sld [smem:[#allocation21_spill]] }
  0x2c   : > { %s4606_s21 = smul.u32 48, %s4937_s0  ;;  %s4358_s3 = sshll.u32 %s4937_s0, 4 }
  0x2d   : > { %s1001_s2 = scalar_lea.vmem %s5620_s29, %s4940_s7  ;;  %s4607_s30 = smul.u32 3, %s4937_s0 }
  0x2e   : > { %s4964_s29 = scalar_lea.vmem %s5623_s4, %s4606_s21  ;;  %s4969_s6 = scalar_lea.vmem %s5625_s28, %s4358_s3 }
  0x2f   : > { %5624 = sst [smem:[#allocation9_spill]] %s4964_s29  ;;  %s5629_s13 = sld [smem:[#allocation22_spill]] }
  0x30   : > { %5626 = sst [smem:[#allocation10_spill]] %s4969_s6  ;;  %s5630_s14 = sld [smem:[#allocation23_spill]] }
  0x31   : > { %s4974_s22 = scalar_lea.vmem %s5627_s24, %s4607_s30  ;;  %s4991_s5 = scalar_lea.vmem %s5628_s12, %s4606_s21 }
  0x32   : > { %s5635_s18 = sld [smem:[#allocation27_spill]]  ;;  %s5637_s29 = sld [smem:[#allocation30_spill]] }
  0x33   : > { %s5638_s6 = sld [smem:[#allocation29_spill]]  ;;  %s5639_s12 = sld [smem:[#allocation31_spill]] }
  0x34   : > { %s5641_s26 = sld [smem:[#allocation33_spill]]  ;;  %s5642_s4 = sld [smem:[#allocation2_spill]] }
  0x35   : > { %s4996_s20 = scalar_lea.vmem %s5629_s13, %s4607_s30 }
  0x36   : > { %s5001_s8 = scalar_lea.vmem %s5630_s14, %s4358_s3 }
  0x37   : > { %5631 = sst [smem:[#allocation11_spill]] %s5001_s8  ;;  %s4361_s8 = sshll.u32 %s4937_s0, 5 }
  0x38   : > { %s5018_s24 = scalar_lea.vmem %s5635_s18, %s4358_s3  ;;  %s1073_s15 = scalar_lea.vmem %s5637_s29, %s4937_s0 }
  0x39   : > { %s5032_s16 = scalar_lea.vmem %s5638_s6, %s4361_s8  ;;  %s1076_s23 = scalar_lea.vmem %s5639_s12, %s4937_s0 }
  0x3a   : > { %s5640_s18 = sld [smem:[#allocation32_spill]]  ;;  %s5046_s14 = scalar_lea.vmem %s5641_s26, %s4940_s7 }
  0x3b   : > { %p4273_p7 = scmp.ne.s32.totalorder %s5642_s4, 0 }
  0x3c   : > { %v1089_v0 = vld [vmem:[%s1001_s2] sm:$0xff] (!%p4273_p7)  ;;  %vm1092_vm0 = vcmask (!%p4273_p7), 261120   ;;  %s5643_s2 = sld [smem:[#allocation16_spill]] (!%p4273_p7)  ;;  %s5644_s6 = sld [smem:[#allocation17_spill]] (!%p4273_p7) }
  0x3d   : > { %1088 = sbr.rel (%p4273_p7) target bundleno = 375 (0x177), region = 120  ;;  %v1093_v1 = vsel (!%p4273_p7), %vm1092_vm0, %v1089_v0, 0.0 }
  0x3e   : > { %1094 = vadd.xlane.f32.xlu0 (!%p4273_p7), %v1093_v1 }
  0x40   : > { %s1079_s17 = scalar_lea.vmem %s5640_s18, %s4937_s0 }
  0x42   : > { %v4274_v11 = vld [vmem:[%s5643_s2] ss:$0 sm:$0xff] (!%p4273_p7) }
  0x43   : > { %v4275_v13 = vld [vmem:[%s5644_s6] ss:$0 sm:$0xff] (!%p4273_p7) }
  0xcb   : > { %v1095_v2 = vpop.xlane.xlu0 %1094 }
  0xcc   : > { %v1097_v3 = vmul.f32 0.03125, %v1095_v2 }
  0xce   : > { %v1098_v4 = vsub.f32 %v1089_v0, %v1097_v3 }
  0xd0   : > { %v1099_v5 = vmul.f32 %v1098_v4, %v1098_v4 }
  0xd2   : > { %v1100_v6 = vsel %vm1092_vm0, %v1099_v5, 0.0 }
  0xd3   : > { %1101 = vadd.xlane.f32.xlu0 %v1100_v6 }
 0x160   : > { %v1102_v7 = vpop.xlane.xlu0 %1101 }
 0x161   : > { %v1103_v8 = vmul.f32 0.03125, %v1102_v7 }
 0x163   : > { %v1104_v9 = vadd.f32 1e-05, %v1103_v8 }
 0x165   : > { %4660 = vrsqrt.f32 %v1104_v9 }
 0x16f   : > { %v4661_v10 = vpop.eup %4660 }
 0x170   : > { %v1106_v12 = vmul.f32 %v4661_v10, %v1098_v4 }
 0x172   : > { %v1113_v14 = vmul.f32 %v4274_v11, %v1106_v12 }
 0x174   : > { %v1120_v15 = vadd.f32 %v4275_v13, %v1113_v14 }
 0x176   : > { %1121 = vst.msk [vmem:[%s5046_s14] sm:$0xff] %vm1092_vm0, %v1120_v15 }
 0x177 PF: > { %s5645_s25 = sld [smem:[#allocation9_spill]]  ;;  %v4764_v17 = vmov 0.0   ;;  %vm4765_vm1 = vmmov 0   ;;  %vm1176_vm2 = vcmask 261120   ;;  %v4280_v23 = vld [vmem:[%s4974_s22 + $0x1] ss:$0 sm:$0xff]  ;;  %v1124_v37 = vlaneseq  ;;  %s5655_s4 = scalar_lea.vmem %s5566_s10, %s4937_s0 }
 0x178   : > { %4434 = vmatprep.subr.bf16.mxu1 %v4764_v17  ;;  %4426 = vmatprep.subr.bf16.mxu0 %v4764_v17  ;;  %v4276_v25 = vld [vmem:[%s4974_s22] ss:$0 sm:$0xff]  ;;  %s4766_s27 = smov 104   ;;  %s4767_s1 = smov 120   ;;  %v4769_v38 = vmov 1983009808  }
 0x179   : > { %4438 = vmatprep.mubr.msk.bf16.mxu1 %vm4765_vm1, %v4764_v17  ;;  %4430 = vmatprep.mubr.msk.bf16.mxu0 %vm4765_vm1, %v4764_v17  ;;  %s4768_s21 = smov 112   ;;  %v1349_v39 = vunpack.c.l.s4 %v4769_v38  ;;  %v4770_v40 = vmov 1934713408   ;;  %v5100_v42 = vshrl.u32 %v1124_v37, 7  ;;  %vm1786_vm3 = vcmask 64512   ;;  %s5646_s28 = sld [smem:[#allocation8_spill]] }
 0x17a   : > { %v1381_v41 = vunpack.c.l.s4 %v4770_v40  ;;  %s5647_s19 = sld [smem:[#allocation15_spill]]  ;;  %s5649_s12 = sld [smem:[#allocation13_spill]]  ;;  %vm2030_vm9 = vcmask 1043456   ;;  %vm2361_vm10 = vcmask 130048   ;;  %vm2363_vm11 = vcmask 195584  }
 0x17b   : > { %v1350_v43 = vunpack.c.0.s8 %v1349_v39  ;;  %s4773_s2 = smov 16   ;;  %s4774_s8 = smov 8   ;;  %vm3900_vm12 = vcmask 523264  }
 0x17c   : > { %v1382_v46 = vunpack.c.0.s8 %v1381_v41  ;;  %s4775_s29 = smov 24  }
 0x17d   : > { %v4662_v16 = vld [vmem:[%s5645_s25 + $0x10] sm:$0xff]   ;;  %v4663_v18 = vld [vmem:[%s5645_s25] sm:$0xff]   ;;  %v4664_v19 = vld [vmem:[%s5645_s25 + $0x18] sm:$0xff]   ;;  %v5103_v47 = vsub.s32 %v1350_v43, %v5100_v42 }
 0x17e   : > { %4435 = vmatpush3.bf16.msra.mxu1 %v4662_v16  ;;  %4427 = vmatpush3.bf16.msra.mxu0 %v4663_v18  ;;  %v5068_v20 = vld [vmem:[%s5046_s14] sm:$0xff]  ;;  %v4665_v21 = vld [vmem:[%s5645_s25 + $0x8] sm:$0xff]   ;;  %v5106_v54 = vsub.s32 %v1382_v46, %v5100_v42 }
 0x17f   : > { %4436 = vmatprep.subr.bf16.mxu1 %v4764_v17  ;;  %4428 = vmatprep.subr.bf16.mxu0 %v4764_v17  ;;  %v1157_v22 = vpack.c.bf16 %v5068_v20, %v5068_v20  ;;  %v4666_v29 = vld [vmem:[%s5645_s25 + $0x20] sm:$0xff]   ;;  %v4667_v36 = vld [vmem:[%s5645_s25 + $0x28] sm:$0xff]  }
 0x180   : > { %s5648_s13 = scalar_lea.vmem %s5647_s19, %s5646_s28  ;;  %s5650_s18 = scalar_lea.vmem %s5649_s12, %s5646_s28 }
 0x181   : > { %s5652_s28 = scalar_lea.vmem %s5565_s9, %s4937_s0  ;;  %s5653_s19 = sld [smem:[#allocation14_spill]] }
 0x182   : > { %4437 = vmatpush3.bf16.msra.mxu1 %v4664_v19  ;;  %4429 = vmatpush3.bf16.msra.mxu0 %v4665_v21 }
 0x183   : > { %4450 = vmatprep.subr.bf16.mxu1 %v4764_v17  ;;  %4442 = vmatprep.subr.bf16.mxu0 %v4764_v17 }
 0x185   : > { %4439 = vmatmul.mubr.msk.bf16.vlgmr.msra.gmra.mrb[0].mxu1 %vm1176_vm2, %v1157_v22  ;;  %4431 = vmatmul.mubr.msk.bf16.vlgmr.msra.gmra.mrb[0].mxu0 %vm1176_vm2, %v1157_v22 }
 0x186   : > { %4452 = vmatprep.mubr.msk.bf16.mxu1 %vm4765_vm1, %v4764_v17  ;;  %4446 = vmatprep.mubr.msk.bf16.mxu0 %vm4765_vm1, %v4764_v17 }
 0x187   : > { %4443 = vmatpush3.bf16.msra.mxu0 %v4666_v29 }
 0x188   : > { %4444 = vmatprep.subr.bf16.mxu0 %v4764_v17 }
 0x18b   : > { %4445 = vmatpush3.bf16.msra.mxu0 %v4667_v36 }
 0x18c   : > { %4456 = vmatprep.subr.bf16.mxu0 %v4764_v17 }
 0x18e   : > { %4447 = vmatmul.mubr.msk.bf16.vlgmr.msra.gmra.mrb[4].mxu0 %vm1176_vm2, %v1157_v22 }
 0x18f   : > { %4458 = vmatprep.mubr.msk.bf16.mxu0 %vm4765_vm1, %v4764_v17 }
 0x258   : > { %v1272_v24 = vpop.f32.mrb[0].mxu1  ;;  %v1214_v28 = vpop.f32.mrb[0].mxu0 }
 0x259   : > { %v1273_v26 = vadd.f32 %v4280_v23, %v1272_v24  ;;  %v4440_v27 = vpop.f32.mrb[1].mxu1  ;;  %v4432_v31 = vpop.f32.mrb[1].mxu0  ;;  %v1215_v33 = vadd.f32 %v4276_v25, %v1214_v28 }
 0x25a   : > { %v1275_v30 = vpop.f32.mrb[2].mxu1  ;;  %v1217_v34 = vpop.f32.mrb[2].mxu0 }
 0x25b   : > { %1493 = vrot.lane.b32.xlu1 %v1273_v26, %s4766_s27  ;;  %1487 = vrot.lane.b32.xlu0 %v1273_v26, %s4767_s1  ;;  %v4441_v32 = vpop.f32.mrb[3].mxu1  ;;  %v4433_v35 = vpop.f32.mrb[3].mxu0 }
 0x25f   : > { %1490 = vrot.lane.b32.xlu0 %v1273_v26, %s4768_s21  ;;  %1337 = vrot.lane.b32.xlu1 %v1215_v33, %s4767_s1 }
 0x263   : > { %1340 = vrot.lane.b32.xlu0 %v1215_v33, %s4768_s21  ;;  %1343 = vrot.lane.b32.xlu1 %v1215_v33, %s4766_s27 }
 0x2cd   : > { %v1494_v44 = vpop.permute.xlu1 %1493  ;;  %v1488_v45 = vpop.permute.xlu0 %1487 }
 0x2ce   : > { %v1512_v48 = vcombine.low %v1488_v45, %v1494_v44  ;;  %v1513_v49 = vcombine.high %v1488_v45, %v1494_v44 }
 0x2d0   : > { %v1520_v55 = vrot.slane %v1512_v48, %v5103_v47  ;;  %v1527_v56 = vrot.slane %v1513_v49, %v5103_v47 }
 0x2d1   : > { %v1491_v50 = vpop.permute.xlu0 %1490  ;;  %v1338_v51 = vpop.permute.xlu1 %1337 }
 0x2d2   : > { %v1496_v52 = vcombine.low %v1273_v26, %v1491_v50  ;;  %v1497_v53 = vcombine.high %v1273_v26, %v1491_v50 }
 0x2d4   : > { %v1504_v57 = vrot.slane %v1496_v52, %v5103_v47  ;;  %v1511_v58 = vrot.slane %v1497_v53, %v5103_v47 }
 0x2d5   : > { %v1341_v59 = vpop.permute.xlu0 %1340  ;;  %v1344_v60 = vpop.permute.xlu1 %1343 }
 0x2d6   : > { %v1528_v61 = vcombine.low %v1504_v57, %v1520_v55  ;;  %v1529_v62 = vcombine.high %v1504_v57, %v1520_v55  ;;  %v1544_v63 = vcombine.low %v1511_v58, %v1527_v56  ;;  %v1545_v0 = vcombine.high %v1511_v58, %v1527_v56 }
 0x2d7   : > { %v1346_v1 = vcombine.low %v1215_v33, %v1341_v59  ;;  %v1347_v2 = vcombine.high %v1215_v33, %v1341_v59  ;;  %v1362_v3 = vcombine.low %v1338_v51, %v1344_v60  ;;  %v1363_v4 = vcombine.high %v1338_v51, %v1344_v60 }
 0x2d8   : > { %v1536_v5 = vrot.slane %v1528_v61, %v5106_v54  ;;  %v1543_v6 = vrot.slane %v1529_v62, %v5106_v54  ;;  %v1552_v7 = vrot.slane %v1544_v63, %v5106_v54  ;;  %v1559_v8 = vrot.slane %v1545_v0, %v5106_v54 }
 0x2d9   : > { %v1354_v9 = vrot.slane %v1346_v1, %v5103_v47  ;;  %v1361_v10 = vrot.slane %v1347_v2, %v5103_v47  ;;  %v1370_v11 = vrot.slane %v1362_v3, %v5103_v47  ;;  %v1377_v12 = vrot.slane %v1363_v4, %v5103_v47 }
 0x2da   : > { %v1564_v13 = vcombine.low %v1536_v5, %v1543_v6  ;;  %v4290_v14 = vcombine.high %v1536_v5, %v1543_v6  ;;  %v1580_v15 = vcombine.low %v1552_v7, %v1559_v8  ;;  %v4291_v16 = vcombine.high %v1552_v7, %v1559_v8 }
 0x2db   : > { %v1378_v18 = vcombine.low %v1354_v9, %v1370_v11  ;;  %v1379_v19 = vcombine.high %v1354_v9, %v1370_v11  ;;  %v1394_v21 = vcombine.low %v1361_v10, %v1377_v12  ;;  %v1395_v22 = vcombine.high %v1361_v10, %v1377_v12 }
 0x2dc   : > { %v1571_v23 = vrot.slane %v1564_v13, %v5103_v47  ;;  %v1579_v24 = vrot.slane %v4290_v14, %v5103_v47  ;;  %v1587_v25 = vrot.slane %v1580_v15, %v5103_v47  ;;  %v1595_v26 = vrot.slane %v4291_v16, %v5103_v47  ;;  %v1330_v15 = vpop.f32.mrb[4].mxu0 }
 0x2dd   : > { %v1386_v27 = vrot.slane %v1378_v18, %v5106_v54  ;;  %v1393_v28 = vrot.slane %v1379_v19, %v5106_v54  ;;  %v1402_v29 = vrot.slane %v1394_v21, %v5106_v54  ;;  %v1409_v30 = vrot.slane %v1395_v22, %v5106_v54  ;;  %v4448_v16 = vpop.f32.mrb[5].mxu0  ;;  %v1139_v21 = vld [vmem:[%s5648_s13] sm:$0x1]  ;;  %s5654_s13 = scalar_lea.vmem %s5653_s19, %s4940_s7 }
 0x2de   : > { %v1596_v31 = vcombine.low %v1571_v23, %v1579_v24  ;;  %v1612_v32 = vcombine.low %v1587_v25, %v1595_v26  ;;  %v1597_v33 = vcombine.high %v1571_v23, %v1579_v24  ;;  %v1613_v34 = vcombine.high %v1587_v25, %v1595_v26  ;;  %v1333_v18 = vpop.f32.mrb[6].mxu0  ;;  %v1129_v26 = vld [vmem:[%s5650_s18] sm:$0x1] }
 0x2df   : > { %v1414_v35 = vcombine.low %v1386_v27, %v1393_v28  ;;  %v4288_v36 = vcombine.high %v1386_v27, %v1393_v28  ;;  %v1430_v38 = vcombine.low %v1402_v29, %v1409_v30  ;;  %v4289_v39 = vcombine.high %v1402_v29, %v1409_v30  ;;  %v4449_v19 = vpop.f32.mrb[7].mxu0 }
 0x2e0   : > { %v1604_v40 = vrot.slane %v1596_v31, %v5106_v54  ;;  %v1620_v41 = vrot.slane %v1612_v32, %v5106_v54  ;;  %v1611_v50 = vrot.slane %v1597_v33, %v5106_v54  ;;  %v1627_v51 = vrot.slane %v1613_v34, %v5106_v54 }
 0x2e1   : > { %v1421_v43 = vrot.slane %v1414_v35, %v5103_v47  ;;  %v1429_v44 = vrot.slane %v4288_v36, %v5103_v47  ;;  %v1437_v45 = vrot.slane %v1430_v38, %v5103_v47  ;;  %v1445_v46 = vrot.slane %v4289_v39, %v5103_v47 }
 0x2e2   : > { %v1628_v48 = vcombine.low %v1604_v40, %v1620_v41  ;;  %v1629_v49 = vcombine.high %v1604_v40, %v1620_v41  ;;  %v1630_v61 = vcombine.low %v1611_v50, %v1627_v51  ;;  %v1631_v62 = vcombine.high %v1611_v50, %v1627_v51 }
 0x2e3   : > { %v1446_v52 = vcombine.low %v1421_v43, %v1429_v44  ;;  %v1462_v53 = vcombine.low %v1437_v45, %v1445_v46  ;;  %v1447_v63 = vcombine.high %v1421_v43, %v1429_v44  ;;  %v1463_v0 = vcombine.high %v1437_v45, %v1445_v46 }
 0x2e4   : > { %v1632_v55 = vpack.c.bf16 %v1628_v48, %v1628_v48  ;;  %v1633_v56 = vpack.c.bf16 %v1629_v49, %v1629_v49  ;;  %v1634_v3 = vpack.c.bf16 %v1630_v61, %v1630_v61  ;;  %v1635_v4 = vpack.c.bf16 %v1631_v62, %v1631_v62  ;;  %v4284_v62 = vld [vmem:[%s4974_s22 + $0x2] ss:$0 sm:$0xff]  ;;  %s5651_s22 = sld [smem:[#allocation10_spill]] }
 0x2e5   : > { %v1454_v57 = vrot.slane %v1446_v52, %v5106_v54  ;;  %v1470_v58 = vrot.slane %v1462_v53, %v5106_v54  ;;  %v1461_v7 = vrot.slane %v1447_v63, %v5106_v54  ;;  %v1477_v8 = vrot.slane %v1463_v0, %v5106_v54 }
 0x2e6   : > { %v1791_v59 = vsel %vm1786_vm3, %v1632_v55, 0  ;;  %v1837_v60 = vsel %vm1786_vm3, %v1633_v56, 0  ;;  %v1883_v9 = vsel %vm1786_vm3, %v1634_v3, 0  ;;  %v1929_v10 = vsel %vm1786_vm3, %v1635_v4, 0 }
 0x2e7   : > { %4451 = vmatpush3.bf16.xpose.msra.mxu1 %v1791_v59  ;;  %4457 = vmatpush3.bf16.xpose.msra.mxu0 %v1837_v60  ;;  %v1478_v1 = vcombine.low %v1454_v57, %v1470_v58  ;;  %v1479_v2 = vcombine.high %v1454_v57, %v1470_v58  ;;  %v1480_v11 = vcombine.low %v1461_v7, %v1477_v8  ;;  %v1134_v22 = vsub.s32 0, %v5100_v42 }
 0x2e8   : > { %4462 = vmatprep.subr.bf16.mxu1 %v4764_v17  ;;  %4468 = vmatprep.subr.bf16.mxu0 %v4764_v17  ;;  %v1481_v12 = vcombine.high %v1461_v7, %v1477_v8  ;;  %vm1140_vm4 = vcmp.gt.f32.partialorder %v1139_v21, 0.5  ;;  %v4771_v23 = vmov -3.4028235e+38   ;;  %vm1130_vm5 = vcmp.gt.f32.partialorder %v1129_v26, 0.5 }
 0x2e9   : > { %v1482_v5 = vpack.c.bf16 %v1478_v1, %v1478_v1  ;;  %v1483_v6 = vpack.c.bf16 %v1479_v2, %v1479_v2  ;;  %v1484_v13 = vpack.c.bf16 %v1480_v11, %v1480_v11  ;;  %v1141_v24 = vsel %vm1140_vm4, 0.0, %v4771_v23 }
 0x2ea   : > { %v1485_v14 = vpack.c.bf16 %v1481_v12, %v1481_v12  ;;  %v5166_v25 = vrot.slane %v1141_v24, %v1134_v22  ;;  %v4772_v27 = vmov 0   ;;  %v1127_v29 = vand.u32 127, %v1124_v37 }
 0x2eb   : > { %v1131_v28 = vsel %vm1130_vm5, 1, %v4772_v27  ;;  %v1331_v63 = vadd.f32 %v4284_v62, %v1330_v15 }
 0x2ec   : > { %v1135_v30 = vrot.slane %v1131_v28, %v1134_v22  ;;  %vm1128_vm6 = vcmp.le.s32.totalorder %v1127_v29, %v5100_v42 }
 0x2ee   : > { %4453 = vmatmul.mubr.msk.bf16.vlgmr.msra.gmra.mrb[4].mxu1 %vm1786_vm3, %v1482_v5  ;;  %4459 = vmatmul.mubr.msk.bf16.vlgmr.msra.gmra.mrb[8].mxu0 %vm1786_vm3, %v1483_v6  ;;  %vm1136_vm7 = vcmp.eq.s32.totalorder %v1135_v30, 1 }
 0x2ef   : > { %4463 = vmatpush3.bf16.xpose.msra.mxu1 %v1883_v9  ;;  %4469 = vmatpush3.bf16.xpose.msra.mxu0 %v1929_v10  ;;  %vm1137_vm8 = vmand %vm1128_vm6, %vm1136_vm7 }
 0x2f0   : > { %4464 = vmatprep.mubr.msk.bf16.mxu1 %vm4765_vm1, %v4764_v17  ;;  %4470 = vmatprep.mubr.msk.bf16.mxu0 %vm4765_vm1, %v4764_v17  ;;  %v1138_v33 = vsel %vm1137_vm8, 0.0, %v4771_v23 }
 0x2f1   : > { %4474 = vmatprep.subr.bf16.mxu1 %v4764_v17  ;;  %4480 = vmatprep.subr.bf16.mxu0 %v4764_v17 }
 0x2f6   : > { %4465 = vmatmul.mubr.msk.bf16.vlgmr.msra.gmra.mrb[8].mxu1 %vm1786_vm3, %v1484_v13  ;;  %4471 = vmatmul.mubr.msk.bf16.vlgmr.msra.gmra.mrb[12].mxu0 %vm1786_vm3, %v1485_v14 }
 0x2f7   : > { %4476 = vmatprep.mubr.msk.bf16.mxu1 %vm4765_vm1, %v4764_v17  ;;  %4482 = vmatprep.mubr.msk.bf16.mxu0 %vm4765_vm1, %v4764_v17 }
 0x3c1   : > { %v1827_v31 = vpop.f32.mrb[4].mxu1  ;;  %v1873_v32 = vpop.f32.mrb[8].mxu0 }
 0x3c2   : > { %v1971_v34 = vmul.f32 0.35355338, %v1827_v31  ;;  %v1972_v35 = vmul.f32 0.35355338, %v1873_v32  ;;  %v4454_v36 = vpop.f32.mrb[5].mxu1  ;;  %v4460_v38 = vpop.f32.mrb[9].mxu0 }
 0x3c3   : > { %v1830_v39 = vpop.f32.mrb[6].mxu1  ;;  %v1876_v40 = vpop.f32.mrb[10].mxu0 }
 0x3c4   : > { %v4455_v41 = vpop.f32.mrb[7].mxu1  ;;  %v4461_v43 = vpop.f32.mrb[11].mxu0  ;;  %v1975_v44 = vadd.f32 %v1971_v34, %v1138_v33  ;;  %v1976_v45 = vadd.f32 %v1972_v35, %v1138_v33 }
 0x3c6   : > { %v1979_v37 = vsel %vm1786_vm3, %v1975_v44, -inf  ;;  %v1982_v46 = vsel %vm1786_vm3, %v1976_v45, -inf }
 0x3c7   : > { %1980 = vmax.xlane.f32.xlu0 %v1979_v37  ;;  %1983 = vmax.xlane.f32.xlu1 %v1982_v46 }
 0x3c9   : > { %v1919_v42 = vpop.f32.mrb[8].mxu1  ;;  %v1965_v48 = vpop.f32.mrb[12].mxu0 }
 0x3ca   : > { %v1973_v49 = vmul.f32 0.35355338, %v1919_v42  ;;  %v1974_v50 = vmul.f32 0.35355338, %v1965_v48  ;;  %v4466_v51 = vpop.f32.mrb[9].mxu1  ;;  %v4472_v52 = vpop.f32.mrb[13].mxu0 }
 0x3cb   : > { %v1922_v53 = vpop.f32.mrb[10].mxu1  ;;  %v1968_v55 = vpop.f32.mrb[14].mxu0 }
 0x3cc   : > { %v4467_v56 = vpop.f32.mrb[11].mxu1  ;;  %v4473_v57 = vpop.f32.mrb[15].mxu0  ;;  %v1977_v58 = vadd.f32 %v1973_v49, %v1138_v33  ;;  %v1978_v60 = vadd.f32 %v1974_v50, %v1138_v33 }
 0x3ce   : > { %v1985_v59 = vsel %vm1786_vm3, %v1977_v58, -inf  ;;  %v1988_v61 = vsel %vm1786_vm3, %v1978_v60, -inf }
 0x3cf   : > { %1986 = vmax.xlane.f32.xlu0 %v1985_v59 }
 0x3d3   : > { %1989 = vmax.xlane.f32.xlu0 %v1988_v61 }
 0x3d8   : > { %1637 = vrot.lane.b32.xlu1 %v1331_v63, %s4767_s1 }
 0x454   : > { %v1981_v0 = vpop.xlane.xlu0 %1980  ;;  %v1984_v1 = vpop.xlane.xlu1 %1983 }
 0x455   : > { %v1991_v2 = vsub.f32 %v1975_v44, %v1981_v0  ;;  %v1992_v3 = vsub.f32 %v1976_v45, %v1984_v1 }
 0x457   : > { %v1995_v4 = vmul.f32 1.442695, %v1991_v2  ;;  %v1997_v5 = vmul.f32 1.442695, %v1992_v3 }
 0x458   : > { %v1638_v22 = vpop.permute.xlu1 %1637 }
 0x459   : > { %4684 = vpow2.f32 %v1995_v4 }
 0x45a   : > { %4686 = vpow2.f32 %v1997_v5 }
 0x45c   : > { %v1987_v10 = vpop.xlane.xlu0 %1986 }
 0x45d   : > { %v1993_v12 = vsub.f32 %v1977_v58, %v1987_v10 }
 0x45f   : > { %v1999_v14 = vmul.f32 1.442695, %v1993_v12 }
 0x460   : > { %v1990_v11 = vpop.xlane.xlu0 %1989 }
 0x461   : > { %v1994_v13 = vsub.f32 %v1978_v60, %v1990_v11  ;;  %4688 = vpow2.f32 %v1999_v14 }
 0x463   : > { %v5181_v6 = vpop.eup %4684  ;;  %v2001_v15 = vmul.f32 1.442695, %v1994_v13 }
 0x464   : > { %v5183_v7 = vpop.eup %4686  ;;  %v2003_v8 = vsel %vm1786_vm3, %v5181_v6, 0.0 }
 0x465   : > { %2004 = vadd.xlane.f32.xlu1 %v2003_v8  ;;  %v2006_v9 = vsel %vm1786_vm3, %v5183_v7, 0.0  ;;  %4690 = vpow2.f32 %v2001_v15 }
 0x466   : > { %2007 = vadd.xlane.f32.xlu0 %v2006_v9 }
 0x46b   : > { %v5191_v16 = vpop.eup %4688 }
 0x46c   : > { %v2009_v19 = vsel %vm1786_vm3, %v5191_v16, 0.0 }
 0x46f   : > { %v5193_v18 = vpop.eup %4690 }
 0x470   : > { %v2012_v21 = vsel %vm1786_vm3, %v5193_v18, 0.0 }
 0x476   : > { %1643 = vrot.lane.b32.xlu1 %v1331_v63, %s4766_s27 }
 0x47c   : > { %1640 = vrot.lane.b32.xlu0 %v1331_v63, %s4768_s21 }
 0x49a   : > { %2010 = vadd.xlane.f32.xlu1 %v2009_v19 }
 0x49b   : > { %2013 = vadd.xlane.f32.xlu0 %v2012_v21 }
 0x4f2   : > { %v2005_v23 = vpop.xlane.xlu1 %2004 }
 0x4f3   : > { %v2008_v24 = vpop.xlane.xlu0 %2007  ;;  %4692 = vrcp.f32 %v2005_v23 }
 0x4f4   : > { %4694 = vrcp.f32 %v2008_v24 }
 0x4f6   : > { %v1644_v26 = vpop.permute.xlu1 %1643 }
 0x4f7   : > { %v1662_v27 = vcombine.low %v1638_v22, %v1644_v26  ;;  %v1663_v28 = vcombine.high %v1638_v22, %v1644_v26  ;;  %v1641_v29 = vpop.permute.xlu0 %1640 }
 0x4f8   : > { %v1646_v30 = vcombine.low %v1331_v63, %v1641_v29  ;;  %v1647_v31 = vcombine.high %v1331_v63, %v1641_v29 }
 0x4f9   : > { %v1670_v32 = vrot.slane %v1662_v27, %v5103_v47  ;;  %v1677_v33 = vrot.slane %v1663_v28, %v5103_v47 }
 0x4fa   : > { %v1654_v34 = vrot.slane %v1646_v30, %v5103_v47  ;;  %v1661_v35 = vrot.slane %v1647_v31, %v5103_v47 }
 0x4fc   : > { %v1678_v36 = vcombine.low %v1654_v34, %v1670_v32  ;;  %v1679_v38 = vcombine.high %v1654_v34, %v1670_v32  ;;  %v1694_v39 = vcombine.low %v1661_v35, %v1677_v33  ;;  %v1695_v40 = vcombine.high %v1661_v35, %v1677_v33 }
 0x4fd   : > { %v4693_v60 = vpop.eup %4692 }
 0x4fe   : > { %v1686_v41 = vrot.slane %v1678_v36, %v5106_v54  ;;  %v1693_v43 = vrot.slane %v1679_v38, %v5106_v54  ;;  %v1702_v44 = vrot.slane %v1694_v39, %v5106_v54  ;;  %v1709_v45 = vrot.slane %v1695_v40, %v5106_v54  ;;  %v4695_v63 = vpop.eup %4694 }
 0x4ff   : > { %v2019_v4 = vmul.f32 %v4693_v60, %v5181_v6  ;;  %v2020_v5 = vmul.f32 %v4695_v63, %v5183_v7 }
 0x500   : > { %v1714_v37 = vcombine.low %v1686_v41, %v1693_v43  ;;  %v4292_v46 = vcombine.high %v1686_v41, %v1693_v43  ;;  %v1730_v42 = vcombine.low %v1702_v44, %v1709_v45  ;;  %v4293_v48 = vcombine.high %v1702_v44, %v1709_v45 }
 0x501   : > { %v2023_v14 = vpack.c.bf16 %v2019_v4, %v2019_v4  ;;  %v2024_v15 = vpack.c.bf16 %v2020_v5, %v2020_v5 }
 0x502   : > { %v1721_v49 = vrot.slane %v1714_v37, %v5103_v47  ;;  %v1729_v50 = vrot.slane %v4292_v46, %v5103_v47  ;;  %v1737_v51 = vrot.slane %v1730_v42, %v5103_v47  ;;  %v1745_v52 = vrot.slane %v4293_v48, %v5103_v47 }
 0x504   : > { %v1746_v53 = vcombine.low %v1721_v49, %v1729_v50  ;;  %v1747_v55 = vcombine.high %v1721_v49, %v1729_v50  ;;  %v1762_v56 = vcombine.low %v1737_v51, %v1745_v52  ;;  %v1763_v57 = vcombine.high %v1737_v51, %v1745_v52 }
 0x506   : > { %v1754_v58 = vrot.slane %v1746_v53, %v5106_v54  ;;  %v1761_v59 = vrot.slane %v1747_v55, %v5106_v54  ;;  %v1770_v61 = vrot.slane %v1762_v56, %v5106_v54  ;;  %v1777_v62 = vrot.slane %v1763_v57, %v5106_v54  ;;  %v4668_v57 = vld [vmem:[%s5651_s22] sm:$0xff]  }
 0x508   : > { %v1778_v0 = vcombine.low %v1754_v58, %v1770_v61  ;;  %v1779_v1 = vcombine.high %v1754_v58, %v1770_v61  ;;  %v1780_v2 = vcombine.low %v1761_v59, %v1777_v62  ;;  %v1781_v3 = vcombine.high %v1761_v59, %v1777_v62 }
 0x50a   : > { %v1782_v8 = vpack.c.bf16 %v1778_v0, %v1778_v0  ;;  %v1783_v9 = vpack.c.bf16 %v1779_v1, %v1779_v1  ;;  %v1784_v12 = vpack.c.bf16 %v1780_v2, %v1780_v2  ;;  %v1785_v13 = vpack.c.bf16 %v1781_v3, %v1781_v3  ;;  %v4669_v2 = vld [vmem:[%s5651_s22 + $0x8] sm:$0xff]   ;;  %s5656_s22 = scalar_lea.vmem %s5567_s11, %s4937_s0 }
 0x50c   : > { %v2032_v10 = vsel %vm2030_vm9, %v1782_v8, 0  ;;  %v2078_v11 = vsel %vm2030_vm9, %v1783_v9, 0  ;;  %v2124_v6 = vsel %vm2030_vm9, %v1784_v12, 0  ;;  %v2170_v7 = vsel %vm2030_vm9, %v1785_v13, 0 }
 0x50d   : > { %4475 = vmatpush3.bf16.msra.mxu1 %v2032_v10  ;;  %4481 = vmatpush3.bf16.msra.mxu0 %v2078_v11 }
 0x50e   : > { %4486 = vmatprep.subr.bf16.mxu1 %v4764_v17  ;;  %4492 = vmatprep.subr.bf16.mxu0 %v4764_v17 }
 0x510   : > { %4477 = vmatmul.mubr.msk.bf16.vlgmr.msra.gmra.mrb[12].mxu1 %vm1786_vm3, %v2023_v14  ;;  %4483 = vmatmul.mubr.msk.bf16.vlgmr.msra.gmra.mrb[16].mxu0 %vm1786_vm3, %v2024_v15 }
 0x511   : > { %4487 = vmatpush3.bf16.msra.mxu1 %v2124_v6  ;;  %4493 = vmatpush3.bf16.msra.mxu0 %v2170_v7 }
 0x512   : > { %4488 = vmatprep.mubr.msk.bf16.mxu1 %vm4765_vm1, %v4764_v17  ;;  %4494 = vmatprep.mubr.msk.bf16.mxu0 %vm4765_vm1, %v4764_v17 }
 0x513   : > { %4498 = vmatprep.subr.bf16.mxu1 %v4764_v17  ;;  %4506 = vmatprep.subr.bf16.mxu0 %v4764_v17 }
 0x527   : > { %v2011_v19 = vpop.xlane.xlu1 %2010 }
 0x528   : > { %4696 = vrcp.f32 %v2011_v19  ;;  %v2014_v21 = vpop.xlane.xlu0 %2013 }
 0x529   : > { %4698 = vrcp.f32 %v2014_v21 }
 0x532   : > { %v4697_v22 = vpop.eup %4696 }
 0x533   : > { %v4699_v23 = vpop.eup %4698  ;;  %v2021_v24 = vmul.f32 %v4697_v22, %v5191_v16 }
 0x534   : > { %v2022_v26 = vmul.f32 %v4699_v23, %v5193_v18 }
 0x535   : > { %v2025_v27 = vpack.c.bf16 %v2021_v24, %v2021_v24 }
 0x536   : > { %v2026_v28 = vpack.c.bf16 %v2022_v26, %v2022_v26 }
 0x537   : > { %4489 = vmatmul.mubr.msk.bf16.vlgmr.msra.gmra.mrb[16].mxu1 %vm1786_vm3, %v2025_v27 }
 0x538   : > { %4495 = vmatmul.mubr.msk.bf16.vlgmr.msra.gmra.mrb[20].mxu0 %vm1786_vm3, %v2026_v28  ;;  %4502 = vmatprep.mubr.msk.bf16.mxu1 %vm4765_vm1, %v4764_v17 }
 0x539   : > { %4510 = vmatprep.mubr.msk.bf16.mxu0 %vm4765_vm1, %v4764_v17  ;;  %4499 = vmatpush3.bf16.msra.mxu1 %v4668_v57 }
 0x53a   : > { %4500 = vmatprep.subr.bf16.mxu1 %v4764_v17 }
 0x53d   : > { %4501 = vmatpush3.bf16.msra.mxu1 %v4669_v2 }
 0x53e   : > { %4514 = vmatprep.subr.bf16.mxu1 %v4764_v17 }
 0x5e3   : > { %v2068_v29 = vpop.f32.mrb[12].mxu1  ;;  %v2114_v30 = vpop.f32.mrb[16].mxu0 }
 0x5e4   : > { %v4478_v31 = vpop.f32.mrb[13].mxu1  ;;  %v4484_v32 = vpop.f32.mrb[17].mxu0 }
 0x5e5   : > { %v2071_v33 = vpop.f32.mrb[14].mxu1  ;;  %v2117_v16 = vpop.f32.mrb[18].mxu0  ;;  %v4304_v31 = vld [vmem:[%s5652_s28] ss:$0 sm:$0xff] }
 0x5e6   : > { %v4479_v34 = vpop.f32.mrb[15].mxu1  ;;  %v4485_v18 = vpop.f32.mrb[19].mxu0 }
 0x60a   : > { %v2160_v35 = vpop.f32.mrb[16].mxu1 }
 0x60b   : > { %v2212_v36 = vcombine.low %v2068_v29, %v2160_v35  ;;  %v2213_v38 = vcombine.high %v2068_v29, %v2160_v35  ;;  %v2206_v39 = vpop.f32.mrb[20].mxu0  ;;  %v4490_v40 = vpop.f32.mrb[17].mxu1 }
 0x60c   : > { %v2228_v41 = vcombine.low %v2114_v30, %v2206_v39  ;;  %v2229_v43 = vcombine.high %v2114_v30, %v2206_v39  ;;  %v4496_v44 = vpop.f32.mrb[21].mxu0  ;;  %v2163_v45 = vpop.f32.mrb[18].mxu1  ;;  %v4671_v39 = vld [vmem:[%s4991_s5 + $0x18] sm:$0xff]   ;;  %v1123_v40 = vld [vmem:[%s5654_s13] sm:$0xff]  ;;  %s5664_s13 = sld [smem:[#allocation28_spill]] }
 0x60d   : > { %v2220_v37 = vrot.slane %v2212_v36, %v5103_v47  ;;  %v2227_v46 = vrot.slane %v2213_v38, %v5103_v47  ;;  %v2209_v42 = vpop.f32.mrb[22].mxu0  ;;  %v4491_v48 = vpop.f32.mrb[19].mxu1  ;;  %v4670_v38 = vld [vmem:[%s4991_s5 + $0x10] sm:$0xff]  }
 0x60e   : > { %v2236_v49 = vrot.slane %v2228_v41, %v5103_v47  ;;  %v2243_v50 = vrot.slane %v2229_v43, %v5103_v47  ;;  %v4497_v51 = vpop.f32.mrb[23].mxu0  ;;  %v5283_v41 = vpack.c.bf16 %v1123_v40, %v1123_v40  ;;  %v4673_v42 = vld [vmem:[%s4991_s5 + $0x8] sm:$0xff]   ;;  %v4314_v48 = vld [vmem:[%s4996_s20 + $0x1] ss:$0 sm:$0xff] }
 0x610   : > { %v2244_v52 = vcombine.low %v2220_v37, %v2236_v49  ;;  %v2245_v53 = vcombine.high %v2220_v37, %v2236_v49  ;;  %v2260_v55 = vcombine.low %v2227_v46, %v2243_v50  ;;  %v2261_v56 = vcombine.high %v2227_v46, %v2243_v50  ;;  %v4672_v46 = vld [vmem:[%s4991_s5] sm:$0xff]  }
 0x611   : > { %4507 = vmatpush3.bf16.msra.mxu0 %v4672_v46 }
 0x612   : > { %v2252_v58 = vrot.slane %v2244_v52, %v5106_v54  ;;  %v2259_v59 = vrot.slane %v2245_v53, %v5106_v54  ;;  %v2268_v60 = vrot.slane %v2260_v55, %v5106_v54  ;;  %v2275_v61 = vrot.slane %v2261_v56, %v5106_v54  ;;  %4508 = vmatprep.subr.bf16.mxu0 %v4764_v17  ;;  %s5665_s7 = scalar_lea.vmem %s5664_s13, %s4937_s0 }
 0x614   : > { %v2280_v62 = vcombine.low %v2252_v58, %v2259_v59  ;;  %v4302_v63 = vcombine.high %v2252_v58, %v2259_v59  ;;  %v2296_v0 = vcombine.low %v2268_v60, %v2275_v61  ;;  %v4303_v1 = vcombine.high %v2268_v60, %v2275_v61  ;;  %v4308_v59 = vld [vmem:[%s5655_s4] ss:$0 sm:$0xff] }
 0x615   : > { %4509 = vmatpush3.bf16.msra.mxu0 %v4673_v42  ;;  %v4309_v61 = vld [vmem:[%s5656_s22] ss:$0 sm:$0xff] }
 0x616   : > { %v2287_v3 = vrot.slane %v2280_v62, %v5103_v47  ;;  %v2295_v4 = vrot.slane %v4302_v63, %v5103_v47  ;;  %v2303_v5 = vrot.slane %v2296_v0, %v5103_v47  ;;  %v2311_v8 = vrot.slane %v4303_v1, %v5103_v47  ;;  %4522 = vmatprep.subr.bf16.mxu0 %v4764_v17 }
 0x618   : > { %v2313_v9 = vcombine.high %v2287_v3, %v2295_v4  ;;  %v2329_v10 = vcombine.high %v2303_v5, %v2311_v8  ;;  %v2312_v11 = vcombine.low %v2287_v3, %v2295_v4  ;;  %v2328_v12 = vcombine.low %v2303_v5, %v2311_v8 }
 0x61a   : > { %v2327_v13 = vrot.slane %v2313_v9, %v5106_v54  ;;  %v2343_v14 = vrot.slane %v2329_v10, %v5106_v54  ;;  %v2320_v15 = vrot.slane %v2312_v11, %v5106_v54  ;;  %v2336_v6 = vrot.slane %v2328_v12, %v5106_v54 }
 0x61c   : > { %v2346_v7 = vcombine.low %v2327_v13, %v2343_v14  ;;  %v2345_v19 = vcombine.high %v2320_v15, %v2336_v6  ;;  %v2347_v21 = vcombine.high %v2327_v13, %v2343_v14  ;;  %v2344_v22 = vcombine.low %v2320_v15, %v2336_v6 }
 0x61e   : > { %2353 = vrot.lane.b32.xlu1 %v2346_v7, %s4773_s2  ;;  %2349 = vrot.lane.b32.xlu0 %v2345_v19, %s4774_s8 }
 0x622   : > { %2357 = vrot.lane.b32.xlu1 %v2347_v21, %s4775_s29 }
 0x690   : > { %v2354_v23 = vpop.permute.xlu1 %2353  ;;  %v2350_v24 = vpop.permute.xlu0 %2349 }
 0x691   : > { %v2360_v26 = vsel %vm1786_vm3, %v2344_v22, %v2350_v24 }
 0x692   : > { %v2362_v28 = vsel %vm2361_vm10, %v2360_v26, %v2354_v23 }
 0x694   : > { %v2358_v27 = vpop.permute.xlu1 %2357 }
 0x695   : > { %v2364_v29 = vsel %vm2363_vm11, %v2362_v28, %v2358_v27 }
 0x696   : > { %v2370_v30 = vpack.c.bf16 %v2364_v29, %v2364_v29  ;;  %v4674_v29 = vld [vmem:[%s4991_s5 + $0x20] sm:$0xff]  }
 0x698   : > { %4503 = vmatmul.mubr.msk.bf16.vlgmr.msra.gmra.mrb[20].mxu1 %vm1176_vm2, %v2370_v30 }
 0x699   : > { %4518 = vmatprep.mubr.msk.bf16.mxu1 %vm4765_vm1, %v4764_v17  ;;  %4515 = vmatpush3.bf16.msra.mxu1 %v4670_v38 }
 0x69a   : > { %4516 = vmatprep.subr.bf16.mxu1 %v4764_v17 }
 0x69d   : > { %4517 = vmatpush3.bf16.msra.mxu1 %v4671_v39 }
 0x69e   : > { %4530 = vmatprep.subr.bf16.mxu1 %v4764_v17 }
 0x6a0   : > { %4519 = vmatmul.mubr.msk.bf16.vlgmr.msra.gmra.mrb[24].mxu1 %vm1176_vm2, %v5283_v41 }
 0x6a1   : > { %4532 = vmatprep.mubr.msk.bf16.mxu1 %vm4765_vm1, %v4764_v17 }
 0x76b   : > { %v2426_v32 = vpop.f32.mrb[20].mxu1 }
 0x76c   : > { %v2427_v33 = vadd.f32 %v4304_v31, %v2426_v32  ;;  %v4504_v16 = vpop.f32.mrb[21].mxu1 }
 0x76d   : > { %v2429_v34 = vpop.f32.mrb[22].mxu1  ;;  %v4675_v16 = vld [vmem:[%s4991_s5 + $0x28] sm:$0xff]   ;;  %s5657_s5 = sld [smem:[#allocation11_spill]] }
 0x76e   : > { %v4505_v18 = vpop.f32.mrb[23].mxu1  ;;  %v2432_v35 = vadd.f32 %v2427_v33, %v5068_v20 }
 0x770   : > { %v2435_v36 = vsel %vm1176_vm2, %v2432_v35, 0.0 }
 0x771   : > { %2436 = vadd.xlane.f32.xlu0 %v2435_v36 }
 0x773   : > { %v2596_v49 = vpop.f32.mrb[24].mxu1 }
 0x774   : > { %v2597_v50 = vadd.f32 %v4314_v48, %v2596_v49  ;;  %v4520_v51 = vpop.f32.mrb[25].mxu1 }
 0x775   : > { %v2599_v52 = vpop.f32.mrb[26].mxu1 }
 0x776   : > { %v4521_v53 = vpop.f32.mrb[27].mxu1 }
 0x787   : > { %2811 = vrot.lane.b32.xlu0 %v2597_v50, %s4767_s1 }
 0x78b   : > { %2817 = vrot.lane.b32.xlu0 %v2597_v50, %s4766_s27 }
 0x7fe   : > { %v2437_v20 = vpop.xlane.xlu0 %2436 }
 0x7ff   : > { %v2439_v43 = vmul.f32 0.03125, %v2437_v20 }
 0x801   : > { %v2440_v44 = vsub.f32 %v2432_v35, %v2439_v43 }
 0x802   : > { %v2812_v1 = vpop.permute.xlu0 %2811 }
 0x803   : > { %v2441_v45 = vmul.f32 %v2440_v44, %v2440_v44 }
 0x805   : > { %v2442_v37 = vsel %vm1176_vm2, %v2441_v45, 0.0 }
 0x806   : > { %2443 = vadd.xlane.f32.xlu1 %v2442_v37  ;;  %v2818_v3 = vpop.permute.xlu0 %2817 }
 0x807   : > { %v2836_v8 = vcombine.low %v2812_v1, %v2818_v3  ;;  %v2837_v9 = vcombine.high %v2812_v1, %v2818_v3 }
 0x809   : > { %v2844_v12 = vrot.slane %v2836_v8, %v5103_v47  ;;  %v2851_v13 = vrot.slane %v2837_v9, %v5103_v47 }
 0x817   : > { %2814 = vrot.lane.b32.xlu1 %v2597_v50, %s4768_s21 }
 0x893   : > { %v2444_v55 = vpop.xlane.xlu1 %2443 }
 0x894   : > { %v2445_v56 = vmul.f32 0.03125, %v2444_v55 }
 0x896   : > { %v2446_v57 = vadd.f32 1e-05, %v2445_v56 }
 0x897   : > { %v2815_v2 = vpop.permute.xlu1 %2814 }
 0x898   : > { %4700 = vrsqrt.f32 %v2446_v57  ;;  %v2820_v4 = vcombine.low %v2597_v50, %v2815_v2  ;;  %v2821_v5 = vcombine.high %v2597_v50, %v2815_v2 }
 0x89a   : > { %v2828_v10 = vrot.slane %v2820_v4, %v5103_v47  ;;  %v2835_v11 = vrot.slane %v2821_v5, %v5103_v47 }
 0x89c   : > { %v2852_v14 = vcombine.low %v2828_v10, %v2844_v12  ;;  %v2853_v15 = vcombine.high %v2828_v10, %v2844_v12  ;;  %v2868_v6 = vcombine.low %v2835_v11, %v2851_v13  ;;  %v2869_v7 = vcombine.high %v2835_v11, %v2851_v13 }
 0x89e   : > { %v2860_v19 = vrot.slane %v2852_v14, %v5106_v54  ;;  %v2867_v21 = vrot.slane %v2853_v15, %v5106_v54  ;;  %v2876_v22 = vrot.slane %v2868_v6, %v5106_v54  ;;  %v2883_v23 = vrot.slane %v2869_v7, %v5106_v54 }
 0x8a0   : > { %v2888_v24 = vcombine.low %v2860_v19, %v2867_v21  ;;  %v4324_v26 = vcombine.high %v2860_v19, %v2867_v21  ;;  %v2904_v27 = vcombine.low %v2876_v22, %v2883_v23  ;;  %v4325_v28 = vcombine.high %v2876_v22, %v2883_v23 }
 0x8a2   : > { %v4701_v58 = vpop.eup %4700  ;;  %v2895_v30 = vrot.slane %v2888_v24, %v5103_v47  ;;  %v2903_v31 = vrot.slane %v4324_v26, %v5103_v47  ;;  %v2911_v32 = vrot.slane %v2904_v27, %v5103_v47  ;;  %v2919_v33 = vrot.slane %v4325_v28, %v5103_v47 }
 0x8a3   : > { %v2448_v60 = vmul.f32 %v4701_v58, %v2440_v44 }
 0x8a4   : > { %v2920_v34 = vcombine.low %v2895_v30, %v2903_v31  ;;  %v2936_v18 = vcombine.low %v2911_v32, %v2919_v33  ;;  %v2921_v35 = vcombine.high %v2895_v30, %v2903_v31  ;;  %v2937_v36 = vcombine.high %v2911_v32, %v2919_v33 }
 0x8a5   : > { %v2455_v62 = vmul.f32 %v4308_v59, %v2448_v60 }
 0x8a6   : > { %v2928_v38 = vrot.slane %v2920_v34, %v5106_v54  ;;  %v2944_v39 = vrot.slane %v2936_v18, %v5106_v54  ;;  %v2935_v40 = vrot.slane %v2921_v35, %v5106_v54  ;;  %v2951_v20 = vrot.slane %v2937_v36, %v5106_v54 }
 0x8a7   : > { %v5309_v63 = vadd.f32 %v4309_v61, %v2455_v62 }
 0x8a8   : > { %v2952_v43 = vcombine.low %v2928_v38, %v2944_v39  ;;  %v2953_v44 = vcombine.high %v2928_v38, %v2944_v39  ;;  %v5340_v45 = vcombine.low %v2935_v40, %v2951_v20  ;;  %v5342_v37 = vcombine.high %v2935_v40, %v2951_v20 }
 0x8a9   : > { %v2478_v0 = vpack.c.bf16 %v5309_v63, %v5309_v63 }
 0x8aa   : > { %v2956_v46 = vpack.c.bf16 %v2952_v43, %v2952_v43  ;;  %v2957_v42 = vpack.c.bf16 %v2953_v44, %v2953_v44  ;;  %v2958_v35 = vpack.c.bf16 %v5340_v45, %v5340_v45  ;;  %v2959_v36 = vpack.c.bf16 %v5342_v37, %v5342_v37 }
 0x8ab   : > { %4511 = vmatmul.mubr.msk.bf16.vlgmr.msra.gmra.mrb[24].mxu0 %vm1176_vm2, %v2478_v0 }
 0x8ac   : > { %4526 = vmatprep.mubr.msk.bf16.mxu0 %vm4765_vm1, %v4764_v17  ;;  %4523 = vmatpush3.bf16.msra.mxu0 %v4674_v29  ;;  %v3114_v48 = vsel %vm1786_vm3, %v2956_v46, 0  ;;  %v3160_v49 = vsel %vm1786_vm3, %v2957_v42, 0  ;;  %v3206_v43 = vsel %vm1786_vm3, %v2958_v35, 0  ;;  %v3252_v44 = vsel %vm1786_vm3, %v2959_v36, 0 }
 0x8ad   : > { %4524 = vmatprep.subr.bf16.mxu0 %v4764_v17  ;;  %4531 = vmatpush3.bf16.xpose.msra.mxu1 %v3114_v48 }
 0x8ae   : > { %4542 = vmatprep.subr.bf16.mxu1 %v4764_v17 }
 0x8b0   : > { %4525 = vmatpush3.bf16.msra.mxu0 %v4675_v16 }
 0x8b1   : > { %4536 = vmatprep.subr.bf16.mxu0 %v4764_v17 }
 0x8b3   : > { %4527 = vmatmul.mubr.msk.bf16.vlgmr.msra.gmra.mrb[28].mxu0 %vm1176_vm2, %v5283_v41  ;;  %v4310_v41 = vld [vmem:[%s4996_s20] ss:$0 sm:$0xff] }
 0x8b4   : > { %4538 = vmatprep.mubr.msk.bf16.mxu0 %vm4765_vm1, %v4764_v17 }
 0x8b9   : > { %4537 = vmatpush3.bf16.xpose.msra.mxu0 %v3160_v49 }
 0x8ba   : > { %4548 = vmatprep.subr.bf16.mxu0 %v4764_v17 }
 0x97e   : > { %v2534_v50 = vpop.f32.mrb[24].mxu0 }
 0x97f   : > { %v2535_v51 = vadd.f32 %v4310_v41, %v2534_v50  ;;  %v4512_v52 = vpop.f32.mrb[25].mxu0 }
 0x980   : > { %v2537_v53 = vpop.f32.mrb[26].mxu0 }
 0x981   : > { %2664 = vrot.lane.b32.xlu0 %v2535_v51, %s4768_s21  ;;  %2661 = vrot.lane.b32.xlu1 %v2535_v51, %s4767_s1  ;;  %v4513_v55 = vpop.f32.mrb[27].mxu0 }
 0x985   : > { %2667 = vrot.lane.b32.xlu1 %v2535_v51, %s4766_s27 }
 0x986   : > { %v5352_v56 = vpop.f32.mrb[28].mxu0 }
 0x987   : > { %v4528_v57 = vpop.f32.mrb[29].mxu0 }
 0x988   : > { %v2657_v58 = vpop.f32.mrb[30].mxu0 }
 0x989   : > { %v4529_v59 = vpop.f32.mrb[31].mxu0 }
 0x9f3   : > { %v2665_v60 = vpop.permute.xlu0 %2664  ;;  %v2662_v61 = vpop.permute.xlu1 %2661 }
 0x9f4   : > { %v2670_v62 = vcombine.low %v2535_v51, %v2665_v60  ;;  %v2671_v0 = vcombine.high %v2535_v51, %v2665_v60 }
 0x9f6   : > { %v2678_v4 = vrot.slane %v2670_v62, %v5103_v47  ;;  %v2685_v5 = vrot.slane %v2671_v0, %v5103_v47 }
 0x9f7   : > { %v2668_v1 = vpop.permute.xlu1 %2667 }
 0x9f8   : > { %v2686_v2 = vcombine.low %v2662_v61, %v2668_v1  ;;  %v2687_v3 = vcombine.high %v2662_v61, %v2668_v1 }
 0x9fa   : > { %v2694_v8 = vrot.slane %v2686_v2, %v5103_v47  ;;  %v2701_v9 = vrot.slane %v2687_v3, %v5103_v47 }
 0x9fc   : > { %v2702_v10 = vcombine.low %v2678_v4, %v2694_v8  ;;  %v2703_v11 = vcombine.high %v2678_v4, %v2694_v8  ;;  %v2718_v12 = vcombine.low %v2685_v5, %v2701_v9  ;;  %v2719_v13 = vcombine.high %v2685_v5, %v2701_v9 }
 0x9fe   : > { %v2710_v14 = vrot.slane %v2702_v10, %v5106_v54  ;;  %v2717_v15 = vrot.slane %v2703_v11, %v5106_v54  ;;  %v2726_v6 = vrot.slane %v2718_v12, %v5106_v54  ;;  %v2733_v7 = vrot.slane %v2719_v13, %v5106_v54 }
 0xa00   : > { %v2738_v19 = vcombine.low %v2710_v14, %v2717_v15  ;;  %v4322_v21 = vcombine.high %v2710_v14, %v2717_v15  ;;  %v2754_v22 = vcombine.low %v2726_v6, %v2733_v7  ;;  %v4323_v23 = vcombine.high %v2726_v6, %v2733_v7  ;;  %v4318_v6 = vld [vmem:[%s4996_s20 + $0x2] ss:$0 sm:$0xff] }
 0xa01   : > { %v2655_v7 = vadd.f32 %v4318_v6, %v5352_v56 }
 0xa02   : > { %v2745_v24 = vrot.slane %v2738_v19, %v5103_v47  ;;  %v2753_v26 = vrot.slane %v4322_v21, %v5103_v47  ;;  %v2761_v27 = vrot.slane %v2754_v22, %v5103_v47  ;;  %v2769_v28 = vrot.slane %v4323_v23, %v5103_v47 }
 0xa04   : > { %v2770_v29 = vcombine.low %v2745_v24, %v2753_v26  ;;  %v2786_v30 = vcombine.low %v2761_v27, %v2769_v28  ;;  %v2771_v31 = vcombine.high %v2745_v24, %v2753_v26  ;;  %v2787_v32 = vcombine.high %v2761_v27, %v2769_v28 }
 0xa06   : > { %v2778_v33 = vrot.slane %v2770_v29, %v5106_v54  ;;  %v2794_v16 = vrot.slane %v2786_v30, %v5106_v54  ;;  %v2785_v40 = vrot.slane %v2771_v31, %v5106_v54  ;;  %v2801_v20 = vrot.slane %v2787_v32, %v5106_v54 }
 0xa08   : > { %v2802_v34 = vcombine.low %v2778_v33, %v2794_v16  ;;  %v2803_v18 = vcombine.high %v2778_v33, %v2794_v16  ;;  %v2804_v45 = vcombine.low %v2785_v40, %v2801_v20  ;;  %v2805_v37 = vcombine.high %v2785_v40, %v2801_v20 }
 0xa0a   : > { %v2806_v38 = vpack.c.bf16 %v2802_v34, %v2802_v34  ;;  %v2807_v39 = vpack.c.bf16 %v2803_v18, %v2803_v18  ;;  %v2808_v46 = vpack.c.bf16 %v2804_v45, %v2804_v45  ;;  %v2809_v42 = vpack.c.bf16 %v2805_v37, %v2805_v37 }
 0xa0c   : > { %4533 = vmatmul.mubr.msk.bf16.vlgmr.msra.gmra.mrb[28].mxu1 %vm1786_vm3, %v2806_v38  ;;  %4539 = vmatmul.mubr.msk.bf16.vlgmr.msra.gmra.mrb[32].mxu0 %vm1786_vm3, %v2807_v39 }
 0xa0d   : > { %4543 = vmatpush3.bf16.xpose.msra.mxu1 %v3206_v43  ;;  %4549 = vmatpush3.bf16.xpose.msra.mxu0 %v3252_v44 }
 0xa0e   : > { %4544 = vmatprep.mubr.msk.bf16.mxu1 %vm4765_vm1, %v4764_v17  ;;  %4550 = vmatprep.mubr.msk.bf16.mxu0 %vm4765_vm1, %v4764_v17 }
 0xa0f   : > { %4554 = vmatprep.subr.bf16.mxu1 %v4764_v17  ;;  %4560 = vmatprep.subr.bf16.mxu0 %v4764_v17 }
 0xa14   : > { %4545 = vmatmul.mubr.msk.bf16.vlgmr.msra.gmra.mrb[32].mxu1 %vm1786_vm3, %v2808_v46  ;;  %4551 = vmatmul.mubr.msk.bf16.vlgmr.msra.gmra.mrb[36].mxu0 %vm1786_vm3, %v2809_v42 }
 0xa15   : > { %4556 = vmatprep.mubr.msk.bf16.mxu1 %vm4765_vm1, %v4764_v17  ;;  %4562 = vmatprep.mubr.msk.bf16.mxu0 %vm4765_vm1, %v4764_v17 }
 0xadf   : > { %v3150_v48 = vpop.f32.mrb[28].mxu1  ;;  %v3196_v49 = vpop.f32.mrb[32].mxu0 }
 0xae0   : > { %v3294_v41 = vmul.f32 0.35355338, %v3150_v48  ;;  %v3295_v50 = vmul.f32 0.35355338, %v3196_v49  ;;  %v4534_v51 = vpop.f32.mrb[29].mxu1  ;;  %v4540_v52 = vpop.f32.mrb[33].mxu0 }
 0xae1   : > { %v3153_v53 = vpop.f32.mrb[30].mxu1  ;;  %v3199_v55 = vpop.f32.mrb[34].mxu0 }
 0xae2   : > { %v4535_v57 = vpop.f32.mrb[31].mxu1  ;;  %v4541_v58 = vpop.f32.mrb[35].mxu0  ;;  %v3304_v59 = vadd.f32 %v5166_v25, %v3294_v41  ;;  %v3305_v60 = vadd.f32 %v5166_v25, %v3295_v50 }
 0xae4   : > { %v3308_v61 = vsel %vm1786_vm3, %v3304_v59, -inf  ;;  %v3311_v62 = vsel %vm1786_vm3, %v3305_v60, -inf }
 0xae5   : > { %3309 = vmax.xlane.f32.xlu0 %v3308_v61  ;;  %3312 = vmax.xlane.f32.xlu1 %v3311_v62 }
 0xae7   : > { %v3242_v0 = vpop.f32.mrb[32].mxu1  ;;  %v3288_v1 = vpop.f32.mrb[36].mxu0 }
 0xae8   : > { %v3296_v2 = vmul.f32 0.35355338, %v3242_v0  ;;  %v3297_v3 = vmul.f32 0.35355338, %v3288_v1  ;;  %v4546_v4 = vpop.f32.mrb[33].mxu1  ;;  %v4552_v5 = vpop.f32.mrb[37].mxu0 }
 0xae9   : > { %v3245_v8 = vpop.f32.mrb[34].mxu1  ;;  %v3291_v9 = vpop.f32.mrb[38].mxu0 }
 0xaea   : > { %v4547_v10 = vpop.f32.mrb[35].mxu1  ;;  %v4553_v11 = vpop.f32.mrb[39].mxu0  ;;  %v3306_v12 = vadd.f32 %v5166_v25, %v3296_v2  ;;  %v3307_v13 = vadd.f32 %v5166_v25, %v3297_v3 }
 0xaec   : > { %v3314_v14 = vsel %vm1786_vm3, %v3306_v12, -inf  ;;  %v3317_v15 = vsel %vm1786_vm3, %v3307_v13, -inf }
 0xaed   : > { %3315 = vmax.xlane.f32.xlu0 %v3314_v14 }
 0xaf1   : > { %3318 = vmax.xlane.f32.xlu0 %v3317_v15 }
 0xaf6   : > { %2961 = vrot.lane.b32.xlu1 %v2655_v7, %s4767_s1  ;;  %s5658_s1 = sld [smem:[#allocation24_spill]] }
 0xb72   : > { %v3310_v19 = vpop.xlane.xlu0 %3309  ;;  %v3313_v21 = vpop.xlane.xlu1 %3312 }
 0xb73   : > { %v3320_v22 = vsub.f32 %v3304_v59, %v3310_v19  ;;  %v3321_v23 = vsub.f32 %v3305_v60, %v3313_v21 }
 0xb75   : > { %v3324_v24 = vmul.f32 1.442695, %v3320_v22  ;;  %v3326_v26 = vmul.f32 1.442695, %v3321_v23 }
 0xb76   : > { %v2962_v38 = vpop.permute.xlu1 %2961 }
 0xb77   : > { %4702 = vpow2.f32 %v3324_v24 }
 0xb78   : > { %4704 = vpow2.f32 %v3326_v26 }
 0xb7a   : > { %v3316_v29 = vpop.xlane.xlu0 %3315 }
 0xb7b   : > { %v3322_v31 = vsub.f32 %v3306_v12, %v3316_v29 }
 0xb7d   : > { %v3328_v33 = vmul.f32 1.442695, %v3322_v31 }
 0xb7e   : > { %v3319_v30 = vpop.xlane.xlu0 %3318 }
 0xb7f   : > { %v3323_v32 = vsub.f32 %v3307_v13, %v3319_v30  ;;  %4706 = vpow2.f32 %v3328_v33 }
 0xb81   : > { %v5401_v25 = vpop.eup %4702  ;;  %v3330_v16 = vmul.f32 1.442695, %v3323_v32 }
 0xb82   : > { %v5403_v27 = vpop.eup %4704  ;;  %v3332_v28 = vsel %vm1786_vm3, %v5401_v25, 0.0 }
 0xb83   : > { %3333 = vadd.xlane.f32.xlu1 %v3332_v28  ;;  %v3335_v56 = vsel %vm1786_vm3, %v5403_v27, 0.0  ;;  %4708 = vpow2.f32 %v3330_v16 }
 0xb84   : > { %3336 = vadd.xlane.f32.xlu0 %v3335_v56 }
 0xb89   : > { %v5411_v34 = vpop.eup %4706 }
 0xb8a   : > { %v3338_v35 = vsel %vm1786_vm3, %v5411_v34, 0.0 }
 0xb8d   : > { %v5413_v18 = vpop.eup %4708 }
 0xb8e   : > { %v3341_v36 = vsel %vm1786_vm3, %v5413_v18, 0.0 }
 0xb94   : > { %2967 = vrot.lane.b32.xlu1 %v2655_v7, %s4766_s27 }
 0xb9a   : > { %2964 = vrot.lane.b32.xlu0 %v2655_v7, %s4768_s21  ;;  %s5659_s21 = scalar_lea.vmem %s5658_s1, %s4937_s0 }
 0xbb8   : > { %3339 = vadd.xlane.f32.xlu1 %v3338_v35 }
 0xbb9   : > { %3342 = vadd.xlane.f32.xlu0 %v3341_v36 }
 0xc10   : > { %v3334_v39 = vpop.xlane.xlu1 %3333 }
 0xc11   : > { %v3337_v40 = vpop.xlane.xlu0 %3336  ;;  %4710 = vrcp.f32 %v3334_v39 }
 0xc12   : > { %4712 = vrcp.f32 %v3337_v40 }
 0xc14   : > { %v2968_v20 = vpop.permute.xlu1 %2967 }
 0xc15   : > { %v2986_v43 = vcombine.low %v2962_v38, %v2968_v20  ;;  %v2987_v44 = vcombine.high %v2962_v38, %v2968_v20  ;;  %v2965_v45 = vpop.permute.xlu0 %2964 }
 0xc16   : > { %v2970_v37 = vcombine.low %v2655_v7, %v2965_v45  ;;  %v2971_v46 = vcombine.high %v2655_v7, %v2965_v45 }
 0xc17   : > { %v2994_v42 = vrot.slane %v2986_v43, %v5103_v47  ;;  %v3001_v48 = vrot.slane %v2987_v44, %v5103_v47 }
 0xc18   : > { %v2978_v49 = vrot.slane %v2970_v37, %v5103_v47  ;;  %v2985_v41 = vrot.slane %v2971_v46, %v5103_v47 }
 0xc1a   : > { %v3002_v50 = vcombine.low %v2978_v49, %v2994_v42  ;;  %v3003_v51 = vcombine.high %v2978_v49, %v2994_v42  ;;  %v3018_v52 = vcombine.low %v2985_v41, %v3001_v48  ;;  %v3019_v53 = vcombine.high %v2985_v41, %v3001_v48 }
 0xc1b   : > { %v4711_v13 = vpop.eup %4710 }
 0xc1c   : > { %v3010_v55 = vrot.slane %v3002_v50, %v5106_v54  ;;  %v3017_v57 = vrot.slane %v3003_v51, %v5106_v54  ;;  %v3026_v58 = vrot.slane %v3018_v52, %v5106_v54  ;;  %v3033_v59 = vrot.slane %v3019_v53, %v5106_v54  ;;  %v4713_v6 = vpop.eup %4712 }
 0xc1d   : > { %v3348_v23 = vmul.f32 %v4711_v13, %v5401_v25  ;;  %v3349_v24 = vmul.f32 %v4713_v6, %v5403_v27 }
 0xc1e   : > { %v3038_v60 = vcombine.low %v3010_v55, %v3017_v57  ;;  %v4326_v61 = vcombine.high %v3010_v55, %v3017_v57  ;;  %v3054_v62 = vcombine.low %v3026_v58, %v3033_v59  ;;  %v4327_v0 = vcombine.high %v3026_v58, %v3033_v59 }
 0xc1f   : > { %v3352_v32 = vpack.c.bf16 %v3348_v23, %v3348_v23  ;;  %v3353_v33 = vpack.c.bf16 %v3349_v24, %v3349_v24 }
 0xc20   : > { %v3045_v1 = vrot.slane %v3038_v60, %v5103_v47  ;;  %v3053_v2 = vrot.slane %v4326_v61, %v5103_v47  ;;  %v3061_v3 = vrot.slane %v3054_v62, %v5103_v47  ;;  %v3069_v4 = vrot.slane %v4327_v0, %v5103_v47 }
 0xc22   : > { %v3070_v5 = vcombine.low %v3045_v1, %v3053_v2  ;;  %v3071_v8 = vcombine.high %v3045_v1, %v3053_v2  ;;  %v3086_v9 = vcombine.low %v3061_v3, %v3069_v4  ;;  %v3087_v10 = vcombine.high %v3061_v3, %v3069_v4 }
 0xc24   : > { %v3078_v11 = vrot.slane %v3070_v5, %v5106_v54  ;;  %v3085_v12 = vrot.slane %v3071_v8, %v5106_v54  ;;  %v3094_v14 = vrot.slane %v3086_v9, %v5106_v54  ;;  %v3101_v15 = vrot.slane %v3087_v10, %v5106_v54  ;;  %v4676_v9 = vld [vmem:[%s5657_s5] sm:$0xff]  }
 0xc26   : > { %v3102_v7 = vcombine.low %v3078_v11, %v3094_v14  ;;  %v3103_v19 = vcombine.high %v3078_v11, %v3094_v14  ;;  %v3104_v21 = vcombine.low %v3085_v12, %v3101_v15  ;;  %v3105_v22 = vcombine.high %v3085_v12, %v3101_v15 }
 0xc28   : > { %v3106_v26 = vpack.c.bf16 %v3102_v7, %v3102_v7  ;;  %v3107_v28 = vpack.c.bf16 %v3103_v19, %v3103_v19  ;;  %v3108_v30 = vpack.c.bf16 %v3104_v21, %v3104_v21  ;;  %v3109_v31 = vpack.c.bf16 %v3105_v22, %v3105_v22  ;;  %v4677_v19 = vld [vmem:[%s5657_s5 + $0x8] sm:$0xff]  }
 0xc2a   : > { %v3360_v56 = vsel %vm2030_vm9, %v3106_v26, 0  ;;  %v3406_v29 = vsel %vm2030_vm9, %v3107_v28, 0  ;;  %v3452_v25 = vsel %vm2030_vm9, %v3108_v30, 0  ;;  %v3498_v27 = vsel %vm2030_vm9, %v3109_v31, 0 }
 0xc2b   : > { %4555 = vmatpush3.bf16.msra.mxu1 %v3360_v56  ;;  %4561 = vmatpush3.bf16.msra.mxu0 %v3406_v29 }
 0xc2c   : > { %4566 = vmatprep.subr.bf16.mxu1 %v4764_v17  ;;  %4572 = vmatprep.subr.bf16.mxu0 %v4764_v17 }
 0xc2e   : > { %4557 = vmatmul.mubr.msk.bf16.vlgmr.msra.gmra.mrb[36].mxu1 %vm1786_vm3, %v3352_v32  ;;  %4563 = vmatmul.mubr.msk.bf16.vlgmr.msra.gmra.mrb[40].mxu0 %vm1786_vm3, %v3353_v33 }
 0xc2f   : > { %4567 = vmatpush3.bf16.msra.mxu1 %v3452_v25  ;;  %4573 = vmatpush3.bf16.msra.mxu0 %v3498_v27 }
 0xc30   : > { %4568 = vmatprep.mubr.msk.bf16.mxu1 %vm4765_vm1, %v4764_v17  ;;  %4574 = vmatprep.mubr.msk.bf16.mxu0 %vm4765_vm1, %v4764_v17 }
 0xc31   : > { %4578 = vmatprep.subr.bf16.mxu1 %v4764_v17  ;;  %4586 = vmatprep.subr.bf16.mxu0 %v4764_v17 }
 0xc45   : > { %v3340_v16 = vpop.xlane.xlu1 %3339 }
 0xc46   : > { %4714 = vrcp.f32 %v3340_v16  ;;  %v3343_v35 = vpop.xlane.xlu0 %3342 }
 0xc47   : > { %4716 = vrcp.f32 %v3343_v35 }
 0xc50   : > { %v4715_v36 = vpop.eup %4714 }
 0xc51   : > { %v4717_v38 = vpop.eup %4716  ;;  %v3350_v39 = vmul.f32 %v4715_v36, %v5411_v34 }
 0xc52   : > { %v3351_v40 = vmul.f32 %v4717_v38, %v5413_v18 }
 0xc53   : > { %v3354_v20 = vpack.c.bf16 %v3350_v39, %v3350_v39 }
 0xc54   : > { %v3355_v43 = vpack.c.bf16 %v3351_v40, %v3351_v40 }
 0xc55   : > { %4569 = vmatmul.mubr.msk.bf16.vlgmr.msra.gmra.mrb[40].mxu1 %vm1786_vm3, %v3354_v20 }
 0xc56   : > { %4575 = vmatmul.mubr.msk.bf16.vlgmr.msra.gmra.mrb[44].mxu0 %vm1786_vm3, %v3355_v43  ;;  %4582 = vmatprep.mubr.msk.bf16.mxu1 %vm4765_vm1, %v4764_v17  ;;  %v4338_v43 = vld [vmem:[%s5659_s21] ss:$0 sm:$0xff] }
 0xc57   : > { %4590 = vmatprep.mubr.msk.bf16.mxu0 %vm4765_vm1, %v4764_v17  ;;  %4579 = vmatpush3.bf16.msra.mxu1 %v4676_v9 }
 0xc58   : > { %4580 = vmatprep.subr.bf16.mxu1 %v4764_v17 }
 0xc5b   : > { %4581 = vmatpush3.bf16.msra.mxu1 %v4677_v19 }
 0xc5c   : > { %4594 = vmatprep.subr.bf16.mxu1 %v4764_v17 }
 0xd01   : > { %v3396_v44 = vpop.f32.mrb[36].mxu1  ;;  %v3442_v45 = vpop.f32.mrb[40].mxu0 }
 0xd02   : > { %v4558_v37 = vpop.f32.mrb[37].mxu1  ;;  %v4564_v46 = vpop.f32.mrb[41].mxu0 }
 0xd03   : > { %v3399_v42 = vpop.f32.mrb[38].mxu1  ;;  %v3445_v34 = vpop.f32.mrb[42].mxu0 }
 0xd04   : > { %v4559_v48 = vpop.f32.mrb[39].mxu1  ;;  %v4565_v18 = vpop.f32.mrb[43].mxu0 }
 0xd28   : > { %v3488_v49 = vpop.f32.mrb[40].mxu1 }
 0xd29   : > { %v3540_v41 = vcombine.low %v3396_v44, %v3488_v49  ;;  %v3541_v50 = vcombine.high %v3396_v44, %v3488_v49  ;;  %v3534_v51 = vpop.f32.mrb[44].mxu0  ;;  %v4570_v52 = vpop.f32.mrb[41].mxu1 }
 0xd2a   : > { %v3556_v53 = vcombine.low %v3442_v45, %v3534_v51  ;;  %v3557_v55 = vcombine.high %v3442_v45, %v3534_v51  ;;  %v4576_v57 = vpop.f32.mrb[45].mxu0  ;;  %v3491_v58 = vpop.f32.mrb[42].mxu1  ;;  %v4678_v52 = vld [vmem:[%s5018_s24] sm:$0xff]  }
 0xd2b   : > { %v3548_v59 = vrot.slane %v3540_v41, %v5103_v47  ;;  %v3555_v60 = vrot.slane %v3541_v50, %v5103_v47  ;;  %v3537_v61 = vpop.f32.mrb[46].mxu0  ;;  %v4571_v62 = vpop.f32.mrb[43].mxu1  ;;  %4587 = vmatpush3.bf16.msra.mxu0 %v4678_v52 }
 0xd2c   : > { %v3564_v0 = vrot.slane %v3556_v53, %v5103_v47  ;;  %v3571_v1 = vrot.slane %v3557_v55, %v5103_v47  ;;  %v4577_v2 = vpop.f32.mrb[47].mxu0  ;;  %v4679_v53 = vld [vmem:[%s5018_s24 + $0x8] sm:$0xff]   ;;  %4588 = vmatprep.subr.bf16.mxu0 %v4764_v17  ;;  %s5662_s24 = sld [smem:[#allocation26_spill]] }
 0xd2d   : > { %v4680_v2 = vld [vmem:[%s5032_s16] sm:$0xff]  }
 0xd2e   : > { %v3572_v3 = vcombine.low %v3548_v59, %v3564_v0  ;;  %v3573_v4 = vcombine.high %v3548_v59, %v3564_v0  ;;  %v3588_v5 = vcombine.low %v3555_v60, %v3571_v1  ;;  %v3589_v8 = vcombine.high %v3555_v60, %v3571_v1 }
 0xd2f   : > { %4589 = vmatpush3.bf16.msra.mxu0 %v4679_v53 }
 0xd30   : > { %v3580_v10 = vrot.slane %v3572_v3, %v5106_v54  ;;  %v3587_v11 = vrot.slane %v3573_v4, %v5106_v54  ;;  %v3596_v12 = vrot.slane %v3588_v5, %v5106_v54  ;;  %v3603_v13 = vrot.slane %v3589_v8, %v5106_v54  ;;  %v4681_v3 = vld [vmem:[%s5032_s16 + $0x8] sm:$0xff]   ;;  %v4682_v4 = vld [vmem:[%s5032_s16 + $0x10] sm:$0xff]   ;;  %v4683_v5 = vld [vmem:[%s5032_s16 + $0x18] sm:$0xff]  }
 0xd31   : > { %v4344_v8 = vld [vmem:[%s5665_s7] ss:$0 sm:$0xff] }
 0xd32   : > { %v3608_v14 = vcombine.low %v3580_v10, %v3587_v11  ;;  %v4336_v15 = vcombine.high %v3580_v10, %v3587_v11  ;;  %v3624_v6 = vcombine.low %v3596_v12, %v3603_v13  ;;  %v4337_v7 = vcombine.high %v3596_v12, %v3603_v13  ;;  %s5663_s3 = scalar_lea.vmem %s5662_s24, %s4937_s0 }
 0xd33   : > { %v4343_v61 = vld [vmem:[%s5663_s3] ss:$0 sm:$0xff] }
 0xd34   : > { %v3615_v21 = vrot.slane %v3608_v14, %v5103_v47  ;;  %v3623_v22 = vrot.slane %v4336_v15, %v5103_v47  ;;  %v3631_v23 = vrot.slane %v3624_v6, %v5103_v47  ;;  %v3639_v24 = vrot.slane %v4337_v7, %v5103_v47 }
 0xd36   : > { %v3641_v26 = vcombine.high %v3615_v21, %v3623_v22  ;;  %v3657_v28 = vcombine.high %v3631_v23, %v3639_v24  ;;  %v3640_v56 = vcombine.low %v3615_v21, %v3623_v22  ;;  %v3656_v29 = vcombine.low %v3631_v23, %v3639_v24  ;;  %v4348_v21 = vld [vmem:[%s1073_s15] ss:$0 sm:$0xff] }
 0xd38   : > { %v3655_v30 = vrot.slane %v3641_v26, %v5106_v54  ;;  %v3671_v31 = vrot.slane %v3657_v28, %v5106_v54  ;;  %v3648_v32 = vrot.slane %v3640_v56, %v5106_v54  ;;  %v3664_v33 = vrot.slane %v3656_v29, %v5106_v54 }
 0xd3a   : > { %v3674_v25 = vcombine.low %v3655_v30, %v3671_v31  ;;  %v3673_v27 = vcombine.high %v3648_v32, %v3664_v33  ;;  %v3675_v16 = vcombine.high %v3655_v30, %v3671_v31  ;;  %v3672_v47 = vcombine.low %v3648_v32, %v3664_v33 }
 0xd3c   : > { %3681 = vrot.lane.b32.xlu1 %v3674_v25, %s4773_s2  ;;  %3677 = vrot.lane.b32.xlu0 %v3673_v27, %s4774_s8 }
 0xd40   : > { %3685 = vrot.lane.b32.xlu1 %v3675_v16, %s4775_s29  ;;  %s5660_s29 = sld [smem:[#allocation25_spill]] }
 0xd46   : > { %s5661_s6 = scalar_lea.vmem %s5660_s29, %s4937_s0 }
 0xd47   : > { %v4342_v59 = vld [vmem:[%s5661_s6] ss:$0 sm:$0xff] }
 0xdae   : > { %v3682_v35 = vpop.permute.xlu1 %3681  ;;  %v3678_v36 = vpop.permute.xlu0 %3677 }
 0xdaf   : > { %v3688_v38 = vsel %vm1786_vm3, %v3672_v47, %v3678_v36  ;;  %v4354_v36 = vld [vmem:[%s1076_s23] ss:$0 sm:$0xff] }
 0xdb0   : > { %v3689_v40 = vsel %vm2361_vm10, %v3688_v38, %v3682_v35 }
 0xdb2   : > { %v3686_v39 = vpop.permute.xlu1 %3685 }
 0xdb3   : > { %v3690_v54 = vsel %vm2363_vm11, %v3689_v40, %v3686_v39  ;;  %v4355_v39 = vld [vmem:[%s1079_s17] ss:$0 sm:$0xff] }
 0xdb4   : > { %v3696_v20 = vpack.c.bf16 %v3690_v54, %v3690_v54 }
 0xdb6   : > { %4583 = vmatmul.mubr.msk.bf16.vlgmr.msra.gmra.mrb[44].mxu1 %vm1176_vm2, %v3696_v20 }
 0xdb7   : > { %4602 = vmatprep.mubr.msk.bf16.mxu1 %vm4765_vm1, %v4764_v17  ;;  %4595 = vmatpush3.bf16.msra.mxu1 %v4680_v2 }
 0xdb8   : > { %4596 = vmatprep.subr.bf16.mxu1 %v4764_v17 }
 0xdbb   : > { %4597 = vmatpush3.bf16.msra.mxu1 %v4681_v3 }
 0xdbc   : > { %4598 = vmatprep.subr.bf16.mxu1 %v4764_v17 }
 0xdbf   : > { %4599 = vmatpush3.bf16.msra.mxu1 %v4682_v4 }
 0xdc0   : > { %4600 = vmatprep.subr.bf16.mxu1 %v4764_v17 }
 0xdc3   : > { %4601 = vmatpush3.bf16.msra.mxu1 %v4683_v5 }
 0xe89   : > { %v3752_v44 = vpop.f32.mrb[44].mxu1 }
 0xe8a   : > { %v3753_v45 = vadd.f32 %v4338_v43, %v3752_v44  ;;  %v4584_v37 = vpop.f32.mrb[45].mxu1 }
 0xe8b   : > { %v3755_v46 = vpop.f32.mrb[46].mxu1 }
 0xe8c   : > { %v4585_v42 = vpop.f32.mrb[47].mxu1  ;;  %v3758_v34 = vadd.f32 %v3753_v45, %v5309_v63 }
 0xe8e   : > { %v3761_v48 = vsel %vm1176_vm2, %v3758_v34, 0.0 }
 0xe8f   : > { %3762 = vadd.xlane.f32.xlu0 %v3761_v48 }
 0xf1c   : > { %v3763_v18 = vpop.xlane.xlu0 %3762 }
 0xf1d   : > { %v3764_v49 = vmul.f32 0.03125, %v3763_v18 }
 0xf1f   : > { %v3765_v41 = vsub.f32 %v3758_v34, %v3764_v49 }
 0xf21   : > { %v3766_v50 = vmul.f32 %v3765_v41, %v3765_v41 }
 0xf23   : > { %v3767_v51 = vsel %vm1176_vm2, %v3766_v50, 0.0 }
 0xf24   : > { %3768 = vadd.xlane.f32.xlu1 %v3767_v51 }
 0xfb1   : > { %v3769_v63 = vpop.xlane.xlu1 %3768 }
 0xfb2   : > { %v3770_v55 = vmul.f32 0.03125, %v3769_v63 }
 0xfb4   : > { %v3771_v57 = vadd.f32 1e-05, %v3770_v55 }
 0xfb6   : > { %4718 = vrsqrt.f32 %v3771_v57 }
 0xfc0   : > { %v4719_v58 = vpop.eup %4718 }
 0xfc1   : > { %v3773_v60 = vmul.f32 %v4719_v58, %v3765_v41 }
 0xfc3   : > { %v3780_v62 = vmul.f32 %v4342_v59, %v3773_v60 }
 0xfc5   : > { %v3787_v0 = vadd.f32 %v4343_v61, %v3780_v62 }
 0xfc7   : > { %v3793_v1 = vpack.c.bf16 %v3787_v0, %v3787_v0 }
 0xfc9   : > { %4591 = vmatmul.mubr.msk.bf16.vlgmr.msra.gmra.mrb[48].mxu0 %vm1176_vm2, %v3793_v1 }
0x109c   : > { %v3849_v9 = vpop.f32.mrb[48].mxu0 }
0x109d   : > { %v3850_v10 = vadd.f32 %v4344_v8, %v3849_v9  ;;  %v4592_v11 = vpop.f32.mrb[49].mxu0 }
0x109e   : > { %v3852_v12 = vpop.f32.mrb[50].mxu0 }
0x109f   : > { %v3856_v13 = vmul.f32 0.70710677, %v3850_v10  ;;  %v4593_v14 = vpop.f32.mrb[51].mxu0  ;;  %v3855_v6 = vmul.f32 0.5, %v3850_v10 }
0x10a1   : > { %4720 = verf.f32 %v3856_v13 }
0x10ab   : > { %v4721_v15 = vpop.eup %4720 }
0x10ac   : > { %v3858_v7 = vadd.f32 1.0, %v4721_v15 }
0x10ae   : > { %v3859_v19 = vmul.f32 %v3858_v7, %v3855_v6 }
0x10b0   : > { %v3869_v17 = vpack.c.bf16 %v3859_v19, %v3859_v19 }
0x10b2   : > { %4603 = vmatmul.mubr.msk.bf16.vlgmr.msra.gmra.mrb[48].mxu1 %vm3900_vm12, %v3869_v17 }
0x1185   : > { %v3938_v22 = vpop.f32.mrb[48].mxu1 }
0x1186   : > { %v3939_v23 = vadd.f32 %v4348_v21, %v3938_v22  ;;  %v4604_v24 = vpop.f32.mrb[49].mxu1 }
0x1187   : > { %v3941_v26 = vpop.f32.mrb[50].mxu1 }
0x1188   : > { %v4605_v28 = vpop.f32.mrb[51].mxu1  ;;  %v3944_v56 = vadd.f32 %v3939_v23, %v3787_v0 }
0x118a   : > { %v3947_v29 = vsel %vm1176_vm2, %v3944_v56, 0.0 }
0x118b   : > { %3948 = vadd.xlane.f32.xlu0 %v3947_v29 }
0x1218   : > { %v3949_v30 = vpop.xlane.xlu0 %3948 }
0x1219   : > { %v3950_v31 = vmul.f32 0.03125, %v3949_v30 }
0x121b   : > { %v3951_v32 = vsub.f32 %v3944_v56, %v3950_v31 }
0x121d   : > { %v3952_v33 = vmul.f32 %v3951_v32, %v3951_v32 }
0x121f   : > { %v3953_v25 = vsel %vm1176_vm2, %v3952_v33, 0.0 }
0x1220   : > { %3954 = vadd.xlane.f32.xlu0 %v3953_v25 }
0x12ad   : > { %v3955_v27 = vpop.xlane.xlu0 %3954 }
0x12ae   : > { %v3956_v16 = vmul.f32 0.03125, %v3955_v27 }
0x12b0   : > { %v3957_v47 = vadd.f32 1e-05, %v3956_v16 }
0x12b2   : > { %4722 = vrsqrt.f32 %v3957_v47 }
0x12bc   : > { %v4723_v35 = vpop.eup %4722 }
0x12bd   : > { %v3959_v38 = vmul.f32 %v4723_v35, %v3951_v32 }
0x12bf   : > { %v3966_v40 = vmul.f32 %v4354_v36, %v3959_v38 }
0x12c1   : > { %v3973_v54 = vadd.f32 %v4355_v39, %v3966_v40 }
0x12c3   : > { %3974 = vst.msk [vmem:[%s5046_s14] sm:$0xff] %vm1176_vm2, %v3973_v54 }
0x12c4 PF: > { %s5669_s27 = sld [smem:[#allocation5_spill]]  ;;  %s5670_s5 = sld [smem:[#allocation3_spill]] }
0x12c5   : > { %s5671_s26 = sld [smem:[#allocation4_spill]]  ;;  %s5673_s28 = sld [smem:[#allocation7_spill]] }
0x12ca   : > { %s34_s6 = sadd.s32 1, %s5669_s27   ;;  %s5672_s27 = sld [smem:[#allocation6_spill]] }
0x12cb   : > { %p31_p8 = scmp.ge.s32.totalorder %s34_s6, 6  }
0x12cd   :  { %33 = sbr.rel (!%p31_p8) target bundleno = 23 (0x17), region = 213 }

</bundles_post_ra>
